<compile_context>
chip_gen: v7x
topology: tpu7x:2x2x1
jax: 0.10.0
libtpu: 0.0.40
codegen_flags: <defaults>
</compile_context>

<pallas_src>
import jax
import jax.numpy as jnp
from jax.experimental import pallas as pl
from jax.experimental.pallas import tpu as pltpu

LANE = 128                      # lane-dense output width
TM_CAP = 512                    # max rows per grid step (keeps VMEM small)
VMEM_LIMIT = 32 * 1024 * 1024   # explicit scoped-VMEM budget (fits all gens)


def _compiler_params():
    return pltpu.CompilerParams(
        dimension_semantics=("parallel",),
        vmem_limit_bytes=VMEM_LIMIT,
    )


def _choose_tm(m):
    # Single full block when small (full-dim exemption from the (8,128) rule),
    # otherwise a multiple-of-8 tile; pl.cdiv handles the ragged last block.
    return m if m <= TM_CAP else TM_CAP


# ----------------------------------------------------------------------------
# Pallas kernels
# ----------------------------------------------------------------------------
def _conv_pool_kernel(p00_ref, p01_ref, p10_ref, p11_ref, w_ref, b_ref, o_ref):
    """relu(max_{4 pool positions}(patches @ w) + b), stored 128-lane dense."""
    w = w_ref[...]
    a = jnp.dot(p00_ref[...], w, preferred_element_type=jnp.float32)
    b0 = jnp.dot(p01_ref[...], w, preferred_element_type=jnp.float32)
    c = jnp.dot(p10_ref[...], w, preferred_element_type=jnp.float32)
    d = jnp.dot(p11_ref[...], w, preferred_element_type=jnp.float32)
    m = jnp.maximum(jnp.maximum(a, b0), jnp.maximum(c, d))      # 2x2 max-pool
    y = jnp.maximum(m + b_ref[...], 0.0)                        # bias + ReLU (f32)
    o_ref[...] = y.astype(o_ref.dtype)


def _linear_kernel(x_ref, w_ref, b_ref, o_ref):
    acc = jnp.dot(x_ref[...], w_ref[...], preferred_element_type=jnp.float32)
    o_ref[...] = (acc + b_ref[...]).astype(o_ref.dtype)


# ----------------------------------------------------------------------------
# Pallas wrappers (M-tiled, pipelined, lane-dense outputs)
# ----------------------------------------------------------------------------
def conv_relu_pool_matmul(p00, p01, p10, p11, w, b, *, out_dtype):
    """Fused (im2col'd) conv + bias + ReLU + 2x2 max-pool."""
    M, K = p00.shape
    _, NP = w.shape
    tm = _choose_tm(M)
    grid = (pl.cdiv(M, tm),)
    cost = pl.CostEstimate(
        flops=int(2 * 4 * M * K * NP),
        transcendentals=0,
        bytes_accessed=int(4 * M * K * 2 + K * NP * 2 + LANE * 4 + M * NP * 2),
    )
    row_spec = pl.BlockSpec((tm, K), lambda i: (i, 0))
    return pl.pallas_call(
        _conv_pool_kernel,
        out_shape=jax.ShapeDtypeStruct((M, NP), out_dtype),
        grid=grid,
        in_specs=[row_spec, row_spec, row_spec, row_spec,
                  pl.BlockSpec((K, NP), lambda i: (0, 0)),
                  pl.BlockSpec((1, NP), lambda i: (0, 0))],
        out_specs=pl.BlockSpec((tm, NP), lambda i: (i, 0)),
        compiler_params=_compiler_params(),
        cost_estimate=cost,
    )(p00, p01, p10, p11, w, b)


def linear_matmul(x, w, b, *, out_dtype):
    M, K = x.shape
    _, NP = w.shape
    tm = _choose_tm(M)
    grid = (pl.cdiv(M, tm),)
    cost = pl.CostEstimate(
        flops=int(2 * M * K * NP),
        transcendentals=0,
        bytes_accessed=int(M * K * 2 + K * NP * 2 + LANE * 4 + M * NP * 4),
    )
    return pl.pallas_call(
        _linear_kernel,
        out_shape=jax.ShapeDtypeStruct((M, NP), out_dtype),
        grid=grid,
        in_specs=[pl.BlockSpec((tm, K), lambda i: (i, 0)),
                  pl.BlockSpec((K, NP), lambda i: (0, 0)),
                  pl.BlockSpec((1, NP), lambda i: (0, 0))],
        out_specs=pl.BlockSpec((tm, NP), lambda i: (i, 0)),
        compiler_params=_compiler_params(),
        cost_estimate=cost,
    )(x, w, b)


# ----------------------------------------------------------------------------
# Plain-JAX glue: im2col patches grouped by 2x2 pooling position
# ----------------------------------------------------------------------------
def pooled_patches(x_nhwc, k, pad):
    """Returns 4 patch matrices P[oh][ow] of shape [N*Ho*Wo, k*k*C]; row r of
    each corresponds to pooling window r, columns ordered (kh, kw, cin)."""
    N, H, W, C = x_nhwc.shape
    Ho, Wo = H // 2, W // 2
    xp = jnp.pad(x_nhwc, ((0, 0), (pad, pad), (pad, pad), (0, 0)))
    outs = []
    for (oh, ow) in ((0, 0), (0, 1), (1, 0), (1, 1)):
        cols = []
        for di in range(k):
            for dj in range(k):
                cols.append(xp[:, oh + di:oh + di + H:2, ow + dj:ow + dj + W:2, :])
        p = jnp.stack(cols, axis=3)                       # [N, Ho, Wo, k*k, C]
        outs.append(p.reshape(N * Ho * Wo, k * k * C))
    return outs


# ----------------------------------------------------------------------------
# Parameter init (deterministic, PyTorch-shaped) and one-time preparation
# ----------------------------------------------------------------------------
def init_params(key):
    ks = jax.random.split(key, 6)

    def uni(k, shape, fan_in):
        bound = 1.0 / jnp.sqrt(float(fan_in))
        return jax.random.uniform(k, shape, jnp.float32, -bound, bound)

    return {
        # Conv1: Conv2d(1, 16, 5, stride=1, padding=2)
        "conv1_w": uni(ks[0], (16, 1, 5, 5), 1 * 5 * 5),
        "conv1_b": uni(ks[1], (16,), 1 * 5 * 5),
        # Conv2: Conv2d(16, 32, 5, stride=1, padding=2)
        "conv2_w": uni(ks[2], (32, 16, 5, 5), 16 * 5 * 5),
        "conv2_b": uni(ks[3], (32,), 16 * 5 * 5),
        # fc1: Linear(7*7*32 = 1568, 10)
        "fc1_w": uni(ks[4], (10, 1568), 1568),
        "fc1_b": uni(ks[5], (10,), 1568),
    }


def prepare_params(params):
    """One-time weight prep: torch layout -> matmul layout, pad Cout->128,
    cast MXU operands to bf16 (bias stays f32 for the f32 epilogue)."""
    def prep_conv(w, b):
        cout, cin, k, _ = w.shape
        wm = jnp.transpose(w, (2, 3, 1, 0)).reshape(k * k * cin, cout)  # (kh,kw,cin)
        wm = jnp.pad(wm, ((0, 0), (0, LANE - cout))).astype(jnp.bfloat16)
        bp = jnp.pad(b, (0, LANE - cout)).astype(jnp.float32).reshape(1, LANE)
        return wm, bp

    w1, b1 = prep_conv(params["conv1_w"], params["conv1_b"])
    w2, b2 = prep_conv(params["conv2_w"], params["conv2_b"])
    nf = params["fc1_w"].shape[0]
    wf = jnp.pad(params["fc1_w"].T, ((0, 0), (0, LANE - nf))).astype(jnp.bfloat16)
    bf = jnp.pad(params["fc1_b"], (0, LANE - nf)).astype(jnp.float32).reshape(1, LANE)
    return {"w1": w1, "b1": b1, "w2": w2, "b2": b2, "wf": wf, "bf": bf}


# ----------------------------------------------------------------------------
# Forward pass
# ----------------------------------------------------------------------------
def cnn_forward(x_nchw, prep):
    x = jnp.transpose(x_nchw, (0, 2, 3, 1)).astype(jnp.bfloat16)   # NCHW -> NHWC
    N, H, W, _ = x.shape

    # --- Conv1(1->16, k5, p2) + ReLU + MaxPool2 ---> [N, 14, 14, 16] ----------
    p = pooled_patches(x, 5, 2)
    y1 = conv_relu_pool_matmul(*p, prep["w1"], prep["b1"], out_dtype=jnp.bfloat16)
    y1 = y1[:, :16].reshape(N, H // 2, W // 2, 16)

    # --- Conv2(16->32, k5, p2) + ReLU + MaxPool2 ---> [N, 7, 7, 32] -----------
    p = pooled_patches(y1, 5, 2)
    y2 = conv_relu_pool_matmul(*p, prep["w2"], prep["b2"], out_dtype=jnp.bfloat16)
    y2 = y2[:, :32].reshape(N, H // 4, W // 4, 32)

    # --- fc1 (PyTorch flattens in NCHW = (C, H, W) order) ---------------------
    flat = jnp.transpose(y2, (0, 3, 1, 2)).reshape(N, 32 * (H // 4) * (W // 4))
    logits = linear_matmul(flat, prep["wf"], prep["bf"], out_dtype=jnp.float32)
    return logits[:, :10]                                           # [N, 10]


if __name__ == "__main__":
    key = jax.random.PRNGKey(0)
    k_param, k_x = jax.random.split(key)
    params = init_params(k_param)
    prep = prepare_params(params)          # hoisted one-time weight preparation

    # Input must be 1x28x28 (MNIST) so fc1's 1568-dim flatten matches; batch=8
    # also exercises the multi-tile (ragged-edge) path of the conv1 kernel.
    x = jax.random.normal(k_x, (8, 1, 28, 28), dtype=jnp.float32)

    logits = jax.jit(cnn_forward)(x, prep)
    jax.block_until_ready(logits)
    assert logits.shape == (8, 10) and logits.dtype == jnp.float32
    print("KERNEL_OK")
</pallas_src>

<mosaic_0001>
module attributes {stable_mosaic.version = 11 : i64} {
  func.func @_conv_pool_kernel(%arg0: i32, %arg1: memref<512x25xbf16, #tpu.memory_space<vmem>>, %arg2: memref<512x25xbf16, #tpu.memory_space<vmem>>, %arg3: memref<512x25xbf16, #tpu.memory_space<vmem>>, %arg4: memref<512x25xbf16, #tpu.memory_space<vmem>>, %arg5: memref<25x128xbf16, #tpu.memory_space<vmem>>, %arg6: memref<1x128xf32, #tpu.memory_space<vmem>>, %arg7: memref<512x128xbf16, #tpu.memory_space<vmem>>) attributes {dimension_semantics = [#tpu.dimension_semantics<parallel>], iteration_bounds = array<i64: 4>, scalar_prefetch = 0 : i64, scratch_operands = 0 : i64, tpu.core_type = #tpu.core_type<tc>, window_params = [{transform_indices = @transform_0, window_bounds = array<i64: 512, 25>}, {transform_indices = @transform_1, window_bounds = array<i64: 512, 25>}, {transform_indices = @transform_2, window_bounds = array<i64: 512, 25>}, {transform_indices = @transform_3, window_bounds = array<i64: 512, 25>}, {pipeline_mode = #tpu.pipeline_mode<synchronous>, transform_indices = @transform_4, window_bounds = array<i64: 25, 128>}, {pipeline_mode = #tpu.pipeline_mode<synchronous>, transform_indices = @transform_5, window_bounds = array<i64: 1, 128>}, {transform_indices = @transform_6, window_bounds = array<i64: 512, 128>}]} {
    %c0 = arith.constant 0 : index
    %c0_0 = arith.constant 0 : index
    %0 = vector.load %arg5[%c0, %c0_0] : memref<25x128xbf16, #tpu.memory_space<vmem>>, vector<25x128xbf16>
    %c0_1 = arith.constant 0 : index
    %c0_2 = arith.constant 0 : index
    %1 = vector.load %arg1[%c0_1, %c0_2] : memref<512x25xbf16, #tpu.memory_space<vmem>>, vector<512x25xbf16>
    %cst = arith.constant dense<0.000000e+00> : vector<512x128xf32>
    %2 = tpu.matmul %1, %0, %cst {dimension_numbers = #tpu.dot_dimension_numbers<[1], [0], [0], [1], [0, 0, 1, 1], [], []>} : vector<512x25xbf16>, vector<25x128xbf16>, vector<512x128xf32> -> vector<512x128xf32>
    %c0_3 = arith.constant 0 : index
    %c0_4 = arith.constant 0 : index
    %3 = vector.load %arg2[%c0_3, %c0_4] : memref<512x25xbf16, #tpu.memory_space<vmem>>, vector<512x25xbf16>
    %cst_5 = arith.constant dense<0.000000e+00> : vector<512x128xf32>
    %4 = tpu.matmul %3, %0, %cst_5 {dimension_numbers = #tpu.dot_dimension_numbers<[1], [0], [0], [1], [0, 0, 1, 1], [], []>} : vector<512x25xbf16>, vector<25x128xbf16>, vector<512x128xf32> -> vector<512x128xf32>
    %c0_6 = arith.constant 0 : index
    %c0_7 = arith.constant 0 : index
    %5 = vector.load %arg3[%c0_6, %c0_7] : memref<512x25xbf16, #tpu.memory_space<vmem>>, vector<512x25xbf16>
    %cst_8 = arith.constant dense<0.000000e+00> : vector<512x128xf32>
    %6 = tpu.matmul %5, %0, %cst_8 {dimension_numbers = #tpu.dot_dimension_numbers<[1], [0], [0], [1], [0, 0, 1, 1], [], []>} : vector<512x25xbf16>, vector<25x128xbf16>, vector<512x128xf32> -> vector<512x128xf32>
    %c0_9 = arith.constant 0 : index
    %c0_10 = arith.constant 0 : index
    %7 = vector.load %arg4[%c0_9, %c0_10] : memref<512x25xbf16, #tpu.memory_space<vmem>>, vector<512x25xbf16>
    %cst_11 = arith.constant dense<0.000000e+00> : vector<512x128xf32>
    %8 = tpu.matmul %7, %0, %cst_11 {dimension_numbers = #tpu.dot_dimension_numbers<[1], [0], [0], [1], [0, 0, 1, 1], [], []>} : vector<512x25xbf16>, vector<25x128xbf16>, vector<512x128xf32> -> vector<512x128xf32>
    %9 = arith.maximumf %2, %4 : vector<512x128xf32>
    %10 = arith.maximumf %6, %8 : vector<512x128xf32>
    %11 = arith.maximumf %9, %10 : vector<512x128xf32>
    %c0_12 = arith.constant 0 : index
    %c0_13 = arith.constant 0 : index
    %12 = vector.load %arg6[%c0_12, %c0_13] : memref<1x128xf32, #tpu.memory_space<vmem>>, vector<1x128xf32>
    %13 = vector.broadcast %12 : vector<1x128xf32> to vector<512x128xf32>
    %14 = arith.addf %11, %13 : vector<512x128xf32>
    %cst_14 = arith.constant 0.000000e+00 : f32
    %15 = vector.broadcast %cst_14 : f32 to vector<512x128xf32>
    %16 = arith.maximumf %14, %15 : vector<512x128xf32>
    %17 = arith.truncf %16 : vector<512x128xf32> to vector<512x128xbf16>
    %c0_15 = arith.constant 0 : index
    %c0_16 = arith.constant 0 : index
    %18 = vector.load %arg7[%c0_15, %c0_16] : memref<512x128xbf16, #tpu.memory_space<vmem>>, vector<512x128xbf16>
    tpu.vector_store %arg7[%c0_15, %c0_16], %17 {strides = array<i32>} : memref<512x128xbf16, #tpu.memory_space<vmem>>, vector<512x128xbf16>,
    return
  }
  func.func @transform_0(%arg0: i32) -> (i32, i32) {
    %c0_i32 = arith.constant 0 : i32
    %c0_i32_0 = arith.constant 0 : i32
    return %arg0, %c0_i32 : i32, i32
  }
  func.func @transform_1(%arg0: i32) -> (i32, i32) {
    %c0_i32 = arith.constant 0 : i32
    %c0_i32_0 = arith.constant 0 : i32
    return %arg0, %c0_i32 : i32, i32
  }
  func.func @transform_2(%arg0: i32) -> (i32, i32) {
    %c0_i32 = arith.constant 0 : i32
    %c0_i32_0 = arith.constant 0 : i32
    return %arg0, %c0_i32 : i32, i32
  }
  func.func @transform_3(%arg0: i32) -> (i32, i32) {
    %c0_i32 = arith.constant 0 : i32
    %c0_i32_0 = arith.constant 0 : i32
    return %arg0, %c0_i32 : i32, i32
  }
  func.func @transform_4(%arg0: i32) -> (i32, i32) {
    %c0_i32 = arith.constant 0 : i32
    %c0_i32_0 = arith.constant 0 : i32
    %c0_i32_1 = arith.constant 0 : i32
    return %c0_i32, %c0_i32_0 : i32, i32
  }
  func.func @transform_5(%arg0: i32) -> (i32, i32) {
    %c0_i32 = arith.constant 0 : i32
    %c0_i32_0 = arith.constant 0 : i32
    %c0_i32_1 = arith.constant 0 : i32
    return %c0_i32, %c0_i32_0 : i32, i32
  }
  func.func @transform_6(%arg0: i32) -> (i32, i32) {
    %c0_i32 = arith.constant 0 : i32
    %c0_i32_0 = arith.constant 0 : i32
    return %arg0, %c0_i32 : i32, i32
  }
}

module attributes {stable_mosaic.version = 11 : i64} {
  func.func @_conv_pool_kernel(%arg0: i32, %arg1: memref<392x400xbf16, #tpu.memory_space<vmem>>, %arg2: memref<392x400xbf16, #tpu.memory_space<vmem>>, %arg3: memref<392x400xbf16, #tpu.memory_space<vmem>>, %arg4: memref<392x400xbf16, #tpu.memory_space<vmem>>, %arg5: memref<400x128xbf16, #tpu.memory_space<vmem>>, %arg6: memref<1x128xf32, #tpu.memory_space<vmem>>, %arg7: memref<392x128xbf16, #tpu.memory_space<vmem>>) attributes {dimension_semantics = [#tpu.dimension_semantics<parallel>], iteration_bounds = array<i64: 1>, scalar_prefetch = 0 : i64, scratch_operands = 0 : i64, tpu.core_type = #tpu.core_type<tc>, window_params = [{transform_indices = @transform_0, window_bounds = array<i64: 392, 400>}, {transform_indices = @transform_1, window_bounds = array<i64: 392, 400>}, {transform_indices = @transform_2, window_bounds = array<i64: 392, 400>}, {transform_indices = @transform_3, window_bounds = array<i64: 392, 400>}, {pipeline_mode = #tpu.pipeline_mode<synchronous>, transform_indices = @transform_4, window_bounds = array<i64: 400, 128>}, {pipeline_mode = #tpu.pipeline_mode<synchronous>, transform_indices = @transform_5, window_bounds = array<i64: 1, 128>}, {transform_indices = @transform_6, window_bounds = array<i64: 392, 128>}]} {
    %c0 = arith.constant 0 : index
    %c0_0 = arith.constant 0 : index
    %0 = vector.load %arg5[%c0, %c0_0] : memref<400x128xbf16, #tpu.memory_space<vmem>>, vector<400x128xbf16>
    %c0_1 = arith.constant 0 : index
    %c0_2 = arith.constant 0 : index
    %1 = vector.load %arg1[%c0_1, %c0_2] : memref<392x400xbf16, #tpu.memory_space<vmem>>, vector<392x400xbf16>
    %cst = arith.constant dense<0.000000e+00> : vector<392x128xf32>
    %2 = tpu.matmul %1, %0, %cst {dimension_numbers = #tpu.dot_dimension_numbers<[1], [0], [0], [1], [0, 0, 1, 1], [], []>} : vector<392x400xbf16>, vector<400x128xbf16>, vector<392x128xf32> -> vector<392x128xf32>
    %c0_3 = arith.constant 0 : index
    %c0_4 = arith.constant 0 : index
    %3 = vector.load %arg2[%c0_3, %c0_4] : memref<392x400xbf16, #tpu.memory_space<vmem>>, vector<392x400xbf16>
    %cst_5 = arith.constant dense<0.000000e+00> : vector<392x128xf32>
    %4 = tpu.matmul %3, %0, %cst_5 {dimension_numbers = #tpu.dot_dimension_numbers<[1], [0], [0], [1], [0, 0, 1, 1], [], []>} : vector<392x400xbf16>, vector<400x128xbf16>, vector<392x128xf32> -> vector<392x128xf32>
    %c0_6 = arith.constant 0 : index
    %c0_7 = arith.constant 0 : index
    %5 = vector.load %arg3[%c0_6, %c0_7] : memref<392x400xbf16, #tpu.memory_space<vmem>>, vector<392x400xbf16>
    %cst_8 = arith.constant dense<0.000000e+00> : vector<392x128xf32>
    %6 = tpu.matmul %5, %0, %cst_8 {dimension_numbers = #tpu.dot_dimension_numbers<[1], [0], [0], [1], [0, 0, 1, 1], [], []>} : vector<392x400xbf16>, vector<400x128xbf16>, vector<392x128xf32> -> vector<392x128xf32>
    %c0_9 = arith.constant 0 : index
    %c0_10 = arith.constant 0 : index
    %7 = vector.load %arg4[%c0_9, %c0_10] : memref<392x400xbf16, #tpu.memory_space<vmem>>, vector<392x400xbf16>
    %cst_11 = arith.constant dense<0.000000e+00> : vector<392x128xf32>
    %8 = tpu.matmul %7, %0, %cst_11 {dimension_numbers = #tpu.dot_dimension_numbers<[1], [0], [0], [1], [0, 0, 1, 1], [], []>} : vector<392x400xbf16>, vector<400x128xbf16>, vector<392x128xf32> -> vector<392x128xf32>
    %9 = arith.maximumf %2, %4 : vector<392x128xf32>
    %10 = arith.maximumf %6, %8 : vector<392x128xf32>
    %11 = arith.maximumf %9, %10 : vector<392x128xf32>
    %c0_12 = arith.constant 0 : index
    %c0_13 = arith.constant 0 : index
    %12 = vector.load %arg6[%c0_12, %c0_13] : memref<1x128xf32, #tpu.memory_space<vmem>>, vector<1x128xf32>
    %13 = vector.broadcast %12 : vector<1x128xf32> to vector<392x128xf32>
    %14 = arith.addf %11, %13 : vector<392x128xf32>
    %cst_14 = arith.constant 0.000000e+00 : f32
    %15 = vector.broadcast %cst_14 : f32 to vector<392x128xf32>
    %16 = arith.maximumf %14, %15 : vector<392x128xf32>
    %17 = arith.truncf %16 : vector<392x128xf32> to vector<392x128xbf16>
    %c0_15 = arith.constant 0 : index
    %c0_16 = arith.constant 0 : index
    %18 = vector.load %arg7[%c0_15, %c0_16] : memref<392x128xbf16, #tpu.memory_space<vmem>>, vector<392x128xbf16>
    tpu.vector_store %arg7[%c0_15, %c0_16], %17 {strides = array<i32>} : memref<392x128xbf16, #tpu.memory_space<vmem>>, vector<392x128xbf16>,
    return
  }
  func.func @transform_0(%arg0: i32) -> (i32, i32) {
    %c0_i32 = arith.constant 0 : i32
    %c0_i32_0 = arith.constant 0 : i32
    return %arg0, %c0_i32 : i32, i32
  }
  func.func @transform_1(%arg0: i32) -> (i32, i32) {
    %c0_i32 = arith.constant 0 : i32
    %c0_i32_0 = arith.constant 0 : i32
    return %arg0, %c0_i32 : i32, i32
  }
  func.func @transform_2(%arg0: i32) -> (i32, i32) {
    %c0_i32 = arith.constant 0 : i32
    %c0_i32_0 = arith.constant 0 : i32
    return %arg0, %c0_i32 : i32, i32
  }
  func.func @transform_3(%arg0: i32) -> (i32, i32) {
    %c0_i32 = arith.constant 0 : i32
    %c0_i32_0 = arith.constant 0 : i32
    return %arg0, %c0_i32 : i32, i32
  }
  func.func @transform_4(%arg0: i32) -> (i32, i32) {
    %c0_i32 = arith.constant 0 : i32
    %c0_i32_0 = arith.constant 0 : i32
    %c0_i32_1 = arith.constant 0 : i32
    return %c0_i32, %c0_i32_0 : i32, i32
  }
  func.func @transform_5(%arg0: i32) -> (i32, i32) {
    %c0_i32 = arith.constant 0 : i32
    %c0_i32_0 = arith.constant 0 : i32
    %c0_i32_1 = arith.constant 0 : i32
    return %c0_i32, %c0_i32_0 : i32, i32
  }
  func.func @transform_6(%arg0: i32) -> (i32, i32) {
    %c0_i32 = arith.constant 0 : i32
    %c0_i32_0 = arith.constant 0 : i32
    return %arg0, %c0_i32 : i32, i32
  }
}

module attributes {stable_mosaic.version = 11 : i64} {
  func.func @_linear_kernel(%arg0: i32, %arg1: memref<8x1568xbf16, #tpu.memory_space<vmem>>, %arg2: memref<1568x128xbf16, #tpu.memory_space<vmem>>, %arg3: memref<1x128xf32, #tpu.memory_space<vmem>>, %arg4: memref<8x128xf32, #tpu.memory_space<vmem>>) attributes {dimension_semantics = [#tpu.dimension_semantics<parallel>], iteration_bounds = array<i64: 1>, scalar_prefetch = 0 : i64, scratch_operands = 0 : i64, tpu.core_type = #tpu.core_type<tc>, window_params = [{transform_indices = @transform_0, window_bounds = array<i64: 8, 1568>}, {pipeline_mode = #tpu.pipeline_mode<synchronous>, transform_indices = @transform_1, window_bounds = array<i64: 1568, 128>}, {pipeline_mode = #tpu.pipeline_mode<synchronous>, transform_indices = @transform_2, window_bounds = array<i64: 1, 128>}, {transform_indices = @transform_3, window_bounds = array<i64: 8, 128>}]} {
    %c0 = arith.constant 0 : index
    %c0_0 = arith.constant 0 : index
    %0 = vector.load %arg1[%c0, %c0_0] : memref<8x1568xbf16, #tpu.memory_space<vmem>>, vector<8x1568xbf16>
    %c0_1 = arith.constant 0 : index
    %c0_2 = arith.constant 0 : index
    %1 = vector.load %arg2[%c0_1, %c0_2] : memref<1568x128xbf16, #tpu.memory_space<vmem>>, vector<1568x128xbf16>
    %cst = arith.constant dense<0.000000e+00> : vector<8x128xf32>
    %2 = tpu.matmul %0, %1, %cst {dimension_numbers = #tpu.dot_dimension_numbers<[1], [0], [0], [1], [0, 0, 1, 1], [], []>} : vector<8x1568xbf16>, vector<1568x128xbf16>, vector<8x128xf32> -> vector<8x128xf32>
    %c0_3 = arith.constant 0 : index
    %c0_4 = arith.constant 0 : index
    %3 = vector.load %arg3[%c0_3, %c0_4] : memref<1x128xf32, #tpu.memory_space<vmem>>, vector<1x128xf32>
    %4 = vector.broadcast %3 : vector<1x128xf32> to vector<8x128xf32>
    %5 = arith.addf %2, %4 : vector<8x128xf32>
    %c0_5 = arith.constant 0 : index
    %c0_6 = arith.constant 0 : index
    %6 = vector.load %arg4[%c0_5, %c0_6] : memref<8x128xf32, #tpu.memory_space<vmem>>, vector<8x128xf32>
    tpu.vector_store %arg4[%c0_5, %c0_6], %5 {strides = array<i32>} : memref<8x128xf32, #tpu.memory_space<vmem>>, vector<8x128xf32>,
    return
  }
  func.func @transform_0(%arg0: i32) -> (i32, i32) {
    %c0_i32 = arith.constant 0 : i32
    %c0_i32_0 = arith.constant 0 : i32
    return %arg0, %c0_i32 : i32, i32
  }
  func.func @transform_1(%arg0: i32) -> (i32, i32) {
    %c0_i32 = arith.constant 0 : i32
    %c0_i32_0 = arith.constant 0 : i32
    %c0_i32_1 = arith.constant 0 : i32
    return %c0_i32, %c0_i32_0 : i32, i32
  }
  func.func @transform_2(%arg0: i32) -> (i32, i32) {
    %c0_i32 = arith.constant 0 : i32
    %c0_i32_0 = arith.constant 0 : i32
    %c0_i32_1 = arith.constant 0 : i32
    return %c0_i32, %c0_i32_0 : i32, i32
  }
  func.func @transform_3(%arg0: i32) -> (i32, i32) {
    %c0_i32 = arith.constant 0 : i32
    %c0_i32_0 = arith.constant 0 : i32
    return %arg0, %c0_i32 : i32, i32
  }
}

</mosaic_0001>

<bundles_post_ra>
// kernel: cnn_forward.3
= control target key start
LH: loop header
LB: loop body
LE: loop exit
PB: predicated region body
PF: predicated region fallthrough
CT: control target
= control target key end

     0   :  { %s5370_s21 = smov 0   ;;  %s5372_s22 = smov 0   ;;  %s6571_s0 = inlined_call_operand.vmem [shape: bf16[1568,25], index: 0, kind: input, shape index: {}]   ;;  %s6572_s1 = inlined_call_operand.vmem [shape: bf16[1568,25], index: 1, kind: input, shape index: {}]   ;;  %s6573_s2 = inlined_call_operand.vmem [shape: bf16[1568,25], index: 2, kind: input, shape index: {}]   ;;  %s6574_s3 = inlined_call_operand.vmem [shape: bf16[1568,25], index: 3, kind: input, shape index: {}]   ;;  %s6575_s4 = inlined_call_operand.vmem [shape: bf16[25,128], index: 4, kind: input, shape index: {}]   ;;  %s6576_s5 = inlined_call_operand.vmem [shape: f32[1,128], index: 5, kind: input, shape index: {}]   ;;  %s6577_s6 = inlined_call_operand.vmem [shape: bf16[1568,128], index: 6, kind: output, shape index: {}]  }
   0x1   :  { %s5374_s23 = smov 0  }
   0x2 LB: > { %s5383_s24 = sadd.s32 4294967295, %s5300_s23   ;;  %s5385_s25 = sadd.s32 1, %s5300_s23   ;;  %s5300_s23 = sphi %s5374_s23, %s6891_s23   ;;  %s5296_s22 = sphi %s5372_s22, %s6890_s22   ;;  %s5292_s21 = sphi %s5370_s21, %s6889_s21  }
   0x3   : > { %s166_s26 = ssub.s32 %s5300_s23, %s5385_s25  ;;  %s169_s27 = sadd.s32 1, %s5296_s22 }
   0x4   : > { %p167_p0 = scmp.eq.s32.totalorder %s166_s26, 0  ;;  %p179_p1 = scmp.ne.s32.totalorder %s5296_s22, %s5292_s21 }
   0x5   : > { %p180_p2 = scmp.eq.s32.totalorder %s5383_s24, 3  ;;  %p4011_p3 = scmp.ge.s32.totalorder %s5300_s23, 1 }
   0x6   : > { %s5393_s28 = scalar_select %p167_p0, %s5296_s22, %s169_s27  }
   0x7   : > { %p5395_p4 = por %p180_p2, %p179_p1  ;;  %p278_p5 = scmp.lt.s32.totalorder %s5300_s23, 5 }
   0x9   : > { %p279_p6 = pnand %p4011_p3, %p278_p5 }
   0xb   : > { %282 = sbr.rel (%p279_p6) target bundleno = 593 (0x251), region = 44 }
  0x12   : > { %v5116_v0 = vld [vmem:[%s6575_s4] sm:$0xff]   ;;  %vm736_vm0 = vcmask 1043456   ;;  %v5117_v1 = vld [vmem:[%s6575_s4 + $0x8] sm:$0x1f]   ;;  %vm737_vm1 = vcmask 1044480   ;;  %s5406_s10 = sshll.u32 %s5383_s24, 6 }
  0x13   : > { %4755 = vmatprep.subr.bf16.mxu0 %v5116_v0  ;;  %4823 = vmatprep.subr.bf16.mxu1 %v5116_v0  ;;  %v5334_v2 = vmov 65535   ;;  %p343_p7 = scmp.lt.s32.totalorder %s5406_s10, 195  ;;  %vm639_vm2 = vcmask 203776   ;;  %s335_s9 = sand.u32 1, %s5292_s21  }
  0x14   : > { %4756 = vmatpush3.bf16.msra.mxu0 %v5116_v0  ;;  %4824 = vmatpush3.bf16.msra.mxu1 %v5116_v0  ;;  %v738_v3 = vsel %vm736_vm0, 4294967295, %v5334_v2  ;;  %s4425_s13 = sshll.u32 (%p5395_p4), %s5383_s24, 8 }
  0x15   : > { %v739_v4 = vsel %vm737_vm1, %v738_v3, 0  ;;  %s344_s11 = scalar_select %p343_p7, %s5406_s10, 195 }
  0x16   : > { %v741_v5 = vand.u32 %v5117_v1, %v739_v4  ;;  %s6379_s16 = scalar_lea.vmem (%p5395_p4), %s6577_s6, %s4425_s13  }
  0x17   : > { %s5410_s12 = sshll.u32 %s344_s11, 2  ;;  %s4012_s11 = sshll.u32 %s335_s9, 8 }
  0x18   : > { %4757 = vmatprep.subr.bf16.mxu0 %v741_v5  ;;  %4825 = vmatprep.subr.bf16.mxu1 %v741_v5  ;;  %s5416_s15 = scalar_lea.vmem %s6571_s0, %s5410_s12  ;;  %s5422_s18 = scalar_lea.vmem %s6572_s1, %s5410_s12 }
  0x19   : > { %4758 = vmatpush3.bf16.msra.mxu0 %v741_v5  ;;  %4826 = vmatpush3.bf16.msra.mxu1 %v741_v5  ;;  %v5118_v6 = vld [vmem:[%s5416_s15] sm:$0xff]   ;;  %v5120_v8 = vld [vmem:[%s5416_s15 + $0x8] sm:$0xff]   ;;  %v5122_v10 = vld [vmem:[%s5416_s15 + $0x10] sm:$0xff]   ;;  %s5497_s23 = scalar_lea.vmem %s6573_s2, %s5410_s12  ;;  %s5504_s30 = scalar_lea.vmem %s6574_s3, %s5410_s12 }
  0x1a   : > { %4891 = vmatprep.subr.bf16.mxu0 %v5116_v0  ;;  %4959 = vmatprep.subr.bf16.mxu1 %v5116_v0  ;;  %v5119_v7 = vld [vmem:[%s5422_s18] sm:$0xff]   ;;  %v5121_v9 = vld [vmem:[%s5422_s18 + $0x8] sm:$0xff]   ;;  %v5123_v11 = vld [vmem:[%s5422_s18 + $0x10] sm:$0xff]   ;;  %s6104_s21 = scalar_lea.vmem [#allocation2], %s4012_s11   ;;  %s3514_s12 = ssub.s32 (%p5395_p4), 196, %s5406_s10 }
  0x1b   : > { %4759 = vmatprep.mubr.msk.bf16.mxu0 %vm639_vm2, %v5118_v6  ;;  %4827 = vmatprep.mubr.msk.bf16.mxu1 %vm639_vm2, %v5119_v7  ;;  %v5124_v12 = vld [vmem:[%s5416_s15 + $0x18] sm:$0xff]   ;;  %v5126_v14 = vld [vmem:[%s5416_s15 + $0x20] sm:$0xff]   ;;  %v5128_v16 = vld [vmem:[%s5416_s15 + $0x28] sm:$0xff]   ;;  %p3515_p8 = scmp.lt.s32.totalorder (%p5395_p4), %s3514_s12, 64 }
  0x1c   : > { %4760 = vmatmul.mubr.msk.bf16.vlgmr.msra.gmra.mrb[0].mxu0 %vm639_vm2, %v5120_v8  ;;  %4828 = vmatmul.mubr.msk.bf16.vlgmr.msra.gmra.mrb[0].mxu1 %vm639_vm2, %v5121_v9  ;;  %v5125_v13 = vld [vmem:[%s5422_s18 + $0x18] sm:$0xff]   ;;  %v5127_v15 = vld [vmem:[%s5422_s18 + $0x20] sm:$0xff]   ;;  %v5129_v17 = vld [vmem:[%s5422_s18 + $0x28] sm:$0xff]  }
  0x1d   : > { %4892 = vmatpush3.bf16.msra.mxu0 %v5116_v0  ;;  %4960 = vmatpush3.bf16.msra.mxu1 %v5116_v0  ;;  %v5130_v18 = vld [vmem:[%s5416_s15 + $0x30] sm:$0xff]   ;;  %v5132_v20 = vld [vmem:[%s5416_s15 + $0x38] sm:$0xff]   ;;  %v5134_v22 = vld [vmem:[%s5416_s15 + $0x40] sm:$0xff]  }
  0x1e   : > { %4763 = vmatprep.mubr.msk.bf16.mxu0 %vm639_vm2, %v5122_v10  ;;  %4831 = vmatprep.mubr.msk.bf16.mxu1 %vm639_vm2, %v5123_v11  ;;  %v5131_v19 = vld [vmem:[%s5422_s18 + $0x30] sm:$0xff]   ;;  %v5133_v21 = vld [vmem:[%s5422_s18 + $0x38] sm:$0xff]   ;;  %v5135_v23 = vld [vmem:[%s5422_s18 + $0x40] sm:$0xff]  }
  0x1f   : > { %4893 = vmatprep.subr.bf16.mxu0 %v741_v5  ;;  %4961 = vmatprep.subr.bf16.mxu1 %v741_v5  ;;  %v5136_v24 = vld [vmem:[%s5416_s15 + $0x48] sm:$0xff]   ;;  %v5138_v26 = vld [vmem:[%s5416_s15 + $0x50] sm:$0xff]   ;;  %v5140_v28 = vld [vmem:[%s5416_s15 + $0x58] sm:$0xff]  }
  0x20   : > { %v5137_v25 = vld [vmem:[%s5422_s18 + $0x48] sm:$0xff]   ;;  %v5139_v27 = vld [vmem:[%s5422_s18 + $0x50] sm:$0xff]   ;;  %v5141_v29 = vld [vmem:[%s5422_s18 + $0x58] sm:$0xff]  }
  0x21   : > { %4894 = vmatpush3.bf16.msra.mxu0 %v741_v5  ;;  %4962 = vmatpush3.bf16.msra.mxu1 %v741_v5  ;;  %v5142_v30 = vld [vmem:[%s5416_s15 + $0x60] sm:$0xff]   ;;  %v5144_v32 = vld [vmem:[%s5416_s15 + $0x68] sm:$0xff]   ;;  %v5146_v34 = vld [vmem:[%s5416_s15 + $0x70] sm:$0xff]  }
  0x22   : > { %v5143_v31 = vld [vmem:[%s5422_s18 + $0x60] sm:$0xff]   ;;  %v5145_v33 = vld [vmem:[%s5422_s18 + $0x68] sm:$0xff]   ;;  %v5147_v35 = vld [vmem:[%s5422_s18 + $0x70] sm:$0xff]  }
  0x23   : > { %v5148_v36 = vld [vmem:[%s5416_s15 + $0x78] sm:$0xff]   ;;  %v5150_v38 = vld [vmem:[%s5416_s15 + $0x80] sm:$0xff]   ;;  %v5152_v40 = vld [vmem:[%s5416_s15 + $0x88] sm:$0xff]  }
  0x24   : > { %4764 = vmatmul.mubr.msk.bf16.gmra.mrb[4].mxu0 %vm639_vm2, %v5124_v12  ;;  %4832 = vmatmul.mubr.msk.bf16.gmra.mrb[4].mxu1 %vm639_vm2, %v5125_v13  ;;  %v5149_v37 = vld [vmem:[%s5422_s18 + $0x78] sm:$0xff]   ;;  %v5151_v39 = vld [vmem:[%s5422_s18 + $0x80] sm:$0xff]   ;;  %v5153_v41 = vld [vmem:[%s5422_s18 + $0x88] sm:$0xff]  }
  0x25   : > { %4767 = vmatprep.mubr.msk.bf16.mxu0 %vm639_vm2, %v5126_v14  ;;  %4835 = vmatprep.mubr.msk.bf16.mxu1 %vm639_vm2, %v5127_v15  ;;  %v5154_v42 = vld [vmem:[%s5416_s15 + $0x90] sm:$0xff]   ;;  %v5156_v44 = vld [vmem:[%s5416_s15 + $0x98] sm:$0xff]   ;;  %v5158_v46 = vld [vmem:[%s5416_s15 + $0xa0] sm:$0xff]  }
  0x26   : > { %v5155_v43 = vld [vmem:[%s5422_s18 + $0x90] sm:$0xff]   ;;  %v5157_v45 = vld [vmem:[%s5422_s18 + $0x98] sm:$0xff]   ;;  %v5159_v47 = vld [vmem:[%s5422_s18 + $0xa0] sm:$0xff]  }
  0x27   : > { %v5160_v48 = vld [vmem:[%s5416_s15 + $0xa8] sm:$0xff]   ;;  %v5162_v50 = vld [vmem:[%s5416_s15 + $0xb0] sm:$0xff]   ;;  %v5164_v52 = vld [vmem:[%s5416_s15 + $0xb8] sm:$0xff]  }
  0x28   : > { %v5161_v49 = vld [vmem:[%s5422_s18 + $0xa8] sm:$0xff]   ;;  %v5163_v51 = vld [vmem:[%s5422_s18 + $0xb0] sm:$0xff]   ;;  %v5165_v53 = vld [vmem:[%s5422_s18 + $0xb8] sm:$0xff]  }
  0x29   : > { %v5166_v54 = vld [vmem:[%s5416_s15 + $0xc0] sm:$0xff]   ;;  %v5168_v56 = vld [vmem:[%s5416_s15 + $0xc8] sm:$0xff]   ;;  %v5170_v58 = vld [vmem:[%s5416_s15 + $0xd0] sm:$0xff]  }
  0x2a   : > { %v5167_v55 = vld [vmem:[%s5422_s18 + $0xc0] sm:$0xff]   ;;  %v5169_v57 = vld [vmem:[%s5422_s18 + $0xc8] sm:$0xff]   ;;  %v5171_v59 = vld [vmem:[%s5422_s18 + $0xd0] sm:$0xff]  }
  0x2b   : > { %v5172_v60 = vld [vmem:[%s5416_s15 + $0xd8] sm:$0xff]   ;;  %v5174_v62 = vld [vmem:[%s5416_s15 + $0xe0] sm:$0xff]   ;;  %v5176_v0 = vld [vmem:[%s5416_s15 + $0xe8] sm:$0xff]  }
  0x2c   : > { %4768 = vmatmul.mubr.msk.bf16.gmra.mrb[8].mxu0 %vm639_vm2, %v5128_v16  ;;  %4836 = vmatmul.mubr.msk.bf16.gmra.mrb[8].mxu1 %vm639_vm2, %v5129_v17  ;;  %v5173_v61 = vld [vmem:[%s5422_s18 + $0xd8] sm:$0xff]   ;;  %v5175_v63 = vld [vmem:[%s5422_s18 + $0xe0] sm:$0xff]   ;;  %v5177_v1 = vld [vmem:[%s5422_s18 + $0xe8] sm:$0xff]  }
  0x2d   : > { %4771 = vmatprep.mubr.msk.bf16.mxu0 %vm639_vm2, %v5130_v18  ;;  %4839 = vmatprep.mubr.msk.bf16.mxu1 %vm639_vm2, %v5131_v19  ;;  %v5178_v2 = vld [vmem:[%s5416_s15 + $0xf0] sm:$0xff]   ;;  %v5180_v4 = vld [vmem:[%s5416_s15 + $0xf8] sm:$0xff]   ;;  %v5182_v6 = vld [vmem:[%s5497_s23] sm:$0xff]  }
  0x2e   : > { %v5179_v3 = vld [vmem:[%s5422_s18 + $0xf0] sm:$0xff]   ;;  %v5181_v5 = vld [vmem:[%s5422_s18 + $0xf8] sm:$0xff]   ;;  %v5183_v7 = vld [vmem:[%s5504_s30] sm:$0xff]  }
  0x2f   : > { %v5184_v8 = vld [vmem:[%s5497_s23 + $0x8] sm:$0xff]   ;;  %v5186_v10 = vld [vmem:[%s5497_s23 + $0x10] sm:$0xff]   ;;  %v5188_v12 = vld [vmem:[%s5497_s23 + $0x18] sm:$0xff]  }
  0x30   : > { %v5185_v9 = vld [vmem:[%s5504_s30 + $0x8] sm:$0xff]   ;;  %v5187_v11 = vld [vmem:[%s5504_s30 + $0x10] sm:$0xff]   ;;  %v5189_v13 = vld [vmem:[%s5504_s30 + $0x18] sm:$0xff]  }
  0x31   : > { %v5190_v14 = vld [vmem:[%s5497_s23 + $0x20] sm:$0xff]   ;;  %v5192_v16 = vld [vmem:[%s5497_s23 + $0x28] sm:$0xff]   ;;  %v5194_v18 = vld [vmem:[%s5497_s23 + $0x30] sm:$0xff]  }
  0x32   : > { %v5191_v15 = vld [vmem:[%s5504_s30 + $0x20] sm:$0xff]   ;;  %v5193_v17 = vld [vmem:[%s5504_s30 + $0x28] sm:$0xff]   ;;  %v5195_v19 = vld [vmem:[%s5504_s30 + $0x30] sm:$0xff]  }
  0x34   : > { %4772 = vmatmul.mubr.msk.bf16.gmra.mrb[12].mxu0 %vm639_vm2, %v5132_v20  ;;  %4840 = vmatmul.mubr.msk.bf16.gmra.mrb[12].mxu1 %vm639_vm2, %v5133_v21  ;;  %v5196_v20 = vld [vmem:[%s5497_s23 + $0x38] sm:$0xff]  }
  0x35   : > { %4775 = vmatprep.mubr.msk.bf16.mxu0 %vm639_vm2, %v5134_v22  ;;  %4843 = vmatprep.mubr.msk.bf16.mxu1 %vm639_vm2, %v5135_v23  ;;  %v5197_v21 = vld [vmem:[%s5504_s30 + $0x38] sm:$0xff]   ;;  %v5198_v22 = vld [vmem:[%s5497_s23 + $0x40] sm:$0xff]  }
  0x36   : > { %v5199_v23 = vld [vmem:[%s5504_s30 + $0x40] sm:$0xff]  }
  0x3c   : > { %4776 = vmatmul.mubr.msk.bf16.gmra.mrb[16].mxu0 %vm639_vm2, %v5136_v24  ;;  %4844 = vmatmul.mubr.msk.bf16.gmra.mrb[16].mxu1 %vm639_vm2, %v5137_v25  ;;  %v5200_v24 = vld [vmem:[%s5497_s23 + $0x48] sm:$0xff]  }
  0x3d   : > { %4779 = vmatprep.mubr.msk.bf16.mxu0 %vm639_vm2, %v5138_v26  ;;  %4847 = vmatprep.mubr.msk.bf16.mxu1 %vm639_vm2, %v5139_v27  ;;  %v5201_v25 = vld [vmem:[%s5504_s30 + $0x48] sm:$0xff]   ;;  %v5202_v26 = vld [vmem:[%s5497_s23 + $0x50] sm:$0xff]  }
  0x3e   : > { %v5203_v27 = vld [vmem:[%s5504_s30 + $0x50] sm:$0xff]  }
  0x44   : > { %4780 = vmatmul.mubr.msk.bf16.gmra.mrb[20].mxu0 %vm639_vm2, %v5140_v28  ;;  %4848 = vmatmul.mubr.msk.bf16.gmra.mrb[20].mxu1 %vm639_vm2, %v5141_v29  ;;  %v5204_v28 = vld [vmem:[%s5497_s23 + $0x58] sm:$0xff]  }
  0x45   : > { %4783 = vmatprep.mubr.msk.bf16.mxu0 %vm639_vm2, %v5142_v30  ;;  %4851 = vmatprep.mubr.msk.bf16.mxu1 %vm639_vm2, %v5143_v31  ;;  %v5205_v29 = vld [vmem:[%s5504_s30 + $0x58] sm:$0xff]   ;;  %v5206_v30 = vld [vmem:[%s5497_s23 + $0x60] sm:$0xff]  }
  0x46   : > { %v5207_v31 = vld [vmem:[%s5504_s30 + $0x60] sm:$0xff]  }
  0x4c   : > { %4784 = vmatmul.mubr.msk.bf16.gmra.mrb[24].mxu0 %vm639_vm2, %v5144_v32  ;;  %4852 = vmatmul.mubr.msk.bf16.gmra.mrb[24].mxu1 %vm639_vm2, %v5145_v33  ;;  %v5208_v32 = vld [vmem:[%s5497_s23 + $0x68] sm:$0xff]  }
  0x4d   : > { %4787 = vmatprep.mubr.msk.bf16.mxu0 %vm639_vm2, %v5146_v34  ;;  %4855 = vmatprep.mubr.msk.bf16.mxu1 %vm639_vm2, %v5147_v35  ;;  %v5209_v33 = vld [vmem:[%s5504_s30 + $0x68] sm:$0xff]   ;;  %v5210_v34 = vld [vmem:[%s5497_s23 + $0x70] sm:$0xff]  }
  0x4e   : > { %v5211_v35 = vld [vmem:[%s5504_s30 + $0x70] sm:$0xff]  }
  0x54   : > { %4788 = vmatmul.mubr.msk.bf16.gmra.mrb[28].mxu0 %vm639_vm2, %v5148_v36  ;;  %4856 = vmatmul.mubr.msk.bf16.gmra.mrb[28].mxu1 %vm639_vm2, %v5149_v37  ;;  %v5212_v36 = vld [vmem:[%s5497_s23 + $0x78] sm:$0xff]  }
  0x55   : > { %4791 = vmatprep.mubr.msk.bf16.mxu0 %vm639_vm2, %v5150_v38  ;;  %4859 = vmatprep.mubr.msk.bf16.mxu1 %vm639_vm2, %v5151_v39  ;;  %v5213_v37 = vld [vmem:[%s5504_s30 + $0x78] sm:$0xff]   ;;  %v5214_v38 = vld [vmem:[%s5497_s23 + $0x80] sm:$0xff]  }
  0x56   : > { %v5215_v39 = vld [vmem:[%s5504_s30 + $0x80] sm:$0xff]  }
  0x5c   : > { %4792 = vmatmul.mubr.msk.bf16.gmra.mrb[32].mxu0 %vm639_vm2, %v5152_v40  ;;  %4860 = vmatmul.mubr.msk.bf16.gmra.mrb[32].mxu1 %vm639_vm2, %v5153_v41  ;;  %v5216_v40 = vld [vmem:[%s5497_s23 + $0x88] sm:$0xff]  }
  0x5d   : > { %4795 = vmatprep.mubr.msk.bf16.mxu0 %vm639_vm2, %v5154_v42  ;;  %4863 = vmatprep.mubr.msk.bf16.mxu1 %vm639_vm2, %v5155_v43  ;;  %v5217_v41 = vld [vmem:[%s5504_s30 + $0x88] sm:$0xff]   ;;  %v5218_v42 = vld [vmem:[%s5497_s23 + $0x90] sm:$0xff]  }
  0x5e   : > { %v5219_v43 = vld [vmem:[%s5504_s30 + $0x90] sm:$0xff]  }
  0x64   : > { %4796 = vmatmul.mubr.msk.bf16.gmra.mrb[36].mxu0 %vm639_vm2, %v5156_v44  ;;  %4864 = vmatmul.mubr.msk.bf16.gmra.mrb[36].mxu1 %vm639_vm2, %v5157_v45  ;;  %v5220_v44 = vld [vmem:[%s5497_s23 + $0x98] sm:$0xff]  }
  0x65   : > { %4799 = vmatprep.mubr.msk.bf16.mxu0 %vm639_vm2, %v5158_v46  ;;  %4867 = vmatprep.mubr.msk.bf16.mxu1 %vm639_vm2, %v5159_v47  ;;  %v5221_v45 = vld [vmem:[%s5504_s30 + $0x98] sm:$0xff]   ;;  %v5222_v46 = vld [vmem:[%s5497_s23 + $0xa0] sm:$0xff]  }
  0x66   : > { %v5223_v47 = vld [vmem:[%s5504_s30 + $0xa0] sm:$0xff]  }
  0x6c   : > { %4800 = vmatmul.mubr.msk.bf16.gmra.mrb[40].mxu0 %vm639_vm2, %v5160_v48  ;;  %4868 = vmatmul.mubr.msk.bf16.gmra.mrb[40].mxu1 %vm639_vm2, %v5161_v49  ;;  %v5224_v48 = vld [vmem:[%s5497_s23 + $0xa8] sm:$0xff]  }
  0x6d   : > { %4803 = vmatprep.mubr.msk.bf16.mxu0 %vm639_vm2, %v5162_v50  ;;  %4871 = vmatprep.mubr.msk.bf16.mxu1 %vm639_vm2, %v5163_v51  ;;  %v5225_v49 = vld [vmem:[%s5504_s30 + $0xa8] sm:$0xff]   ;;  %v5226_v50 = vld [vmem:[%s5497_s23 + $0xb0] sm:$0xff]  }
  0x6e   : > { %v5227_v51 = vld [vmem:[%s5504_s30 + $0xb0] sm:$0xff]  }
  0x74   : > { %4804 = vmatmul.mubr.msk.bf16.gmra.mrb[44].mxu0 %vm639_vm2, %v5164_v52  ;;  %4872 = vmatmul.mubr.msk.bf16.gmra.mrb[44].mxu1 %vm639_vm2, %v5165_v53 }
  0x75   : > { %4807 = vmatprep.mubr.msk.bf16.mxu0 %vm639_vm2, %v5166_v54  ;;  %4875 = vmatprep.mubr.msk.bf16.mxu1 %vm639_vm2, %v5167_v55  ;;  %v5228_v55 = vld [vmem:[%s5497_s23 + $0xb8] sm:$0xff]  }
  0x7c   : > { %4808 = vmatmul.mubr.msk.bf16.gmra.mrb[48].mxu0 %vm639_vm2, %v5168_v56  ;;  %4876 = vmatmul.mubr.msk.bf16.gmra.mrb[48].mxu1 %vm639_vm2, %v5169_v57 }
  0x7d   : > { %4811 = vmatprep.mubr.msk.bf16.mxu0 %vm639_vm2, %v5170_v58  ;;  %4879 = vmatprep.mubr.msk.bf16.mxu1 %vm639_vm2, %v5171_v59  ;;  %v5229_v59 = vld [vmem:[%s5504_s30 + $0xb8] sm:$0xff]  }
  0x84   : > { %4812 = vmatmul.mubr.msk.bf16.gmra.mrb[52].mxu0 %vm639_vm2, %v5172_v60  ;;  %4880 = vmatmul.mubr.msk.bf16.gmra.mrb[52].mxu1 %vm639_vm2, %v5173_v61  ;;  %v5230_v60 = vld [vmem:[%s5497_s23 + $0xc0] sm:$0xff]  }
  0x85   : > { %4815 = vmatprep.mubr.msk.bf16.mxu0 %vm639_vm2, %v5174_v62  ;;  %4883 = vmatprep.mubr.msk.bf16.mxu1 %vm639_vm2, %v5175_v63 }
  0x8c   : > { %4816 = vmatmul.mubr.msk.bf16.gmra.mrb[56].mxu0 %vm639_vm2, %v5176_v0  ;;  %4884 = vmatmul.mubr.msk.bf16.gmra.mrb[56].mxu1 %vm639_vm2, %v5177_v1  ;;  %v5231_v0 = vld [vmem:[%s5504_s30 + $0xc0] sm:$0xff]  }
  0x8d   : > { %4819 = vmatprep.mubr.msk.bf16.mxu0 %vm639_vm2, %v5178_v2  ;;  %4887 = vmatprep.mubr.msk.bf16.mxu1 %vm639_vm2, %v5179_v3 }
  0x94   : > { %4820 = vmatmul.mubr.msk.bf16.gmra.mrb[60].mxu0 %vm639_vm2, %v5180_v4  ;;  %4888 = vmatmul.mubr.msk.bf16.gmra.mrb[60].mxu1 %vm639_vm2, %v5181_v5 }
  0x95   : > { %4895 = vmatprep.mubr.msk.bf16.mxu0 %vm639_vm2, %v5182_v6  ;;  %4963 = vmatprep.mubr.msk.bf16.mxu1 %vm639_vm2, %v5183_v7  ;;  %v5232_v7 = vld [vmem:[%s5497_s23 + $0xc8] sm:$0xff]  }
  0x9c   : > { %4896 = vmatmul.mubr.msk.bf16.vlgmr.msra.gmra.mrb[64].mxu0 %vm639_vm2, %v5184_v8  ;;  %4964 = vmatmul.mubr.msk.bf16.vlgmr.msra.gmra.mrb[64].mxu1 %vm639_vm2, %v5185_v9 }
  0x9d   : > { %4899 = vmatprep.mubr.msk.bf16.mxu0 %vm639_vm2, %v5186_v10  ;;  %4967 = vmatprep.mubr.msk.bf16.mxu1 %vm639_vm2, %v5187_v11  ;;  %v5233_v11 = vld [vmem:[%s5504_s30 + $0xc8] sm:$0xff]  }
  0xa4   : > { %4900 = vmatmul.mubr.msk.bf16.gmra.mrb[68].mxu0 %vm639_vm2, %v5188_v12  ;;  %4968 = vmatmul.mubr.msk.bf16.gmra.mrb[68].mxu1 %vm639_vm2, %v5189_v13  ;;  %v5234_v12 = vld [vmem:[%s5497_s23 + $0xd0] sm:$0xff]  }
  0xa5   : > { %4903 = vmatprep.mubr.msk.bf16.mxu0 %vm639_vm2, %v5190_v14  ;;  %4971 = vmatprep.mubr.msk.bf16.mxu1 %vm639_vm2, %v5191_v15 }
  0xac   : > { %4904 = vmatmul.mubr.msk.bf16.gmra.mrb[72].mxu0 %vm639_vm2, %v5192_v16  ;;  %4972 = vmatmul.mubr.msk.bf16.gmra.mrb[72].mxu1 %vm639_vm2, %v5193_v17  ;;  %v5235_v16 = vld [vmem:[%s5504_s30 + $0xd0] sm:$0xff]  }
  0xad   : > { %4907 = vmatprep.mubr.msk.bf16.mxu0 %vm639_vm2, %v5194_v18  ;;  %4975 = vmatprep.mubr.msk.bf16.mxu1 %vm639_vm2, %v5195_v19 }
  0xb4   : > { %4908 = vmatmul.mubr.msk.bf16.gmra.mrb[76].mxu0 %vm639_vm2, %v5196_v20  ;;  %4976 = vmatmul.mubr.msk.bf16.gmra.mrb[76].mxu1 %vm639_vm2, %v5197_v21 }
  0xb5   : > { %4911 = vmatprep.mubr.msk.bf16.mxu0 %vm639_vm2, %v5198_v22  ;;  %4979 = vmatprep.mubr.msk.bf16.mxu1 %vm639_vm2, %v5199_v23  ;;  %v5236_v23 = vld [vmem:[%s5497_s23 + $0xd8] sm:$0xff]  }
  0xbc   : > { %4912 = vmatmul.mubr.msk.bf16.gmra.mrb[80].mxu0 %vm639_vm2, %v5200_v24  ;;  %4980 = vmatmul.mubr.msk.bf16.gmra.mrb[80].mxu1 %vm639_vm2, %v5201_v25 }
  0xbd   : > { %4915 = vmatprep.mubr.msk.bf16.mxu0 %vm639_vm2, %v5202_v26  ;;  %4983 = vmatprep.mubr.msk.bf16.mxu1 %vm639_vm2, %v5203_v27  ;;  %v5237_v27 = vld [vmem:[%s5504_s30 + $0xd8] sm:$0xff]  }
  0xc4   : > { %4916 = vmatmul.mubr.msk.bf16.gmra.mrb[84].mxu0 %vm639_vm2, %v5204_v28  ;;  %4984 = vmatmul.mubr.msk.bf16.gmra.mrb[84].mxu1 %vm639_vm2, %v5205_v29  ;;  %v5238_v28 = vld [vmem:[%s5497_s23 + $0xe0] sm:$0xff]  }
  0xc5   : > { %4919 = vmatprep.mubr.msk.bf16.mxu0 %vm639_vm2, %v5206_v30  ;;  %4987 = vmatprep.mubr.msk.bf16.mxu1 %vm639_vm2, %v5207_v31 }
  0xcc   : > { %4920 = vmatmul.mubr.msk.bf16.gmra.mrb[88].mxu0 %vm639_vm2, %v5208_v32  ;;  %4988 = vmatmul.mubr.msk.bf16.gmra.mrb[88].mxu1 %vm639_vm2, %v5209_v33  ;;  %v5239_v32 = vld [vmem:[%s5504_s30 + $0xe0] sm:$0xff]  }
  0xcd   : > { %4923 = vmatprep.mubr.msk.bf16.mxu0 %vm639_vm2, %v5210_v34  ;;  %4991 = vmatprep.mubr.msk.bf16.mxu1 %vm639_vm2, %v5211_v35 }
  0xd4   : > { %4924 = vmatmul.mubr.msk.bf16.gmra.mrb[92].mxu0 %vm639_vm2, %v5212_v36  ;;  %4992 = vmatmul.mubr.msk.bf16.gmra.mrb[92].mxu1 %vm639_vm2, %v5213_v37 }
  0xd5   : > { %4927 = vmatprep.mubr.msk.bf16.mxu0 %vm639_vm2, %v5214_v38  ;;  %4995 = vmatprep.mubr.msk.bf16.mxu1 %vm639_vm2, %v5215_v39  ;;  %v5240_v39 = vld [vmem:[%s5497_s23 + $0xe8] sm:$0xff]  }
  0xdc   : > { %4928 = vmatmul.mubr.msk.bf16.gmra.mrb[96].mxu0 %vm639_vm2, %v5216_v40  ;;  %4996 = vmatmul.mubr.msk.bf16.gmra.mrb[96].mxu1 %vm639_vm2, %v5217_v41 }
  0xdd   : > { %4931 = vmatprep.mubr.msk.bf16.mxu0 %vm639_vm2, %v5218_v42  ;;  %4999 = vmatprep.mubr.msk.bf16.mxu1 %vm639_vm2, %v5219_v43  ;;  %v5241_v43 = vld [vmem:[%s5504_s30 + $0xe8] sm:$0xff]  }
  0xe4   : > { %4932 = vmatmul.mubr.msk.bf16.gmra.mrb[100].mxu0 %vm639_vm2, %v5220_v44  ;;  %5000 = vmatmul.mubr.msk.bf16.gmra.mrb[100].mxu1 %vm639_vm2, %v5221_v45  ;;  %v5242_v44 = vld [vmem:[%s5497_s23 + $0xf0] sm:$0xff]  }
  0xe5   : > { %4935 = vmatprep.mubr.msk.bf16.mxu0 %vm639_vm2, %v5222_v46  ;;  %5003 = vmatprep.mubr.msk.bf16.mxu1 %vm639_vm2, %v5223_v47 }
  0xec   : > { %4936 = vmatmul.mubr.msk.bf16.gmra.mrb[104].mxu0 %vm639_vm2, %v5224_v48  ;;  %5004 = vmatmul.mubr.msk.bf16.gmra.mrb[104].mxu1 %vm639_vm2, %v5225_v49  ;;  %v5243_v48 = vld [vmem:[%s5504_s30 + $0xf0] sm:$0xff]  }
  0xed   : > { %4939 = vmatprep.mubr.msk.bf16.mxu0 %vm639_vm2, %v5226_v50  ;;  %5007 = vmatprep.mubr.msk.bf16.mxu1 %vm639_vm2, %v5227_v51 }
  0xef   : > { %v5656_v52 = vpop.f32.mrb[0].mxu0  ;;  %v5658_v53 = vpop.f32.mrb[0].mxu1 }
  0xf0   : > { %v5660_v54 = vpop.f32.mrb[1].mxu0  ;;  %v5665_v57 = vpop.f32.mrb[1].mxu1 }
  0xf1   : > { %v5667_v58 = vpop.f32.mrb[2].mxu0  ;;  %v5673_v62 = vpop.f32.mrb[2].mxu1 }
  0xf2   : > { %v5675_v63 = vpop.f32.mrb[3].mxu0  ;;  %v5680_v2 = vpop.f32.mrb[3].mxu1 }
  0xf4   : > { %4940 = vmatmul.mubr.msk.bf16.gmra.mrb[108].mxu0 %vm639_vm2, %v5228_v55  ;;  %5008 = vmatmul.mubr.msk.bf16.gmra.mrb[108].mxu1 %vm639_vm2, %v5229_v59 }
  0xf5   : > { %4943 = vmatprep.mubr.msk.bf16.mxu0 %vm639_vm2, %v5230_v60  ;;  %5011 = vmatprep.mubr.msk.bf16.mxu1 %vm639_vm2, %v5231_v0  ;;  %v5244_v0 = vld [vmem:[%s5497_s23 + $0xf8] sm:$0xff]  }
  0xf7   : > { %v5688_v4 = vpop.f32.mrb[4].mxu0  ;;  %v5690_v5 = vpop.f32.mrb[4].mxu1 }
  0xf8   : > { %v5692_v6 = vpop.f32.mrb[5].mxu0  ;;  %v5697_v9 = vpop.f32.mrb[5].mxu1 }
  0xf9   : > { %v5699_v10 = vpop.f32.mrb[6].mxu0  ;;  %v5705_v14 = vpop.f32.mrb[6].mxu1 }
  0xfa   : > { %v5707_v15 = vpop.f32.mrb[7].mxu0  ;;  %v5712_v18 = vpop.f32.mrb[7].mxu1 }
  0xfc   : > { %4944 = vmatmul.mubr.msk.bf16.gmra.mrb[112].mxu0 %vm639_vm2, %v5232_v7  ;;  %5012 = vmatmul.mubr.msk.bf16.gmra.mrb[112].mxu1 %vm639_vm2, %v5233_v11 }
  0xfd   : > { %4947 = vmatprep.mubr.msk.bf16.mxu0 %vm639_vm2, %v5234_v12  ;;  %5015 = vmatprep.mubr.msk.bf16.mxu1 %vm639_vm2, %v5235_v16  ;;  %v5245_v16 = vld [vmem:[%s5504_s30 + $0xf8] sm:$0xff]  }
  0xff   : > { %v5720_v20 = vpop.f32.mrb[8].mxu0  ;;  %v5722_v21 = vpop.f32.mrb[8].mxu1 }
 0x100   : > { %v5724_v22 = vpop.f32.mrb[9].mxu0  ;;  %v5729_v25 = vpop.f32.mrb[9].mxu1 }
 0x101   : > { %v5731_v26 = vpop.f32.mrb[10].mxu0  ;;  %v5737_v30 = vpop.f32.mrb[10].mxu1 }
 0x102   : > { %v5739_v31 = vpop.f32.mrb[11].mxu0  ;;  %v5744_v34 = vpop.f32.mrb[11].mxu1 }
 0x104   : > { %4948 = vmatmul.mubr.msk.bf16.gmra.mrb[116].mxu0 %vm639_vm2, %v5236_v23  ;;  %5016 = vmatmul.mubr.msk.bf16.gmra.mrb[116].mxu1 %vm639_vm2, %v5237_v27 }
 0x105   : > { %4951 = vmatprep.mubr.msk.bf16.mxu0 %vm639_vm2, %v5238_v28  ;;  %5019 = vmatprep.mubr.msk.bf16.mxu1 %vm639_vm2, %v5239_v32 }
 0x107   : > { %v5752_v36 = vpop.f32.mrb[12].mxu0  ;;  %v5754_v37 = vpop.f32.mrb[12].mxu1 }
 0x108   : > { %v5756_v38 = vpop.f32.mrb[13].mxu0  ;;  %v5761_v41 = vpop.f32.mrb[13].mxu1 }
 0x109   : > { %v5763_v42 = vpop.f32.mrb[14].mxu0  ;;  %v5769_v46 = vpop.f32.mrb[14].mxu1 }
 0x10a   : > { %v5771_v47 = vpop.f32.mrb[15].mxu0  ;;  %v5776_v50 = vpop.f32.mrb[15].mxu1 }
 0x10c   : > { %4952 = vmatmul.mubr.msk.bf16.gmra.mrb[120].mxu0 %vm639_vm2, %v5240_v39  ;;  %5020 = vmatmul.mubr.msk.bf16.gmra.mrb[120].mxu1 %vm639_vm2, %v5241_v43 }
 0x10d   : > { %4955 = vmatprep.mubr.msk.bf16.mxu0 %vm639_vm2, %v5242_v44  ;;  %5023 = vmatprep.mubr.msk.bf16.mxu1 %vm639_vm2, %v5243_v48 }
 0x10f   : > { %v5784_v55 = vpop.f32.mrb[16].mxu0  ;;  %v5786_v59 = vpop.f32.mrb[16].mxu1 }
 0x110   : > { %v5788_v60 = vpop.f32.mrb[17].mxu0  ;;  %v5793_v11 = vpop.f32.mrb[17].mxu1 }
 0x111   : > { %v5795_v12 = vpop.f32.mrb[18].mxu0  ;;  %v5800_v27 = vpop.f32.mrb[18].mxu1 }
 0x112   : > { %v5802_v28 = vpop.f32.mrb[19].mxu0  ;;  %v5806_v39 = vpop.f32.mrb[19].mxu1 }
 0x114   : > { %4956 = vmatmul.mubr.msk.bf16.gmra.mrb[124].mxu0 %vm639_vm2, %v5244_v0  ;;  %5024 = vmatmul.mubr.msk.bf16.gmra.mrb[124].mxu1 %vm639_vm2, %v5245_v16 }
 0x117   : > { %v5812_v44 = vpop.f32.mrb[20].mxu0  ;;  %v5814_v48 = vpop.f32.mrb[20].mxu1 }
 0x118   : > { %v5816_v23 = vpop.f32.mrb[21].mxu0  ;;  %v5820_v51 = vpop.f32.mrb[21].mxu1 }
 0x119   : > { %v5822_v32 = vpop.f32.mrb[22].mxu0  ;;  %v5826_v49 = vpop.f32.mrb[22].mxu1 }
 0x11a   : > { %v5828_v0 = vpop.f32.mrb[23].mxu0  ;;  %v5832_v45 = vpop.f32.mrb[23].mxu1 }
 0x11b   : > { %6660 = vst [vmem:[#allocation3_spill] sm:$0xff] %v5832_v45  ;;  %v6743_v45 = vmax.f32 %v5667_v58, %v5673_v62 }
 0x11f   : > { %v5836_v7 = vpop.f32.mrb[24].mxu0  ;;  %v5838_v35 = vpop.f32.mrb[24].mxu1 }
 0x120   : > { %6661 = vst [vmem:[#allocation4_spill] sm:$0xff] %v5836_v7  ;;  %6662 = vst [vmem:[#allocation5_spill] sm:$0xff] %v5838_v35  ;;  %v5840_v33 = vpop.f32.mrb[25].mxu0  ;;  %v5844_v29 = vpop.f32.mrb[25].mxu1 }
 0x121   : > { %6663 = vst [vmem:[#allocation6_spill] sm:$0xff] %v5840_v33  ;;  %6664 = vst [vmem:[#allocation7_spill] sm:$0xff] %v5844_v29  ;;  %v5846_v24 = vpop.f32.mrb[26].mxu0  ;;  %v5850_v19 = vpop.f32.mrb[26].mxu1 }
 0x122   : > { %6665 = vst [vmem:[#allocation8_spill] sm:$0xff] %v5846_v24  ;;  %6666 = vst [vmem:[#allocation9_spill] sm:$0xff] %v5850_v19  ;;  %v5852_v17 = vpop.f32.mrb[27].mxu0  ;;  %v5856_v13 = vpop.f32.mrb[27].mxu1 }
 0x123   : > { %6667 = vst [vmem:[#allocation10_spill] sm:$0xff] %v5852_v17  ;;  %6668 = vst [vmem:[#allocation11_spill] sm:$0xff] %v5856_v13 }
 0x127   : > { %v5860_v43 = vpop.f32.mrb[28].mxu0  ;;  %v5862_v3 = vpop.f32.mrb[28].mxu1 }
 0x128   : > { %6669 = vst [vmem:[#allocation12_spill] sm:$0xff] %v5860_v43  ;;  %6670 = vst [vmem:[#allocation13_spill] sm:$0xff] %v5862_v3  ;;  %v5864_v1 = vpop.f32.mrb[29].mxu0  ;;  %v5868_v61 = vpop.f32.mrb[29].mxu1 }
 0x129   : > { %6671 = vst [vmem:[#allocation14_spill] sm:$0xff] %v5864_v1  ;;  %6672 = vst [vmem:[#allocation15_spill] sm:$0xff] %v5868_v61  ;;  %v5870_v56 = vpop.f32.mrb[30].mxu0  ;;  %v5874_v19 = vpop.f32.mrb[30].mxu1 }
 0x12a   : > { %6673 = vst [vmem:[#allocation16_spill] sm:$0xff] %v5870_v56  ;;  %6674 = vst [vmem:[#allocation17_spill] sm:$0xff] %v5874_v19  ;;  %v5876_v24 = vpop.f32.mrb[31].mxu0  ;;  %v5880_v13 = vpop.f32.mrb[31].mxu1 }
 0x12b   : > { %6675 = vst [vmem:[#allocation18_spill] sm:$0xff] %v5876_v24  ;;  %6676 = vst [vmem:[#allocation19_spill] sm:$0xff] %v5880_v13 }
 0x12f   : > { %v5884_v16 = vpop.f32.mrb[32].mxu0  ;;  %v5886_v3 = vpop.f32.mrb[32].mxu1 }
 0x130   : > { %6677 = vst [vmem:[#allocation20_spill] sm:$0xff] %v5884_v16  ;;  %6678 = vst [vmem:[#allocation21_spill] sm:$0xff] %v5886_v3  ;;  %v5888_v43 = vpop.f32.mrb[33].mxu0  ;;  %v5892_v61 = vpop.f32.mrb[33].mxu1 }
 0x131   : > { %6679 = vst [vmem:[#allocation22_spill] sm:$0xff] %v5888_v43  ;;  %6680 = vst [vmem:[#allocation23_spill] sm:$0xff] %v5892_v61  ;;  %v5894_v1 = vpop.f32.mrb[34].mxu0  ;;  %v5898_v19 = vpop.f32.mrb[34].mxu1 }
 0x132   : > { %6681 = vst [vmem:[#allocation24_spill] sm:$0xff] %v5894_v1  ;;  %6682 = vst [vmem:[#allocation25_spill] sm:$0xff] %v5898_v19  ;;  %v5900_v56 = vpop.f32.mrb[35].mxu0  ;;  %v5904_v13 = vpop.f32.mrb[35].mxu1 }
 0x133   : > { %6683 = vst [vmem:[#allocation26_spill] sm:$0xff] %v5900_v56  ;;  %6684 = vst [vmem:[#allocation27_spill] sm:$0xff] %v5904_v13 }
 0x137   : > { %v5908_v40 = vpop.f32.mrb[36].mxu0  ;;  %v5910_v3 = vpop.f32.mrb[36].mxu1 }
 0x138   : > { %6685 = vst [vmem:[#allocation28_spill] sm:$0xff] %v5908_v40  ;;  %6686 = vst [vmem:[#allocation29_spill] sm:$0xff] %v5910_v3  ;;  %v5912_v16 = vpop.f32.mrb[37].mxu0  ;;  %v5916_v61 = vpop.f32.mrb[37].mxu1 }
 0x139   : > { %6687 = vst [vmem:[#allocation30_spill] sm:$0xff] %v5912_v16  ;;  %6688 = vst [vmem:[#allocation31_spill] sm:$0xff] %v5916_v61  ;;  %v5918_v43 = vpop.f32.mrb[38].mxu0  ;;  %v5922_v19 = vpop.f32.mrb[38].mxu1 }
 0x13a   : > { %6689 = vst [vmem:[#allocation32_spill] sm:$0xff] %v5918_v43  ;;  %6690 = vst [vmem:[#allocation33_spill] sm:$0xff] %v5922_v19  ;;  %v5924_v1 = vpop.f32.mrb[39].mxu0  ;;  %v5928_v13 = vpop.f32.mrb[39].mxu1 }
 0x13b   : > { %6691 = vst [vmem:[#allocation34_spill] sm:$0xff] %v5924_v1  ;;  %6692 = vst [vmem:[#allocation35_spill] sm:$0xff] %v5928_v13 }
 0x13f   : > { %v5932_v8 = vpop.f32.mrb[40].mxu0  ;;  %v5934_v3 = vpop.f32.mrb[40].mxu1 }
 0x140   : > { %6693 = vst [vmem:[#allocation36_spill] sm:$0xff] %v5932_v8  ;;  %6694 = vst [vmem:[#allocation37_spill] sm:$0xff] %v5934_v3  ;;  %v5936_v40 = vpop.f32.mrb[41].mxu0  ;;  %v5940_v61 = vpop.f32.mrb[41].mxu1 }
 0x141   : > { %6695 = vst [vmem:[#allocation38_spill] sm:$0xff] %v5936_v40  ;;  %6696 = vst [vmem:[#allocation39_spill] sm:$0xff] %v5940_v61  ;;  %v5942_v16 = vpop.f32.mrb[42].mxu0  ;;  %v5946_v19 = vpop.f32.mrb[42].mxu1 }
 0x142   : > { %6697 = vst [vmem:[#allocation40_spill] sm:$0xff] %v5942_v16  ;;  %6698 = vst [vmem:[#allocation41_spill] sm:$0xff] %v5946_v19  ;;  %v5948_v43 = vpop.f32.mrb[43].mxu0  ;;  %v5952_v13 = vpop.f32.mrb[43].mxu1 }
 0x143   : > { %6699 = vst [vmem:[#allocation42_spill] sm:$0xff] %v5948_v43  ;;  %6700 = vst [vmem:[#allocation43_spill] sm:$0xff] %v5952_v13 }
 0x147   : > { %v5956_v17 = vpop.f32.mrb[44].mxu0  ;;  %v5958_v3 = vpop.f32.mrb[44].mxu1 }
 0x148   : > { %6701 = vst [vmem:[#allocation44_spill] sm:$0xff] %v5956_v17  ;;  %6702 = vst [vmem:[#allocation45_spill] sm:$0xff] %v5958_v3  ;;  %v5960_v8 = vpop.f32.mrb[45].mxu0  ;;  %v5964_v61 = vpop.f32.mrb[45].mxu1 }
 0x149   : > { %6703 = vst [vmem:[#allocation46_spill] sm:$0xff] %v5960_v8  ;;  %6704 = vst [vmem:[#allocation47_spill] sm:$0xff] %v5964_v61  ;;  %v5966_v40 = vpop.f32.mrb[46].mxu0  ;;  %v5970_v19 = vpop.f32.mrb[46].mxu1 }
 0x14a   : > { %6705 = vst [vmem:[#allocation48_spill] sm:$0xff] %v5966_v40  ;;  %6706 = vst [vmem:[#allocation49_spill] sm:$0xff] %v5970_v19  ;;  %v5972_v16 = vpop.f32.mrb[47].mxu0  ;;  %v5976_v13 = vpop.f32.mrb[47].mxu1 }
 0x14b   : > { %6707 = vst [vmem:[#allocation50_spill] sm:$0xff] %v5972_v16  ;;  %6708 = vst [vmem:[#allocation51_spill] sm:$0xff] %v5976_v13 }
 0x14f   : > { %v5980_v24 = vpop.f32.mrb[48].mxu0  ;;  %v5982_v3 = vpop.f32.mrb[48].mxu1 }
 0x150   : > { %6709 = vst [vmem:[#allocation52_spill] sm:$0xff] %v5980_v24  ;;  %6710 = vst [vmem:[#allocation53_spill] sm:$0xff] %v5982_v3  ;;  %v5984_v17 = vpop.f32.mrb[49].mxu0  ;;  %v5988_v61 = vpop.f32.mrb[49].mxu1 }
 0x151   : > { %6711 = vst [vmem:[#allocation54_spill] sm:$0xff] %v5984_v17  ;;  %6712 = vst [vmem:[#allocation55_spill] sm:$0xff] %v5988_v61  ;;  %v5990_v8 = vpop.f32.mrb[50].mxu0  ;;  %v5994_v19 = vpop.f32.mrb[50].mxu1 }
 0x152   : > { %6713 = vst [vmem:[#allocation56_spill] sm:$0xff] %v5990_v8  ;;  %6714 = vst [vmem:[#allocation57_spill] sm:$0xff] %v5994_v19  ;;  %v5996_v40 = vpop.f32.mrb[51].mxu0  ;;  %v6000_v13 = vpop.f32.mrb[51].mxu1 }
 0x153   : > { %6715 = vst [vmem:[#allocation58_spill] sm:$0xff] %v5996_v40  ;;  %6716 = vst [vmem:[#allocation59_spill] sm:$0xff] %v6000_v13  ;;  %v6079_v40 = vld [vmem:[%s6576_s5] ss:$0 sm:$0xff] }
 0x157   : > { %v6004_v56 = vpop.f32.mrb[52].mxu0  ;;  %v6006_v3 = vpop.f32.mrb[52].mxu1 }
 0x158   : > { %6717 = vst [vmem:[#allocation60_spill] sm:$0xff] %v6004_v56  ;;  %6718 = vst [vmem:[#allocation61_spill] sm:$0xff] %v6006_v3  ;;  %v6008_v24 = vpop.f32.mrb[53].mxu0  ;;  %v6012_v61 = vpop.f32.mrb[53].mxu1 }
 0x159   : > { %6719 = vst [vmem:[#allocation62_spill] sm:$0xff] %v6008_v24  ;;  %6720 = vst [vmem:[#allocation63_spill] sm:$0xff] %v6012_v61  ;;  %v6014_v17 = vpop.f32.mrb[54].mxu0  ;;  %v6018_v19 = vpop.f32.mrb[54].mxu1 }
 0x15a   : > { %6721 = vst [vmem:[#allocation64_spill] sm:$0xff] %v6014_v17  ;;  %6722 = vst [vmem:[#allocation65_spill] sm:$0xff] %v6018_v19  ;;  %v6020_v8 = vpop.f32.mrb[55].mxu0  ;;  %v6024_v13 = vpop.f32.mrb[55].mxu1 }
 0x15b   : > { %6723 = vst [vmem:[#allocation66_spill] sm:$0xff] %v6020_v8  ;;  %6724 = vst [vmem:[#allocation67_spill] sm:$0xff] %v6024_v13 }
 0x15f   : > { %v6028_v1 = vpop.f32.mrb[56].mxu0  ;;  %v6030_v3 = vpop.f32.mrb[56].mxu1 }
 0x160   : > { %6725 = vst [vmem:[#allocation68_spill] sm:$0xff] %v6028_v1  ;;  %6726 = vst [vmem:[#allocation69_spill] sm:$0xff] %v6030_v3  ;;  %v6032_v56 = vpop.f32.mrb[57].mxu0  ;;  %v6036_v61 = vpop.f32.mrb[57].mxu1 }
 0x161   : > { %6727 = vst [vmem:[#allocation70_spill] sm:$0xff] %v6032_v56  ;;  %6728 = vst [vmem:[#allocation71_spill] sm:$0xff] %v6036_v61  ;;  %v6038_v24 = vpop.f32.mrb[58].mxu0  ;;  %v6042_v19 = vpop.f32.mrb[58].mxu1 }
 0x162   : > { %6729 = vst [vmem:[#allocation72_spill] sm:$0xff] %v6038_v24  ;;  %6730 = vst [vmem:[#allocation73_spill] sm:$0xff] %v6042_v19  ;;  %v6044_v17 = vpop.f32.mrb[59].mxu0  ;;  %v6048_v13 = vpop.f32.mrb[59].mxu1 }
 0x163   : > { %6731 = vst [vmem:[#allocation74_spill] sm:$0xff] %v6044_v17  ;;  %6732 = vst [vmem:[#allocation75_spill] sm:$0xff] %v6048_v13 }
 0x167   : > { %v6052_v43 = vpop.f32.mrb[60].mxu0  ;;  %v6054_v3 = vpop.f32.mrb[60].mxu1 }
 0x168   : > { %6733 = vst [vmem:[#allocation76_spill] sm:$0xff] %v6052_v43  ;;  %6734 = vst [vmem:[#allocation77_spill] sm:$0xff] %v6054_v3  ;;  %v6056_v1 = vpop.f32.mrb[61].mxu0  ;;  %v6060_v61 = vpop.f32.mrb[61].mxu1 }
 0x169   : > { %6735 = vst [vmem:[#allocation78_spill] sm:$0xff] %v6056_v1  ;;  %6736 = vst [vmem:[#allocation79_spill] sm:$0xff] %v6060_v61  ;;  %v6062_v56 = vpop.f32.mrb[62].mxu0  ;;  %v6066_v19 = vpop.f32.mrb[62].mxu1 }
 0x16a   : > { %6737 = vst [vmem:[#allocation80_spill] sm:$0xff] %v6062_v56  ;;  %6738 = vst [vmem:[#allocation81_spill] sm:$0xff] %v6066_v19  ;;  %v6068_v24 = vpop.f32.mrb[63].mxu0  ;;  %v6072_v13 = vpop.f32.mrb[63].mxu1  ;;  %v6741_v19 = vmax.f32 %v5656_v52, %v5658_v53  ;;  %v6744_v52 = vmax.f32 %v5675_v63, %v5680_v2  ;;  %v6745_v2 = vmax.f32 %v5688_v4, %v5690_v5 }
 0x16b   : > { %6739 = vst [vmem:[#allocation82_spill] sm:$0xff] %v6068_v24  ;;  %6740 = vst [vmem:[#allocation83_spill] sm:$0xff] %v6072_v13  ;;  %v6742_v13 = vmax.f32 %v5660_v54, %v5665_v57 }
 0x16f   : > { %v4897_v3 = vpop.f32.mrb[64].mxu0  ;;  %v4965_v43 = vpop.f32.mrb[64].mxu1 }
 0x170   : > { %v1995_v17 = vpop.f32.mrb[65].mxu0  ;;  %v2925_v29 = vmax.f32 %v4897_v3, %v4965_v43  ;;  %v2604_v33 = vpop.f32.mrb[65].mxu1 }
 0x171   : > { %v4898_v35 = vpop.f32.mrb[66].mxu0  ;;  %v2923_v61 = vmax.f32 %v1995_v17, %v2604_v33  ;;  %v4966_v1 = vpop.f32.mrb[66].mxu1 }
 0x172   : > { %v1998_v8 = vpop.f32.mrb[67].mxu0  ;;  %v2989_v56 = vmax.f32 %v6741_v19, %v2925_v29  ;;  %v2926_v7 = vmax.f32 %v4898_v35, %v4966_v1  ;;  %v2607_v16 = vpop.f32.mrb[67].mxu1 }
 0x173   : > { %v2987_v3 = vmax.f32 %v6742_v13, %v2923_v61  ;;  %v2924_v43 = vmax.f32 %v1998_v8, %v2607_v16 }
 0x174   : > { %v3060_v24 = vadd.f32 %v6079_v40, %v2989_v56  ;;  %v2990_v17 = vmax.f32 %v6743_v45, %v2926_v7 }
 0x175   : > { %v3058_v33 = vadd.f32 %v6079_v40, %v2987_v3  ;;  %v2988_v53 = vmax.f32 %v6744_v52, %v2924_v43 }
 0x176   : > { %v3061_v1 = vadd.f32 %v6079_v40, %v2990_v17  ;;  %v3124_v8 = vmax.f32 %v3060_v24, 0.0  ;;  %v6746_v24 = vmax.f32 %v5692_v6, %v5697_v9 }
 0x177   : > { %v4901_v19 = vpop.f32.mrb[68].mxu0  ;;  %v3059_v54 = vadd.f32 %v6079_v40, %v2988_v53  ;;  %v4969_v57 = vpop.f32.mrb[68].mxu1  ;;  %v3122_v62 = vmax.f32 %v3058_v33, 0.0 }
 0x178   : > { %v2011_v61 = vpop.f32.mrb[69].mxu0  ;;  %v3125_v56 = vmax.f32 %v3061_v1, 0.0  ;;  %v2929_v13 = vmax.f32 %v4901_v19, %v4969_v57  ;;  %v2620_v29 = vpop.f32.mrb[69].mxu1  ;;  %v6747_v19 = vmax.f32 %v5699_v10, %v5705_v14 }
 0x179   : > { %v4902_v58 = vpop.f32.mrb[70].mxu0  ;;  %v3123_v35 = vmax.f32 %v3059_v54, 0.0  ;;  %v2927_v45 = vmax.f32 %v2011_v61, %v2620_v29  ;;  %v4970_v7 = vpop.f32.mrb[70].mxu1  ;;  %v6748_v54 = vmax.f32 %v5707_v15, %v5712_v18 }
 0x17a   : > { %v2014_v16 = vpop.f32.mrb[71].mxu0  ;;  %v4436_v63 = vpack.c.bf16 %v3125_v56, %v3124_v8  ;;  %v2993_v3 = vmax.f32 %v6745_v2, %v2929_v13  ;;  %v2930_v43 = vmax.f32 %v4902_v58, %v4970_v7  ;;  %v2623_v17 = vpop.f32.mrb[71].mxu1 }
 0x17b   : > { %v4431_v52 = vpack.c.bf16 %v3123_v35, %v3122_v62  ;;  %v2991_v53 = vmax.f32 %v6746_v24, %v2927_v45  ;;  %v2928_v1 = vmax.f32 %v2014_v16, %v2623_v17  ;;  %v6749_v16 = vmax.f32 %v5720_v20, %v5722_v21 }
 0x17c   : > { %4588 = vst [vmem:[%s6104_s21 + $0x8] sm:$0xff] %v4436_v63   ;;  %v3064_v33 = vadd.f32 %v6079_v40, %v2993_v3  ;;  %v2994_v4 = vmax.f32 %v6747_v19, %v2930_v43  ;;  %v6750_v17 = vmax.f32 %v5724_v22, %v5729_v25  ;;  %v6752_v20 = vmax.f32 %v5739_v31, %v5744_v34 }
 0x17d   : > { %4432 = vst [vmem:[%s6104_s21] sm:$0xff] %v4431_v52   ;;  %v3062_v5 = vadd.f32 %v6079_v40, %v2991_v53  ;;  %v2992_v6 = vmax.f32 %v6748_v54, %v2928_v1  ;;  %v6751_v1 = vmax.f32 %v5731_v26, %v5737_v30 }
 0x17e   : > { %v3065_v9 = vadd.f32 %v6079_v40, %v2994_v4  ;;  %v3128_v13 = vmax.f32 %v3064_v33, 0.0 }
 0x17f   : > { %v4905_v57 = vpop.f32.mrb[72].mxu0  ;;  %v3063_v61 = vadd.f32 %v6079_v40, %v2992_v6  ;;  %v4973_v8 = vpop.f32.mrb[72].mxu1  ;;  %v3126_v62 = vmax.f32 %v3062_v5, 0.0 }
 0x180   : > { %v2027_v56 = vpop.f32.mrb[73].mxu0  ;;  %v3129_v29 = vmax.f32 %v3065_v9, 0.0  ;;  %v2933_v58 = vmax.f32 %v4905_v57, %v4973_v8  ;;  %v2636_v10 = vpop.f32.mrb[73].mxu1 }
 0x181   : > { %v4906_v14 = vpop.f32.mrb[74].mxu0  ;;  %v3127_v35 = vmax.f32 %v3063_v61, 0.0  ;;  %v2931_v45 = vmax.f32 %v2027_v56, %v2636_v10  ;;  %v4974_v7 = vpop.f32.mrb[74].mxu1 }
 0x182   : > { %v2030_v15 = vpop.f32.mrb[75].mxu0  ;;  %v4446_v18 = vpack.c.bf16 %v3129_v29, %v3128_v13  ;;  %v2997_v63 = vmax.f32 %v6749_v16, %v2933_v58  ;;  %v2934_v2 = vmax.f32 %v4906_v14, %v4974_v7  ;;  %v2639_v3 = vpop.f32.mrb[75].mxu1  ;;  %v6753_v29 = vmax.f32 %v5752_v36, %v5754_v37 }
 0x183   : > { %v4441_v43 = vpack.c.bf16 %v3127_v35, %v3126_v62  ;;  %v2995_v52 = vmax.f32 %v6750_v17, %v2931_v45  ;;  %v2932_v24 = vmax.f32 %v2030_v15, %v2639_v3  ;;  %v6754_v35 = vmax.f32 %v5756_v38, %v5761_v41 }
 0x184   : > { %4590 = vst [vmem:[%s6104_s21 + $0x18] sm:$0xff] %v4446_v18   ;;  %v3068_v53 = vadd.f32 %v6079_v40, %v2997_v63  ;;  %v2998_v33 = vmax.f32 %v6751_v1, %v2934_v2  ;;  %v6755_v18 = vmax.f32 %v5763_v42, %v5769_v46  ;;  %v6756_v36 = vmax.f32 %v5771_v47, %v5776_v50 }
 0x185   : > { %4589 = vst [vmem:[%s6104_s21 + $0x10] sm:$0xff] %v4441_v43   ;;  %v3066_v19 = vadd.f32 %v6079_v40, %v2995_v52  ;;  %v2996_v21 = vmax.f32 %v6752_v20, %v2932_v24  ;;  %v6757_v20 = vmax.f32 %v5784_v55, %v5786_v59  ;;  %v6760_v55 = vmax.f32 %v5802_v28, %v5806_v39 }
 0x186   : > { %v3069_v4 = vadd.f32 %v6079_v40, %v2998_v33  ;;  %v3132_v6 = vmax.f32 %v3068_v53, 0.0 }
 0x187   : > { %v4909_v5 = vpop.f32.mrb[76].mxu0  ;;  %v3067_v22 = vadd.f32 %v6079_v40, %v2996_v21  ;;  %v4977_v25 = vpop.f32.mrb[76].mxu1  ;;  %v3130_v61 = vmax.f32 %v3066_v19, 0.0 }
 0x188   : > { %v2043_v54 = vpop.f32.mrb[77].mxu0  ;;  %v3133_v9 = vmax.f32 %v3069_v4, 0.0  ;;  %v2937_v57 = vmax.f32 %v4909_v5, %v4977_v25  ;;  %v2652_v26 = vpop.f32.mrb[77].mxu1  ;;  %v6758_v25 = vmax.f32 %v5788_v60, %v5793_v11 }
 0x189   : > { %v4910_v30 = vpop.f32.mrb[78].mxu0  ;;  %v3131_v8 = vmax.f32 %v3067_v22, 0.0  ;;  %v2935_v56 = vmax.f32 %v2043_v54, %v2652_v26  ;;  %v4978_v13 = vpop.f32.mrb[78].mxu1 }
 0x18a   : > { %v2046_v31 = vpop.f32.mrb[79].mxu0  ;;  %v4456_v34 = vpack.c.bf16 %v3133_v9, %v3132_v6  ;;  %v3001_v58 = vmax.f32 %v6753_v29, %v2937_v57  ;;  %v2938_v10 = vmax.f32 %v4910_v30, %v4978_v13  ;;  %v2655_v14 = vpop.f32.mrb[79].mxu1  ;;  %v6759_v57 = vmax.f32 %v5795_v12, %v5800_v27 }
 0x18b   : > { %v4451_v62 = vpack.c.bf16 %v3131_v8, %v3130_v61  ;;  %v2999_v45 = vmax.f32 %v6754_v35, %v2935_v56  ;;  %v2936_v7 = vmax.f32 %v2046_v31, %v2655_v14 }
 0x18c   : > { %4592 = vst [vmem:[%s6104_s21 + $0x28] sm:$0xff] %v4456_v34   ;;  %v3072_v15 = vadd.f32 %v6079_v40, %v3001_v58  ;;  %v3002_v16 = vmax.f32 %v6755_v18, %v2938_v10  ;;  %v6762_v18 = vmax.f32 %v5816_v23, %v5820_v51 }
 0x18d   : > { %4591 = vst [vmem:[%s6104_s21 + $0x20] sm:$0xff] %v4451_v62   ;;  %v3070_v63 = vadd.f32 %v6079_v40, %v2999_v45  ;;  %v3000_v37 = vmax.f32 %v6756_v36, %v2936_v7  ;;  %v6761_v62 = vmax.f32 %v5812_v44, %v5814_v48  ;;  %v6764_v44 = vld [vmem:[#allocation3_spill] sm:$0xff] }
 0x18e   : > { %v3073_v2 = vadd.f32 %v6079_v40, %v3002_v16  ;;  %v3136_v17 = vmax.f32 %v3072_v15, 0.0  ;;  %v6765_v48 = vmax.f32 %v5828_v0, %v6764_v44 }
 0x18f   : > { %v4913_v3 = vpop.f32.mrb[80].mxu0  ;;  %v3071_v38 = vadd.f32 %v6079_v40, %v3000_v37  ;;  %v4981_v41 = vpop.f32.mrb[80].mxu1  ;;  %v3134_v53 = vmax.f32 %v3070_v63, 0.0  ;;  %v6763_v37 = vmax.f32 %v5822_v32, %v5826_v49 }
 0x190   : > { %v2059_v43 = vpop.f32.mrb[81].mxu0  ;;  %v3137_v52 = vmax.f32 %v3073_v2, 0.0  ;;  %v2941_v24 = vmax.f32 %v4913_v3, %v4981_v41  ;;  %v2668_v42 = vpop.f32.mrb[81].mxu1 }
 0x191   : > { %v4914_v46 = vpop.f32.mrb[82].mxu0  ;;  %v3135_v1 = vmax.f32 %v3071_v38, 0.0  ;;  %v2939_v33 = vmax.f32 %v2059_v43, %v2668_v42  ;;  %v4982_v19 = vpop.f32.mrb[82].mxu1 }
 0x192   : > { %v2062_v47 = vpop.f32.mrb[83].mxu0  ;;  %v4466_v50 = vpack.c.bf16 %v3137_v52, %v3136_v17  ;;  %v3005_v21 = vmax.f32 %v6757_v20, %v2941_v24  ;;  %v2942_v4 = vmax.f32 %v4914_v46, %v4982_v19  ;;  %v2671_v5 = vpop.f32.mrb[83].mxu1 }
 0x193   : > { %v4461_v22 = vpack.c.bf16 %v3135_v1, %v3134_v53  ;;  %v3003_v54 = vmax.f32 %v6758_v25, %v2939_v33  ;;  %v2940_v6 = vmax.f32 %v2062_v47, %v2671_v5  ;;  %v6766_v47 = vld [vmem:[#allocation4_spill] sm:$0xff]  ;;  %v6769_v25 = vld [vmem:[#allocation6_spill] sm:$0xff] }
 0x194   : > { %4594 = vst [vmem:[%s6104_s21 + $0x38] sm:$0xff] %v4466_v50   ;;  %v3076_v9 = vadd.f32 %v6079_v40, %v3005_v21  ;;  %v3006_v26 = vmax.f32 %v6759_v57, %v2942_v4  ;;  %v6767_v50 = vld [vmem:[#allocation5_spill] sm:$0xff] }
 0x195   : > { %4593 = vst [vmem:[%s6104_s21 + $0x30] sm:$0xff] %v4461_v22   ;;  %v3074_v30 = vadd.f32 %v6079_v40, %v3003_v54  ;;  %v3004_v59 = vmax.f32 %v6760_v55, %v2940_v6  ;;  %v6768_v20 = vmax.f32 %v6766_v47, %v6767_v50  ;;  %v6770_v54 = vld [vmem:[#allocation7_spill] sm:$0xff]  ;;  %v6773_v55 = vld [vmem:[#allocation9_spill] sm:$0xff] }
 0x196   : > { %v3077_v61 = vadd.f32 %v6079_v40, %v3006_v26  ;;  %v3140_v13 = vmax.f32 %v3076_v9, 0.0  ;;  %v6771_v6 = vmax.f32 %v6769_v25, %v6770_v54 }
 0x197   : > { %v4917_v8 = vpop.f32.mrb[84].mxu0  ;;  %v3075_v60 = vadd.f32 %v6079_v40, %v3004_v59  ;;  %v4985_v11 = vpop.f32.mrb[84].mxu1  ;;  %v3138_v29 = vmax.f32 %v3074_v30, 0.0  ;;  %v6772_v30 = vld [vmem:[#allocation8_spill] sm:$0xff] }
 0x198   : > { %v2075_v56 = vpop.f32.mrb[85].mxu0  ;;  %v3141_v31 = vmax.f32 %v3077_v61, 0.0  ;;  %v2945_v34 = vmax.f32 %v4917_v8, %v4985_v11  ;;  %v2684_v12 = vpop.f32.mrb[85].mxu1  ;;  %v6774_v59 = vmax.f32 %v6772_v30, %v6773_v55  ;;  %v6776_v11 = vld [vmem:[#allocation11_spill] sm:$0xff]  ;;  %v6790_v30 = vld [vmem:[#allocation20_spill] sm:$0xff]  ;;  %v6791_v55 = vld [vmem:[#allocation21_spill] sm:$0xff] }
 0x199   : > { %v4918_v27 = vpop.f32.mrb[86].mxu0  ;;  %v3139_v58 = vmax.f32 %v3075_v60, 0.0  ;;  %v2943_v10 = vmax.f32 %v2075_v56, %v2684_v12  ;;  %v4986_v14 = vpop.f32.mrb[86].mxu1  ;;  %v6775_v60 = vld [vmem:[#allocation10_spill] sm:$0xff] }
 0x19a   : > { %v2078_v28 = vpop.f32.mrb[87].mxu0  ;;  %v4476_v39 = vpack.c.bf16 %v3141_v31, %v3140_v13  ;;  %v3009_v35 = vmax.f32 %v6761_v62, %v2945_v34  ;;  %v2946_v45 = vmax.f32 %v4918_v27, %v4986_v14  ;;  %v2687_v7 = vpop.f32.mrb[87].mxu1  ;;  %v6777_v56 = vmax.f32 %v6775_v60, %v6776_v11 }
 0x19b   : > { %v4471_v15 = vpack.c.bf16 %v3139_v58, %v3138_v29  ;;  %v3007_v16 = vmax.f32 %v6762_v18, %v2943_v10  ;;  %v2944_v63 = vmax.f32 %v2078_v28, %v2687_v7 }
 0x19c   : > { %4596 = vst [vmem:[%s6104_s21 + $0x48] sm:$0xff] %v4476_v39   ;;  %v3080_v36 = vadd.f32 %v6079_v40, %v3009_v35  ;;  %v3010_v2 = vmax.f32 %v6763_v37, %v2946_v45 }
 0x19d   : > { %4595 = vst [vmem:[%s6104_s21 + $0x40] sm:$0xff] %v4471_v15   ;;  %v3078_v3 = vadd.f32 %v6079_v40, %v3007_v16  ;;  %v3008_v38 = vmax.f32 %v6765_v48, %v2944_v63  ;;  %v6778_v16 = vld [vmem:[#allocation12_spill] sm:$0xff]  ;;  %v6779_v63 = vld [vmem:[#allocation13_spill] sm:$0xff]  ;;  %v6781_v48 = vld [vmem:[#allocation14_spill] sm:$0xff] }
 0x19e   : > { %v3081_v41 = vadd.f32 %v6079_v40, %v3010_v2  ;;  %v3144_v52 = vmax.f32 %v3080_v36, 0.0  ;;  %v6780_v36 = vmax.f32 %v6778_v16, %v6779_v63 }
 0x19f   : > { %v4921_v43 = vpop.f32.mrb[88].mxu0  ;;  %v3079_v51 = vadd.f32 %v6079_v40, %v3008_v38  ;;  %v4989_v23 = vpop.f32.mrb[88].mxu1  ;;  %v3142_v46 = vmax.f32 %v3078_v3, 0.0  ;;  %v6782_v38 = vld [vmem:[#allocation15_spill] sm:$0xff] }
 0x1a0   : > { %v2091_v17 = vpop.f32.mrb[89].mxu0  ;;  %v3145_v24 = vmax.f32 %v3081_v41, 0.0  ;;  %v2949_v42 = vmax.f32 %v4921_v43, %v4989_v23  ;;  %v2700_v49 = vpop.f32.mrb[89].mxu1  ;;  %v6783_v41 = vmax.f32 %v6781_v48, %v6782_v38 }
 0x1a1   : > { %v4922_v32 = vpop.f32.mrb[90].mxu0  ;;  %v3143_v53 = vmax.f32 %v3079_v51, 0.0  ;;  %v2947_v1 = vmax.f32 %v2091_v17, %v2700_v49  ;;  %v4990_v33 = vpop.f32.mrb[90].mxu1  ;;  %v6784_v17 = vld [vmem:[#allocation16_spill] sm:$0xff] }
 0x1a2   : > { %v2094_v0 = vpop.f32.mrb[91].mxu0  ;;  %v4486_v19 = vpack.c.bf16 %v3145_v24, %v3144_v52  ;;  %v3013_v21 = vmax.f32 %v6768_v20, %v2949_v42  ;;  %v2950_v4 = vmax.f32 %v4922_v32, %v4990_v33  ;;  %v2703_v5 = vpop.f32.mrb[91].mxu1  ;;  %v6785_v52 = vld [vmem:[#allocation17_spill] sm:$0xff]  ;;  %v6787_v32 = vld [vmem:[#allocation18_spill] sm:$0xff] }
 0x1a3   : > { %v4481_v22 = vpack.c.bf16 %v3143_v53, %v3142_v46  ;;  %v3011_v9 = vmax.f32 %v6771_v6, %v2947_v1  ;;  %v2948_v57 = vmax.f32 %v2094_v0, %v2703_v5  ;;  %v6786_v24 = vmax.f32 %v6784_v17, %v6785_v52  ;;  %v6788_v46 = vld [vmem:[#allocation19_spill] sm:$0xff]  ;;  %v6802_v17 = vld [vmem:[#allocation28_spill] sm:$0xff]  ;;  %v6803_v52 = vld [vmem:[#allocation29_spill] sm:$0xff] }
 0x1a4   : > { %4598 = vst [vmem:[%s6104_s21 + $0x58] sm:$0xff] %v4486_v19   ;;  %v3084_v26 = vadd.f32 %v6079_v40, %v3013_v21  ;;  %v3014_v61 = vmax.f32 %v6774_v59, %v2950_v4  ;;  %v6789_v53 = vmax.f32 %v6787_v32, %v6788_v46  ;;  %v6792_v59 = vmax.f32 %v6790_v30, %v6791_v55 }
 0x1a5   : > { %4597 = vst [vmem:[%s6104_s21 + $0x50] sm:$0xff] %v4481_v22   ;;  %v3082_v8 = vadd.f32 %v6079_v40, %v3011_v9  ;;  %v3012_v13 = vmax.f32 %v6777_v56, %v2948_v57  ;;  %v6793_v56 = vld [vmem:[#allocation22_spill] sm:$0xff] }
 0x1a6   : > { %v3085_v31 = vadd.f32 %v6079_v40, %v3014_v61  ;;  %v3148_v58 = vmax.f32 %v3084_v26, 0.0 }
 0x1a7   : > { %v4925_v34 = vpop.f32.mrb[92].mxu0  ;;  %v3083_v12 = vadd.f32 %v6079_v40, %v3012_v13  ;;  %v4993_v27 = vpop.f32.mrb[92].mxu1  ;;  %v3146_v62 = vmax.f32 %v3082_v8, 0.0  ;;  %v6794_v13 = vld [vmem:[#allocation23_spill] sm:$0xff] }
 0x1a8   : > { %v2107_v29 = vpop.f32.mrb[93].mxu0  ;;  %v3149_v10 = vmax.f32 %v3085_v31, 0.0  ;;  %v2953_v14 = vmax.f32 %v4925_v34, %v4993_v27  ;;  %v2716_v28 = vpop.f32.mrb[93].mxu1  ;;  %v6795_v31 = vmax.f32 %v6793_v56, %v6794_v13 }
 0x1a9   : > { %v4926_v39 = vpop.f32.mrb[94].mxu0  ;;  %v3147_v35 = vmax.f32 %v3083_v12, 0.0  ;;  %v2951_v45 = vmax.f32 %v2107_v29, %v2716_v28  ;;  %v4994_v7 = vpop.f32.mrb[94].mxu1  ;;  %v6796_v29 = vld [vmem:[#allocation24_spill] sm:$0xff] }
 0x1aa   : > { %v2110_v15 = vpop.f32.mrb[95].mxu0  ;;  %v4496_v18 = vpack.c.bf16 %v3149_v10, %v3148_v58  ;;  %v3017_v37 = vmax.f32 %v6780_v36, %v2953_v14  ;;  %v2954_v2 = vmax.f32 %v4926_v39, %v4994_v7  ;;  %v2719_v3 = vpop.f32.mrb[95].mxu1  ;;  %v6797_v58 = vld [vmem:[#allocation25_spill] sm:$0xff]  ;;  %v6799_v39 = vld [vmem:[#allocation26_spill] sm:$0xff] }
 0x1ab   : > { %v4491_v44 = vpack.c.bf16 %v3147_v35, %v3146_v62  ;;  %v3015_v43 = vmax.f32 %v6783_v41, %v2951_v45  ;;  %v2952_v51 = vmax.f32 %v2110_v15, %v2719_v3  ;;  %v6798_v10 = vmax.f32 %v6796_v29, %v6797_v58  ;;  %v6800_v62 = vld [vmem:[#allocation27_spill] sm:$0xff]  ;;  %v6814_v29 = vld [vmem:[#allocation36_spill] sm:$0xff]  ;;  %v6815_v58 = vld [vmem:[#allocation37_spill] sm:$0xff] }
 0x1ac   : > { %4600 = vst [vmem:[%s6104_s21 + $0x68] sm:$0xff] %v4496_v18   ;;  %v3088_v23 = vadd.f32 %v6079_v40, %v3017_v37  ;;  %v3018_v42 = vmax.f32 %v6786_v24, %v2954_v2  ;;  %v6801_v35 = vmax.f32 %v6799_v39, %v6800_v62  ;;  %v6804_v24 = vmax.f32 %v6802_v17, %v6803_v52 }
 0x1ad   : > { %4599 = vst [vmem:[%s6104_s21 + $0x60] sm:$0xff] %v4491_v44   ;;  %v3086_v49 = vadd.f32 %v6079_v40, %v3015_v43  ;;  %v3016_v1 = vmax.f32 %v6789_v53, %v2952_v51  ;;  %v6805_v53 = vld [vmem:[#allocation30_spill] sm:$0xff] }
 0x1ae   : > { %v3089_v33 = vadd.f32 %v6079_v40, %v3018_v42  ;;  %v3152_v20 = vmax.f32 %v3088_v23, 0.0 }
 0x1af   : > { %v4929_v0 = vpop.f32.mrb[96].mxu0  ;;  %v3087_v19 = vadd.f32 %v6079_v40, %v3016_v1  ;;  %v4997_v47 = vpop.f32.mrb[96].mxu1  ;;  %v3150_v25 = vmax.f32 %v3086_v49, 0.0  ;;  %v6806_v1 = vld [vmem:[#allocation31_spill] sm:$0xff] }
 0x1b0   : > { %v2123_v50 = vpop.f32.mrb[97].mxu0  ;;  %v3153_v21 = vmax.f32 %v3089_v33, 0.0  ;;  %v2957_v4 = vmax.f32 %v4929_v0, %v4997_v47  ;;  %v2732_v5 = vpop.f32.mrb[97].mxu1  ;;  %v6807_v33 = vmax.f32 %v6805_v53, %v6806_v1 }
 0x1b1   : > { %v4930_v22 = vpop.f32.mrb[98].mxu0  ;;  %v3151_v54 = vmax.f32 %v3087_v19, 0.0  ;;  %v2955_v6 = vmax.f32 %v2123_v50, %v2732_v5  ;;  %v4998_v9 = vpop.f32.mrb[98].mxu1  ;;  %v6808_v50 = vld [vmem:[#allocation32_spill] sm:$0xff] }
 0x1b2   : > { %v2126_v57 = vpop.f32.mrb[99].mxu0  ;;  %v4506_v26 = vpack.c.bf16 %v3153_v21, %v3152_v20  ;;  %v3021_v61 = vmax.f32 %v6792_v59, %v2957_v4  ;;  %v2958_v8 = vmax.f32 %v4930_v22, %v4998_v9  ;;  %v2735_v60 = vpop.f32.mrb[99].mxu1  ;;  %v6809_v20 = vld [vmem:[#allocation33_spill] sm:$0xff]  ;;  %v6811_v22 = vld [vmem:[#allocation34_spill] sm:$0xff] }
 0x1b3   : > { %v4501_v11 = vpack.c.bf16 %v3151_v54, %v3150_v25  ;;  %v3019_v34 = vmax.f32 %v6795_v31, %v2955_v6  ;;  %v2956_v12 = vmax.f32 %v2126_v57, %v2735_v60  ;;  %v6810_v21 = vmax.f32 %v6808_v50, %v6809_v20  ;;  %v6812_v25 = vld [vmem:[#allocation35_spill] sm:$0xff]  ;;  %v6826_v50 = vld [vmem:[#allocation44_spill] sm:$0xff]  ;;  %v6827_v20 = vld [vmem:[#allocation45_spill] sm:$0xff] }
 0x1b4   : > { %4602 = vst [vmem:[%s6104_s21 + $0x78] sm:$0xff] %v4506_v26   ;;  %v3092_v27 = vadd.f32 %v6079_v40, %v3021_v61  ;;  %v3022_v14 = vmax.f32 %v6798_v10, %v2958_v8  ;;  %v6813_v54 = vmax.f32 %v6811_v22, %v6812_v25  ;;  %v6816_v10 = vmax.f32 %v6814_v29, %v6815_v58 }
 0x1b5   : > { %4601 = vst [vmem:[%s6104_s21 + $0x70] sm:$0xff] %v4501_v11   ;;  %v3090_v28 = vadd.f32 %v6079_v40, %v3019_v34  ;;  %v3020_v45 = vmax.f32 %v6801_v35, %v2956_v12  ;;  %v6817_v35 = vld [vmem:[#allocation38_spill] sm:$0xff] }
 0x1b6   : > { %v3093_v7 = vadd.f32 %v6079_v40, %v3022_v14  ;;  %v3156_v36 = vmax.f32 %v3092_v27, 0.0 }
 0x1b7   : > { %v4933_v15 = vpop.f32.mrb[100].mxu0  ;;  %v3091_v18 = vadd.f32 %v6079_v40, %v3020_v45  ;;  %v5001_v16 = vpop.f32.mrb[100].mxu1  ;;  %v3154_v48 = vmax.f32 %v3090_v28, 0.0  ;;  %v6818_v45 = vld [vmem:[#allocation39_spill] sm:$0xff] }
 0x1b8   : > { %v2139_v63 = vpop.f32.mrb[101].mxu0  ;;  %v3157_v37 = vmax.f32 %v3093_v7, 0.0  ;;  %v2961_v2 = vmax.f32 %v4933_v15, %v5001_v16  ;;  %v2748_v3 = vpop.f32.mrb[101].mxu1  ;;  %v6819_v7 = vmax.f32 %v6817_v35, %v6818_v45 }
 0x1b9   : > { %v4934_v44 = vpop.f32.mrb[102].mxu0  ;;  %v3155_v38 = vmax.f32 %v3091_v18, 0.0  ;;  %v2959_v41 = vmax.f32 %v2139_v63, %v2748_v3  ;;  %v5002_v43 = vpop.f32.mrb[102].mxu1  ;;  %v6820_v63 = vld [vmem:[#allocation40_spill] sm:$0xff] }
 0x1ba   : > { %v2142_v51 = vpop.f32.mrb[103].mxu0  ;;  %v4516_v23 = vpack.c.bf16 %v3157_v37, %v3156_v36  ;;  %v3025_v42 = vmax.f32 %v6804_v24, %v2961_v2  ;;  %v2962_v49 = vmax.f32 %v4934_v44, %v5002_v43  ;;  %v2751_v32 = vpop.f32.mrb[103].mxu1  ;;  %v6821_v36 = vld [vmem:[#allocation41_spill] sm:$0xff]  ;;  %v6823_v44 = vld [vmem:[#allocation42_spill] sm:$0xff] }
 0x1bb   : > { %v4511_v46 = vpack.c.bf16 %v3155_v38, %v3154_v48  ;;  %v3023_v0 = vmax.f32 %v6807_v33, %v2959_v41  ;;  %v2960_v19 = vmax.f32 %v2142_v51, %v2751_v32  ;;  %v6822_v37 = vmax.f32 %v6820_v63, %v6821_v36  ;;  %v6824_v48 = vld [vmem:[#allocation43_spill] sm:$0xff]  ;;  %v6838_v63 = vld [vmem:[#allocation52_spill] sm:$0xff]  ;;  %v6839_v36 = vld [vmem:[#allocation53_spill] sm:$0xff] }
 0x1bc   : > { %4604 = vst [vmem:[%s6104_s21 + $0x88] sm:$0xff] %v4516_v23   ;;  %v3096_v47 = vadd.f32 %v6079_v40, %v3025_v42  ;;  %v3026_v4 = vmax.f32 %v6810_v21, %v2962_v49  ;;  %v6825_v38 = vmax.f32 %v6823_v44, %v6824_v48  ;;  %v6828_v21 = vmax.f32 %v6826_v50, %v6827_v20 }
 0x1bd   : > { %4603 = vst [vmem:[%s6104_s21 + $0x80] sm:$0xff] %v4511_v46   ;;  %v3094_v5 = vadd.f32 %v6079_v40, %v3023_v0  ;;  %v3024_v6 = vmax.f32 %v6813_v54, %v2960_v19  ;;  %v6829_v54 = vld [vmem:[#allocation46_spill] sm:$0xff] }
 0x1be   : > { %v3097_v9 = vadd.f32 %v6079_v40, %v3026_v4  ;;  %v3160_v59 = vmax.f32 %v3096_v47, 0.0 }
 0x1bf   : > { %v4937_v57 = vpop.f32.mrb[104].mxu0  ;;  %v3095_v26 = vadd.f32 %v6079_v40, %v3024_v6  ;;  %v5005_v30 = vpop.f32.mrb[104].mxu1  ;;  %v3158_v56 = vmax.f32 %v3094_v5, 0.0  ;;  %v6830_v6 = vld [vmem:[#allocation47_spill] sm:$0xff] }
 0x1c0   : > { %v2155_v55 = vpop.f32.mrb[105].mxu0  ;;  %v3161_v61 = vmax.f32 %v3097_v9, 0.0  ;;  %v2965_v8 = vmax.f32 %v4937_v57, %v5005_v30  ;;  %v2764_v60 = vpop.f32.mrb[105].mxu1  ;;  %v6831_v9 = vmax.f32 %v6829_v54, %v6830_v6 }
 0x1c1   : > { %v4938_v11 = vpop.f32.mrb[106].mxu0  ;;  %v3159_v13 = vmax.f32 %v3095_v26, 0.0  ;;  %v2963_v31 = vmax.f32 %v2155_v55, %v2764_v60  ;;  %v5006_v34 = vpop.f32.mrb[106].mxu1  ;;  %v6832_v55 = vld [vmem:[#allocation48_spill] sm:$0xff] }
 0x1c2   : > { %v2158_v12 = vpop.f32.mrb[107].mxu0  ;;  %v4526_v27 = vpack.c.bf16 %v3161_v61, %v3160_v59  ;;  %v3029_v14 = vmax.f32 %v6816_v10, %v2965_v8  ;;  %v2966_v28 = vmax.f32 %v4938_v11, %v5006_v34  ;;  %v2767_v39 = vpop.f32.mrb[107].mxu1  ;;  %v6833_v59 = vld [vmem:[#allocation49_spill] sm:$0xff]  ;;  %v6835_v11 = vld [vmem:[#allocation50_spill] sm:$0xff] }
 0x1c3   : > { %v4521_v62 = vpack.c.bf16 %v3159_v13, %v3158_v56  ;;  %v3027_v15 = vmax.f32 %v6819_v7, %v2963_v31  ;;  %v2964_v18 = vmax.f32 %v2158_v12, %v2767_v39  ;;  %v6834_v61 = vmax.f32 %v6832_v55, %v6833_v59  ;;  %v6836_v56 = vld [vmem:[#allocation51_spill] sm:$0xff]  ;;  %v6850_v55 = vld [vmem:[#allocation60_spill] sm:$0xff]  ;;  %v6851_v59 = vld [vmem:[#allocation61_spill] sm:$0xff] }
 0x1c4   : > { %4606 = vst [vmem:[%s6104_s21 + $0x98] sm:$0xff] %v4526_v27   ;;  %v3100_v16 = vadd.f32 %v6079_v40, %v3029_v14  ;;  %v3030_v2 = vmax.f32 %v6822_v37, %v2966_v28  ;;  %v6837_v13 = vmax.f32 %v6835_v11, %v6836_v56  ;;  %v6840_v37 = vmax.f32 %v6838_v63, %v6839_v36 }
 0x1c5   : > { %4605 = vst [vmem:[%s6104_s21 + $0x90] sm:$0xff] %v4521_v62   ;;  %v3098_v3 = vadd.f32 %v6079_v40, %v3027_v15  ;;  %v3028_v41 = vmax.f32 %v6825_v38, %v2964_v18  ;;  %v6841_v38 = vld [vmem:[#allocation54_spill] sm:$0xff] }
 0x1c6   : > { %v3101_v43 = vadd.f32 %v6079_v40, %v3030_v2  ;;  %v3164_v24 = vmax.f32 %v3100_v16, 0.0 }
 0x1c7   : > { %v4941_v51 = vpop.f32.mrb[108].mxu0  ;;  %v3099_v23 = vadd.f32 %v6079_v40, %v3028_v41  ;;  %v5009_v17 = vpop.f32.mrb[108].mxu1  ;;  %v3162_v53 = vmax.f32 %v3098_v3, 0.0  ;;  %v6842_v41 = vld [vmem:[#allocation55_spill] sm:$0xff] }
 0x1c8   : > { %v2171_v52 = vpop.f32.mrb[109].mxu0  ;;  %v3165_v42 = vmax.f32 %v3101_v43, 0.0  ;;  %v2969_v49 = vmax.f32 %v4941_v51, %v5009_v17  ;;  %v2780_v32 = vpop.f32.mrb[109].mxu1  ;;  %v6843_v43 = vmax.f32 %v6841_v38, %v6842_v41 }
 0x1c9   : > { %v4942_v46 = vpop.f32.mrb[110].mxu0  ;;  %v3163_v1 = vmax.f32 %v3099_v23, 0.0  ;;  %v2967_v33 = vmax.f32 %v2171_v52, %v2780_v32  ;;  %v5010_v0 = vpop.f32.mrb[110].mxu1  ;;  %v6844_v52 = vld [vmem:[#allocation56_spill] sm:$0xff] }
 0x1ca   : > { %v2174_v19 = vpop.f32.mrb[111].mxu0  ;;  %v4536_v47 = vpack.c.bf16 %v3165_v42, %v3164_v24  ;;  %v3033_v4 = vmax.f32 %v6828_v21, %v2969_v49  ;;  %v2970_v5 = vmax.f32 %v4942_v46, %v5010_v0  ;;  %v2783_v22 = vpop.f32.mrb[111].mxu1  ;;  %v6845_v24 = vld [vmem:[#allocation57_spill] sm:$0xff]  ;;  %v6847_v46 = vld [vmem:[#allocation58_spill] sm:$0xff] }
 0x1cb   : > { %v4531_v25 = vpack.c.bf16 %v3163_v1, %v3162_v53  ;;  %v3031_v57 = vmax.f32 %v6831_v9, %v2967_v33  ;;  %v2968_v26 = vmax.f32 %v2174_v19, %v2783_v22  ;;  %v6846_v42 = vmax.f32 %v6844_v52, %v6845_v24  ;;  %v6848_v53 = vld [vmem:[#allocation59_spill] sm:$0xff]  ;;  %v6862_v52 = vld [vmem:[#allocation68_spill] sm:$0xff]  ;;  %v6863_v24 = vld [vmem:[#allocation69_spill] sm:$0xff] }
 0x1cc   : > { %4608 = vst [vmem:[%s6104_s21 + $0xa8] sm:$0xff] %v4536_v47   ;;  %v3104_v30 = vadd.f32 %v6079_v40, %v3033_v4  ;;  %v3034_v8 = vmax.f32 %v6834_v61, %v2970_v5  ;;  %v6849_v1 = vmax.f32 %v6847_v46, %v6848_v53  ;;  %v6852_v61 = vmax.f32 %v6850_v55, %v6851_v59 }
 0x1cd   : > { %4607 = vst [vmem:[%s6104_s21 + $0xa0] sm:$0xff] %v4531_v25   ;;  %v3102_v60 = vadd.f32 %v6079_v40, %v3031_v57  ;;  %v3032_v31 = vmax.f32 %v6837_v13, %v2968_v26  ;;  %v6853_v13 = vld [vmem:[#allocation62_spill] sm:$0xff] }
 0x1ce   : > { %v3105_v34 = vadd.f32 %v6079_v40, %v3034_v8  ;;  %v3168_v10 = vmax.f32 %v3104_v30, 0.0 }
 0x1cf   : > { %v4945_v12 = vpop.f32.mrb[112].mxu0  ;;  %v3103_v27 = vadd.f32 %v6079_v40, %v3032_v31  ;;  %v5013_v29 = vpop.f32.mrb[112].mxu1  ;;  %v3166_v35 = vmax.f32 %v3102_v60, 0.0  ;;  %v6854_v31 = vld [vmem:[#allocation63_spill] sm:$0xff] }
 0x1d0   : > { %v2187_v58 = vpop.f32.mrb[113].mxu0  ;;  %v3169_v14 = vmax.f32 %v3105_v34, 0.0  ;;  %v2973_v28 = vmax.f32 %v4945_v12, %v5013_v29  ;;  %v2796_v39 = vpop.f32.mrb[113].mxu1  ;;  %v6855_v34 = vmax.f32 %v6853_v13, %v6854_v31 }
 0x1d1   : > { %v4946_v62 = vpop.f32.mrb[114].mxu0  ;;  %v3167_v45 = vmax.f32 %v3103_v27, 0.0  ;;  %v2971_v7 = vmax.f32 %v2187_v58, %v2796_v39  ;;  %v5014_v15 = vpop.f32.mrb[114].mxu1  ;;  %v6856_v58 = vld [vmem:[#allocation64_spill] sm:$0xff] }
 0x1d2   : > { %v2190_v18 = vpop.f32.mrb[115].mxu0  ;;  %v4546_v16 = vpack.c.bf16 %v3169_v14, %v3168_v10  ;;  %v3037_v2 = vmax.f32 %v6840_v37, %v2973_v28  ;;  %v2974_v3 = vmax.f32 %v4946_v62, %v5014_v15  ;;  %v2799_v44 = vpop.f32.mrb[115].mxu1  ;;  %v6857_v10 = vld [vmem:[#allocation65_spill] sm:$0xff]  ;;  %v6859_v62 = vld [vmem:[#allocation66_spill] sm:$0xff] }
 0x1d3   : > { %v4541_v48 = vpack.c.bf16 %v3167_v45, %v3166_v35  ;;  %v3035_v51 = vmax.f32 %v6843_v43, %v2971_v7  ;;  %v2972_v23 = vmax.f32 %v2190_v18, %v2799_v44  ;;  %v6858_v14 = vmax.f32 %v6856_v58, %v6857_v10  ;;  %v6860_v35 = vld [vmem:[#allocation67_spill] sm:$0xff]  ;;  %v6874_v58 = vld [vmem:[#allocation76_spill] sm:$0xff]  ;;  %v6875_v10 = vld [vmem:[#allocation77_spill] sm:$0xff] }
 0x1d4   : > { %4610 = vst [vmem:[%s6104_s21 + $0xb8] sm:$0xff] %v4546_v16   ;;  %v3108_v17 = vadd.f32 %v6079_v40, %v3037_v2  ;;  %v3038_v49 = vmax.f32 %v6846_v42, %v2974_v3  ;;  %v6861_v45 = vmax.f32 %v6859_v62, %v6860_v35  ;;  %v6864_v42 = vmax.f32 %v6862_v52, %v6863_v24 }
 0x1d5   : > { %4609 = vst [vmem:[%s6104_s21 + $0xb0] sm:$0xff] %v4541_v48   ;;  %v3106_v32 = vadd.f32 %v6079_v40, %v3035_v51  ;;  %v3036_v33 = vmax.f32 %v6849_v1, %v2972_v23  ;;  %v6865_v1 = vld [vmem:[#allocation70_spill] sm:$0xff] }
 0x1d6   : > { %v3109_v0 = vadd.f32 %v6079_v40, %v3038_v49  ;;  %v3172_v21 = vmax.f32 %v3108_v17, 0.0 }
 0x1d7   : > { %v4949_v19 = vpop.f32.mrb[116].mxu0  ;;  %v3107_v47 = vadd.f32 %v6079_v40, %v3036_v33  ;;  %v5017_v50 = vpop.f32.mrb[116].mxu1  ;;  %v3170_v54 = vmax.f32 %v3106_v32, 0.0  ;;  %v6866_v33 = vld [vmem:[#allocation71_spill] sm:$0xff] }
 0x1d8   : > { %v2203_v20 = vpop.f32.mrb[117].mxu0  ;;  %v3173_v4 = vmax.f32 %v3109_v0, 0.0  ;;  %v2977_v5 = vmax.f32 %v4949_v19, %v5017_v50  ;;  %v2812_v22 = vpop.f32.mrb[117].mxu1  ;;  %v6867_v0 = vmax.f32 %v6865_v1, %v6866_v33 }
 0x1d9   : > { %v4950_v25 = vpop.f32.mrb[118].mxu0  ;;  %v3171_v6 = vmax.f32 %v3107_v47, 0.0  ;;  %v2975_v9 = vmax.f32 %v2203_v20, %v2812_v22  ;;  %v5018_v57 = vpop.f32.mrb[118].mxu1  ;;  %v6868_v20 = vld [vmem:[#allocation72_spill] sm:$0xff] }
 0x1da   : > { %v2206_v26 = vpop.f32.mrb[119].mxu0  ;;  %v4556_v30 = vpack.c.bf16 %v3173_v4, %v3172_v21  ;;  %v3041_v8 = vmax.f32 %v6852_v61, %v2977_v5  ;;  %v2978_v60 = vmax.f32 %v4950_v25, %v5018_v57  ;;  %v2815_v11 = vpop.f32.mrb[119].mxu1  ;;  %v6869_v21 = vld [vmem:[#allocation73_spill] sm:$0xff]  ;;  %v6871_v25 = vld [vmem:[#allocation74_spill] sm:$0xff] }
 0x1db   : > { %v4551_v56 = vpack.c.bf16 %v3171_v6, %v3170_v54  ;;  %v3039_v12 = vmax.f32 %v6855_v34, %v2975_v9  ;;  %v2976_v27 = vmax.f32 %v2206_v26, %v2815_v11  ;;  %v6870_v4 = vmax.f32 %v6868_v20, %v6869_v21  ;;  %v6872_v54 = vld [vmem:[#allocation75_spill] sm:$0xff] }
 0x1dc   : > { %4612 = vst [vmem:[%s6104_s21 + $0xc8] sm:$0xff] %v4556_v30   ;;  %v3112_v29 = vadd.f32 %v6079_v40, %v3041_v8  ;;  %v3042_v28 = vmax.f32 %v6858_v14, %v2978_v60  ;;  %v6873_v6 = vmax.f32 %v6871_v25, %v6872_v54  ;;  %v6876_v14 = vmax.f32 %v6874_v58, %v6875_v10 }
 0x1dd   : > { %4611 = vst [vmem:[%s6104_s21 + $0xc0] sm:$0xff] %v4551_v56   ;;  %v3110_v39 = vadd.f32 %v6079_v40, %v3039_v12  ;;  %v3040_v7 = vmax.f32 %v6861_v45, %v2976_v27  ;;  %v6877_v45 = vld [vmem:[#allocation78_spill] sm:$0xff] }
 0x1de   : > { %v3113_v15 = vadd.f32 %v6079_v40, %v3042_v28  ;;  %v3176_v37 = vmax.f32 %v3112_v29, 0.0 }
 0x1df   : > { %v4953_v18 = vpop.f32.mrb[120].mxu0  ;;  %v3111_v16 = vadd.f32 %v6079_v40, %v3040_v7  ;;  %v5021_v63 = vpop.f32.mrb[120].mxu1  ;;  %v3174_v38 = vmax.f32 %v3110_v39, 0.0  ;;  %v6878_v7 = vld [vmem:[#allocation79_spill] sm:$0xff] }
 0x1e0   : > { %v2219_v36 = vpop.f32.mrb[121].mxu0  ;;  %v3177_v2 = vmax.f32 %v3113_v15, 0.0  ;;  %v2981_v3 = vmax.f32 %v4953_v18, %v5021_v63  ;;  %v2828_v44 = vpop.f32.mrb[121].mxu1  ;;  %v6879_v15 = vmax.f32 %v6877_v45, %v6878_v7 }
 0x1e1   : > { %v4954_v48 = vpop.f32.mrb[122].mxu0  ;;  %v3175_v41 = vmax.f32 %v3111_v16, 0.0  ;;  %v2979_v43 = vmax.f32 %v2219_v36, %v2828_v44  ;;  %v5022_v51 = vpop.f32.mrb[122].mxu1  ;;  %v6880_v36 = vld [vmem:[#allocation80_spill] sm:$0xff] }
 0x1e2   : > { %v2222_v23 = vpop.f32.mrb[123].mxu0  ;;  %v4566_v17 = vpack.c.bf16 %v3177_v2, %v3176_v37  ;;  %v3045_v49 = vmax.f32 %v6864_v42, %v2981_v3  ;;  %v2982_v32 = vmax.f32 %v4954_v48, %v5022_v51  ;;  %v2831_v46 = vpop.f32.mrb[123].mxu1  ;;  %v6881_v37 = vld [vmem:[#allocation81_spill] sm:$0xff]  ;;  %v6883_v48 = vld [vmem:[#allocation82_spill] sm:$0xff] }
 0x1e3   : > { %v4561_v53 = vpack.c.bf16 %v3175_v41, %v3174_v38  ;;  %v3043_v19 = vmax.f32 %v6867_v0, %v2979_v43  ;;  %v2980_v47 = vmax.f32 %v2222_v23, %v2831_v46  ;;  %v6882_v2 = vmax.f32 %v6880_v36, %v6881_v37  ;;  %v6884_v38 = vld [vmem:[#allocation83_spill] sm:$0xff] }
 0x1e4   : > { %4614 = vst [vmem:[%s6104_s21 + $0xd8] sm:$0xff] %v4566_v17   ;;  %v3116_v50 = vadd.f32 %v6079_v40, %v3045_v49  ;;  %v3046_v5 = vmax.f32 %v6870_v4, %v2982_v32  ;;  %v6885_v41 = vmax.f32 %v6883_v48, %v6884_v38 }
 0x1e5   : > { %4613 = vst [vmem:[%s6104_s21 + $0xd0] sm:$0xff] %v4561_v53   ;;  %v3114_v22 = vadd.f32 %v6079_v40, %v3043_v19  ;;  %v3044_v9 = vmax.f32 %v6873_v6, %v2980_v47 }
 0x1e6   : > { %v3117_v57 = vadd.f32 %v6079_v40, %v3046_v5  ;;  %v3180_v61 = vmax.f32 %v3116_v50, 0.0 }
 0x1e7   : > { %v4957_v26 = vpop.f32.mrb[124].mxu0  ;;  %v3115_v30 = vadd.f32 %v6079_v40, %v3044_v9  ;;  %v5025_v55 = vpop.f32.mrb[124].mxu1  ;;  %v3178_v13 = vmax.f32 %v3114_v22, 0.0 }
 0x1e8   : > { %v2235_v59 = vpop.f32.mrb[125].mxu0  ;;  %v3181_v8 = vmax.f32 %v3117_v57, 0.0  ;;  %v2985_v60 = vmax.f32 %v4957_v26, %v5025_v55  ;;  %v2844_v11 = vpop.f32.mrb[125].mxu1 }
 0x1e9   : > { %v4958_v56 = vpop.f32.mrb[126].mxu0  ;;  %v3179_v31 = vmax.f32 %v3115_v30, 0.0  ;;  %v2983_v34 = vmax.f32 %v2235_v59, %v2844_v11  ;;  %v5026_v12 = vpop.f32.mrb[126].mxu1 }
 0x1ea   : > { %v2238_v27 = vpop.f32.mrb[127].mxu0  ;;  %v4576_v29 = vpack.c.bf16 %v3181_v8, %v3180_v61  ;;  %v3049_v28 = vmax.f32 %v6876_v14, %v2985_v60  ;;  %v2986_v39 = vmax.f32 %v4958_v56, %v5026_v12  ;;  %v2847_v62 = vpop.f32.mrb[127].mxu1 }
 0x1eb   : > { %v4571_v35 = vpack.c.bf16 %v3179_v31, %v3178_v13  ;;  %v3047_v18 = vmax.f32 %v6879_v15, %v2983_v34  ;;  %v2984_v16 = vmax.f32 %v2238_v27, %v2847_v62 }
 0x1ec   : > { %4616 = vst [vmem:[%s6104_s21 + $0xe8] sm:$0xff] %v4576_v29   ;;  %v3120_v63 = vadd.f32 %v6079_v40, %v3049_v28  ;;  %v3050_v3 = vmax.f32 %v6882_v2, %v2986_v39 }
 0x1ed   : > { %4615 = vst [vmem:[%s6104_s21 + $0xe0] sm:$0xff] %v4571_v35   ;;  %v3118_v44 = vadd.f32 %v6079_v40, %v3047_v18  ;;  %v3048_v43 = vmax.f32 %v6885_v41, %v2984_v16 }
 0x1ee   : > { %v3121_v51 = vadd.f32 %v6079_v40, %v3050_v3  ;;  %v3184_v17 = vmax.f32 %v3120_v63, 0.0 }
 0x1ef   : > { %v3119_v23 = vadd.f32 %v6079_v40, %v3048_v43  ;;  %v3182_v24 = vmax.f32 %v3118_v44, 0.0  ;;  %3512 = sbr.rel (!%p5395_p4) target bundleno = 593 (0x251), region = 48 }
 0x1f0   : > { %v3185_v52 = vmax.f32 %v3121_v51, 0.0 }
 0x1f1   : > { %v3183_v42 = vmax.f32 %v3119_v23, 0.0 }
 0x1f2   : > { %v4586_v49 = vpack.c.bf16 %v3185_v52, %v3184_v17 }
 0x1f3   : > { %v4581_v32 = vpack.c.bf16 %v3183_v42, %v3182_v24 }
 0x1f4   : > { %4618 = vst [vmem:[%s6104_s21 + $0xf8] sm:$0xff] %v4586_v49  }
 0x1f5   : > { %4617 = vst [vmem:[%s6104_s21 + $0xf0] sm:$0xff] %v4581_v32  }
 0x1f6   : > { %s6893_s12 = smov (!%p3515_p8, %s3514_s12), 64 }
 0x1f7   : > { %s4346_s17 = sshll.u32 %s6893_s12, 6 }
 0x1f8   : > { %p4349_p9 = scmp.eq.s32.totalorder %s4346_s17, 0 }
 0x1f9   : > { %s6385_s18 = sshrl.u32 (!%p4349_p9), %s6893_s12, 6 }
 0x1fa   : > { %3523 = sbr.rel (%p4349_p9) target bundleno = 593 (0x251), region = 52  ;;  %p4350_p10 = scmp.le.s32.totalorder (!%p4349_p9), %s6385_s18, 0 }
 0x201   : > { %3946 = sbr.rel (%p4350_p10) target bundleno = 572 (0x23c), region = 133  ;;  %s6886_s24 = smov (!%p4350_p10), %s6379_s16 }
 0x202   : > { %s6887_s29 = smov (!%p4350_p10), %s6104_s21  ;;  %s6394_s10 = smov (!%p4350_p10), 0  }
 0x203   : > { %s6396_s19 = smov (!%p4350_p10), 0  }
 0x208 LB: >> { %v3539_v40 = vld [vmem:[%s5308_s29] sm:$0xf]  ;;  %v3541_v46 = vld [vmem:[%s5308_s29 + $0x4] sm:$0xf]  ;;  %v3543_v53 = vld [vmem:[%s5308_s29 + $0x8] sm:$0xf]  ;;  %s5316_s19 = sphi %s6396_s19, %s3533_s19   ;;  %s5312_s10 = sphi %s6394_s10, %s6888_s10   ;;  %s5308_s29 = sphi %s6887_s29, %s3672_s29   ;;  %s5304_s24 = sphi %s6886_s24, %s3673_s24  }
 0x209   : >> { %3540 = vst [vmem:[%s5304_s24] sm:$0xf] %v3539_v40  ;;  %3542 = vst [vmem:[%s5304_s24 + $0x4] sm:$0xf] %v3541_v46  ;;  %v3545_v1 = vld [vmem:[%s5308_s29 + $0xc] sm:$0xf]  ;;  %s3667_s20 = sadd.s32 1, %s5312_s10 }
 0x20a   : >> { %3544 = vst [vmem:[%s5304_s24 + $0x8] sm:$0xf] %v3543_v53  ;;  %v3547_v33 = vld [vmem:[%s5308_s29 + $0x10] sm:$0xf]  ;;  %v3549_v0 = vld [vmem:[%s5308_s29 + $0x14] sm:$0xf]  ;;  %p3668_p11 = scmp.ge.s32.totalorder %s3667_s20, %s6385_s18 }
 0x20b   : >> { %3546 = vst [vmem:[%s5304_s24 + $0xc] sm:$0xf] %v3545_v1  ;;  %3548 = vst [vmem:[%s5304_s24 + $0x10] sm:$0xf] %v3547_v33  ;;  %v3551_v19 = vld [vmem:[%s5308_s29 + $0x18] sm:$0xf] }
 0x20c   : >> { %3550 = vst [vmem:[%s5304_s24 + $0x14] sm:$0xf] %v3549_v0  ;;  %v3553_v47 = vld [vmem:[%s5308_s29 + $0x1c] sm:$0xf]  ;;  %v3555_v50 = vld [vmem:[%s5308_s29 + $0x20] sm:$0xf] }
 0x20d   : >> { %3552 = vst [vmem:[%s5304_s24 + $0x18] sm:$0xf] %v3551_v19  ;;  %3554 = vst [vmem:[%s5304_s24 + $0x1c] sm:$0xf] %v3553_v47  ;;  %v3557_v20 = vld [vmem:[%s5308_s29 + $0x24] sm:$0xf] }
 0x20e   : >> { %3556 = vst [vmem:[%s5304_s24 + $0x20] sm:$0xf] %v3555_v50  ;;  %v3559_v21 = vld [vmem:[%s5308_s29 + $0x28] sm:$0xf]  ;;  %v3561_v4 = vld [vmem:[%s5308_s29 + $0x2c] sm:$0xf] }
 0x20f   : >> { %3558 = vst [vmem:[%s5304_s24 + $0x24] sm:$0xf] %v3557_v20  ;;  %3560 = vst [vmem:[%s5304_s24 + $0x28] sm:$0xf] %v3559_v21  ;;  %v3563_v5 = vld [vmem:[%s5308_s29 + $0x30] sm:$0xf] }
 0x210   : >> { %3562 = vst [vmem:[%s5304_s24 + $0x2c] sm:$0xf] %v3561_v4  ;;  %v3565_v22 = vld [vmem:[%s5308_s29 + $0x34] sm:$0xf]  ;;  %v3567_v25 = vld [vmem:[%s5308_s29 + $0x38] sm:$0xf] }
 0x211   : >> { %3564 = vst [vmem:[%s5304_s24 + $0x30] sm:$0xf] %v3563_v5  ;;  %3566 = vst [vmem:[%s5304_s24 + $0x34] sm:$0xf] %v3565_v22  ;;  %v3569_v54 = vld [vmem:[%s5308_s29 + $0x3c] sm:$0xf] }
 0x212   : >> { %3568 = vst [vmem:[%s5304_s24 + $0x38] sm:$0xf] %v3567_v25  ;;  %v3571_v6 = vld [vmem:[%s5308_s29 + $0x40] sm:$0xf]  ;;  %v3573_v9 = vld [vmem:[%s5308_s29 + $0x44] sm:$0xf] }
 0x213   : >> { %3570 = vst [vmem:[%s5304_s24 + $0x3c] sm:$0xf] %v3569_v54  ;;  %3572 = vst [vmem:[%s5304_s24 + $0x40] sm:$0xf] %v3571_v6  ;;  %v3575_v57 = vld [vmem:[%s5308_s29 + $0x48] sm:$0xf] }
 0x214   : >> { %3574 = vst [vmem:[%s5304_s24 + $0x44] sm:$0xf] %v3573_v9  ;;  %v3577_v26 = vld [vmem:[%s5308_s29 + $0x4c] sm:$0xf]  ;;  %v3579_v30 = vld [vmem:[%s5308_s29 + $0x50] sm:$0xf] }
 0x215   : >> { %3576 = vst [vmem:[%s5304_s24 + $0x48] sm:$0xf] %v3575_v57  ;;  %3578 = vst [vmem:[%s5304_s24 + $0x4c] sm:$0xf] %v3577_v26  ;;  %v3581_v55 = vld [vmem:[%s5308_s29 + $0x54] sm:$0xf] }
 0x216   : >> { %3580 = vst [vmem:[%s5304_s24 + $0x50] sm:$0xf] %v3579_v30  ;;  %v3583_v59 = vld [vmem:[%s5308_s29 + $0x58] sm:$0xf]  ;;  %v3585_v61 = vld [vmem:[%s5308_s29 + $0x5c] sm:$0xf] }
 0x217   : >> { %3582 = vst [vmem:[%s5304_s24 + $0x54] sm:$0xf] %v3581_v55  ;;  %3584 = vst [vmem:[%s5304_s24 + $0x58] sm:$0xf] %v3583_v59  ;;  %v3587_v8 = vld [vmem:[%s5308_s29 + $0x60] sm:$0xf] }
 0x218   : >> { %3586 = vst [vmem:[%s5304_s24 + $0x5c] sm:$0xf] %v3585_v61  ;;  %v3589_v60 = vld [vmem:[%s5308_s29 + $0x64] sm:$0xf]  ;;  %v3591_v11 = vld [vmem:[%s5308_s29 + $0x68] sm:$0xf] }
 0x219   : >> { %3588 = vst [vmem:[%s5304_s24 + $0x60] sm:$0xf] %v3587_v8  ;;  %3590 = vst [vmem:[%s5304_s24 + $0x64] sm:$0xf] %v3589_v60  ;;  %v3593_v56 = vld [vmem:[%s5308_s29 + $0x6c] sm:$0xf] }
 0x21a   : >> { %3592 = vst [vmem:[%s5304_s24 + $0x68] sm:$0xf] %v3591_v11  ;;  %v3595_v13 = vld [vmem:[%s5308_s29 + $0x70] sm:$0xf]  ;;  %v3597_v31 = vld [vmem:[%s5308_s29 + $0x74] sm:$0xf] }
 0x21b   : >> { %3594 = vst [vmem:[%s5304_s24 + $0x6c] sm:$0xf] %v3593_v56  ;;  %3596 = vst [vmem:[%s5304_s24 + $0x70] sm:$0xf] %v3595_v13  ;;  %v3599_v34 = vld [vmem:[%s5308_s29 + $0x78] sm:$0xf] }
 0x21c   : >> { %3598 = vst [vmem:[%s5304_s24 + $0x74] sm:$0xf] %v3597_v31  ;;  %v3601_v12 = vld [vmem:[%s5308_s29 + $0x7c] sm:$0xf]  ;;  %v3603_v27 = vld [vmem:[%s5308_s29 + $0x80] sm:$0xf] }
 0x21d   : >> { %3600 = vst [vmem:[%s5304_s24 + $0x78] sm:$0xf] %v3599_v34  ;;  %3602 = vst [vmem:[%s5304_s24 + $0x7c] sm:$0xf] %v3601_v12  ;;  %v3605_v29 = vld [vmem:[%s5308_s29 + $0x84] sm:$0xf] }
 0x21e   : >> { %3604 = vst [vmem:[%s5304_s24 + $0x80] sm:$0xf] %v3603_v27  ;;  %v3607_v58 = vld [vmem:[%s5308_s29 + $0x88] sm:$0xf]  ;;  %v3609_v10 = vld [vmem:[%s5308_s29 + $0x8c] sm:$0xf] }
 0x21f   : >> { %3606 = vst [vmem:[%s5304_s24 + $0x84] sm:$0xf] %v3605_v29  ;;  %3608 = vst [vmem:[%s5304_s24 + $0x88] sm:$0xf] %v3607_v58  ;;  %v3611_v14 = vld [vmem:[%s5308_s29 + $0x90] sm:$0xf] }
 0x220   : >> { %3610 = vst [vmem:[%s5304_s24 + $0x8c] sm:$0xf] %v3609_v10  ;;  %v3613_v28 = vld [vmem:[%s5308_s29 + $0x94] sm:$0xf]  ;;  %v3615_v39 = vld [vmem:[%s5308_s29 + $0x98] sm:$0xf] }
 0x221   : >> { %3612 = vst [vmem:[%s5304_s24 + $0x90] sm:$0xf] %v3611_v14  ;;  %3614 = vst [vmem:[%s5304_s24 + $0x94] sm:$0xf] %v3613_v28  ;;  %v3617_v62 = vld [vmem:[%s5308_s29 + $0x9c] sm:$0xf] }
 0x222   : >> { %3616 = vst [vmem:[%s5304_s24 + $0x98] sm:$0xf] %v3615_v39  ;;  %v3619_v35 = vld [vmem:[%s5308_s29 + $0xa0] sm:$0xf]  ;;  %v3621_v45 = vld [vmem:[%s5308_s29 + $0xa4] sm:$0xf] }
 0x223   : >> { %3618 = vst [vmem:[%s5304_s24 + $0x9c] sm:$0xf] %v3617_v62  ;;  %3620 = vst [vmem:[%s5304_s24 + $0xa0] sm:$0xf] %v3619_v35  ;;  %v3623_v7 = vld [vmem:[%s5308_s29 + $0xa8] sm:$0xf] }
 0x224   : >> { %3622 = vst [vmem:[%s5304_s24 + $0xa4] sm:$0xf] %v3621_v45  ;;  %v3625_v15 = vld [vmem:[%s5308_s29 + $0xac] sm:$0xf]  ;;  %v3627_v18 = vld [vmem:[%s5308_s29 + $0xb0] sm:$0xf] }
 0x225   : >> { %3624 = vst [vmem:[%s5304_s24 + $0xa8] sm:$0xf] %v3623_v7  ;;  %3626 = vst [vmem:[%s5304_s24 + $0xac] sm:$0xf] %v3625_v15  ;;  %v3629_v16 = vld [vmem:[%s5308_s29 + $0xb4] sm:$0xf] }
 0x226   : >> { %3628 = vst [vmem:[%s5304_s24 + $0xb0] sm:$0xf] %v3627_v18  ;;  %v3631_v63 = vld [vmem:[%s5308_s29 + $0xb8] sm:$0xf]  ;;  %v3633_v36 = vld [vmem:[%s5308_s29 + $0xbc] sm:$0xf] }
 0x227   : >> { %3630 = vst [vmem:[%s5304_s24 + $0xb4] sm:$0xf] %v3629_v16  ;;  %3632 = vst [vmem:[%s5304_s24 + $0xb8] sm:$0xf] %v3631_v63  ;;  %v3635_v37 = vld [vmem:[%s5308_s29 + $0xc0] sm:$0xf] }
 0x228   : >> { %3634 = vst [vmem:[%s5304_s24 + $0xbc] sm:$0xf] %v3633_v36  ;;  %v3637_v2 = vld [vmem:[%s5308_s29 + $0xc4] sm:$0xf]  ;;  %v3639_v3 = vld [vmem:[%s5308_s29 + $0xc8] sm:$0xf] }
 0x229   : >> { %3636 = vst [vmem:[%s5304_s24 + $0xc0] sm:$0xf] %v3635_v37  ;;  %3638 = vst [vmem:[%s5304_s24 + $0xc4] sm:$0xf] %v3637_v2  ;;  %v3641_v44 = vld [vmem:[%s5308_s29 + $0xcc] sm:$0xf] }
 0x22a   : >> { %3640 = vst [vmem:[%s5304_s24 + $0xc8] sm:$0xf] %v3639_v3  ;;  %v3643_v48 = vld [vmem:[%s5308_s29 + $0xd0] sm:$0xf]  ;;  %v3645_v38 = vld [vmem:[%s5308_s29 + $0xd4] sm:$0xf] }
 0x22b   : >> { %3642 = vst [vmem:[%s5304_s24 + $0xcc] sm:$0xf] %v3641_v44  ;;  %3644 = vst [vmem:[%s5304_s24 + $0xd0] sm:$0xf] %v3643_v48  ;;  %v3647_v41 = vld [vmem:[%s5308_s29 + $0xd8] sm:$0xf] }
 0x22c   : >> { %3646 = vst [vmem:[%s5304_s24 + $0xd4] sm:$0xf] %v3645_v38  ;;  %v3649_v43 = vld [vmem:[%s5308_s29 + $0xdc] sm:$0xf]  ;;  %v3651_v51 = vld [vmem:[%s5308_s29 + $0xe0] sm:$0xf] }
 0x22d   : >> { %3648 = vst [vmem:[%s5304_s24 + $0xd8] sm:$0xf] %v3647_v41  ;;  %3650 = vst [vmem:[%s5304_s24 + $0xdc] sm:$0xf] %v3649_v43  ;;  %v3653_v23 = vld [vmem:[%s5308_s29 + $0xe4] sm:$0xf] }
 0x22e   : >> { %3652 = vst [vmem:[%s5304_s24 + $0xe0] sm:$0xf] %v3651_v51  ;;  %v3655_v17 = vld [vmem:[%s5308_s29 + $0xe8] sm:$0xf]  ;;  %v3657_v52 = vld [vmem:[%s5308_s29 + $0xec] sm:$0xf] }
 0x22f   : >> { %3654 = vst [vmem:[%s5304_s24 + $0xe4] sm:$0xf] %v3653_v23  ;;  %3656 = vst [vmem:[%s5304_s24 + $0xe8] sm:$0xf] %v3655_v17  ;;  %v3659_v24 = vld [vmem:[%s5308_s29 + $0xf0] sm:$0xf] }
 0x230   : >> { %3658 = vst [vmem:[%s5304_s24 + $0xec] sm:$0xf] %v3657_v52  ;;  %v3661_v42 = vld [vmem:[%s5308_s29 + $0xf4] sm:$0xf]  ;;  %v3663_v49 = vld [vmem:[%s5308_s29 + $0xf8] sm:$0xf] }
 0x231   : >> { %3660 = vst [vmem:[%s5304_s24 + $0xf0] sm:$0xf] %v3659_v24  ;;  %3662 = vst [vmem:[%s5304_s24 + $0xf4] sm:$0xf] %v3661_v42  ;;  %v3665_v32 = vld [vmem:[%s5308_s29 + $0xfc] sm:$0xf] }
 0x232   : >> { %3664 = vst [vmem:[%s5304_s24 + $0xf8] sm:$0xf] %v3663_v49  ;;  %3666 = vst [vmem:[%s5304_s24 + $0xfc] sm:$0xf] %v3665_v32  ;;  %s6895_s20 = smov (%p3668_p11, %s3667_s20), 0  ;;  %s3533_s19 = sadd.s32 1, %s5316_s19  }
 0x233   : >> { %s4351_s23 = sshll.u32 %s6895_s20, 8  ;;  %p3532_p12 = scmp.ge.s32.totalorder %s3533_s19, %s6385_s18 }
 0x234   : >> { %s3672_s29 = scalar_lea.vmem %s6104_s21, %s4351_s23 [#allocation2]   ;;  %s3673_s24 = scalar_lea.vmem %s6379_s16, %s4351_s23  }
 0x235   : >> { %s6888_s10 = smov %s6895_s20  ;;  %3535 = sbr.rel (!%p3532_p12) target bundleno = 520 (0x208), region = 139 }
 0x23c PF: > { %s6553_s26 = sand.u32 63, %s6893_s12   ;;  %s4426_s27 = sshll.u32 %s6385_s18, 8 }
 0x23d   : > { %s3678_s30 = scalar_lea.vmem %s6104_s21, %s4426_s27 [#allocation2]   ;;  %s3680_s7 = scalar_lea.vmem %s6379_s16, %s4426_s27  }
 0x23e   : > { %p4356_p13 = scmp.le.s32.totalorder %s6553_s26, 0 }
 0x23f   : > { %s5318_s8 = smov (!%p4356_p13), %s3680_s7   ;;  %s5322_s9 = smov (!%p4356_p13), %s3678_s30  }
 0x240   : > { %3960 = sbr.rel (%p4356_p13) target bundleno = 593 (0x251), region = 144  ;;  %s5326_s11 = smov (!%p4356_p13), 0  }
 0x241   : > { %s5330_s13 = smov (!%p4356_p13), 0  }
 0x247 LB: >> { %v3690_v40 = vld [vmem:[%s5324_s9] sm:$0xf]  ;;  %s3692_s12 = sadd.s32 1, %s5328_s11  ;;  %s3684_s13 = sadd.s32 1, %s5332_s13   ;;  %s5332_s13 = sphi %s5330_s13, %s3684_s13   ;;  %s5328_s11 = sphi %s5326_s11, %s5327_s11   ;;  %s5324_s9 = sphi %s5322_s9, %s3697_s9   ;;  %s5320_s8 = sphi %s5318_s8, %s3698_s8  }
 0x248   : >> { %3691 = vst [vmem:[%s5320_s8] sm:$0xf] %v3690_v40  ;;  %p3693_p0 = scmp.ge.s32.totalorder %s3692_s12, %s6553_s26  ;;  %p3683_p1 = scmp.ge.s32.totalorder %s3684_s13, %s6553_s26 }
 0x24a   : >> { %s6897_s12 = smov (%p3693_p0, %s3692_s12), 0  ;;  %3686 = sbr.rel (!%p3683_p1) target bundleno = 583 (0x247), region = 150 }
 0x24b   : >> { %s4357_s21 = sshll.u32 %s6897_s12, 2  ;;  %s5327_s11 = smov %s6897_s12  }
 0x24c   : >> { %s3697_s9 = scalar_lea.vmem %s3678_s30, %s4357_s21 [#allocation2]   ;;  %s3698_s8 = scalar_lea.vmem %s3680_s7, %s4357_s21  }
 0x251 PF: > { %p13_p2 = scmp.ge.s32.totalorder %s5385_s25, 6   ;;  %s6889_s21 = smov %s5296_s22 }
 0x252   : > { %s6890_s22 = smov %s5393_s28  ;;  %s6891_s23 = smov %s5385_s25 }
 0x253   :  { %15 = sbr.rel (!%p13_p2) target bundleno = 2 (0x2), region = 161 }

// kernel: cnn_forward.4
= control target key start
LH: loop header
LB: loop body
LE: loop exit
PB: predicated region body
PF: predicated region fallthrough
CT: control target
= control target key end

     0   :  { %v6961_v0 = vmov 0   ;;  %vm791_vm0 = vcmask 130048   ;;  %s9093_s4 = inlined_call_operand.vmem [shape: bf16[400,128], index: 4, kind: input, shape index: {}]   ;;  %s9094_s0 = inlined_call_operand.vmem [shape: bf16[392,400], index: 0, kind: input, shape index: {}]   ;;  %s9095_s1 = inlined_call_operand.vmem [shape: bf16[392,400], index: 1, kind: input, shape index: {}]   ;;  %s9096_s2 = inlined_call_operand.vmem [shape: bf16[392,400], index: 2, kind: input, shape index: {}]   ;;  %s9097_s3 = inlined_call_operand.vmem [shape: bf16[392,400], index: 3, kind: input, shape index: {}]   ;;  %s9098_s5 = inlined_call_operand.vmem [shape: f32[1,128], index: 5, kind: input, shape index: {}]   ;;  %s9099_s6 = inlined_call_operand.vmem [shape: bf16[392,128], index: 6, kind: output, shape index: {}]  }
   0x1   :  { %867 = vmatprep.subr.bf16.mxu0 %v6961_v0  ;;  %1973 = vmatprep.subr.bf16.mxu1 %v6961_v0  ;;  %v6319_v1 = vld [vmem:[%s9093_s4] sm:$0xff]   ;;  %v6320_v2 = vld [vmem:[%s9093_s4 + $0x8] sm:$0xff]   ;;  %v6321_v3 = vld [vmem:[%s9093_s4 + $0x10] sm:$0xff]  }
   0x2   :  { %868 = vmatpush1.bf16.msra.mxu0 %v6319_v1  ;;  %1974 = vmatpush1.bf16.msra.mxu1 %v6319_v1  ;;  %v6322_v4 = vld [vmem:[%s9093_s4 + $0x18] sm:$0xff]   ;;  %v6323_v5 = vld [vmem:[%s9093_s4 + $0x20] sm:$0xff]   ;;  %v6324_v7 = vld [vmem:[%s9093_s4 + $0x28] sm:$0xff]  }
   0x3   :  { %869 = vmatprep.subr.bf16.mxu0 %v6961_v0  ;;  %1975 = vmatprep.subr.bf16.mxu1 %v6961_v0  ;;  %v6337_v6 = vld [vmem:[%s9094_s0 + $0x4] ss:$16 sps:$4 sm:$0xff]   ;;  %v6326_v10 = vld [vmem:[%s9093_s4 + $0x38] sm:$0xff]   ;;  %v6328_v12 = vld [vmem:[%s9093_s4 + $0x48] sm:$0xff]  }
   0x4   :  { %v6340_v8 = vld [vmem:[%s9095_s1 + $0x4] ss:$16 sps:$4 sm:$0xff]   ;;  %899 = vmatprep.mubr.bf16.mxu0 %v6337_v6  ;;  %v6330_v14 = vld [vmem:[%s9093_s4 + $0x58] sm:$0xff]   ;;  %v6332_v16 = vld [vmem:[%s9093_s4 + $0x68] sm:$0xff]  }
   0x5   :  { %2005 = vmatprep.mubr.bf16.mxu1 %v6340_v8  ;;  %v6325_v9 = vld [vmem:[%s9093_s4 + $0x30] sm:$0xff]   ;;  %v6327_v11 = vld [vmem:[%s9093_s4 + $0x40] sm:$0xff]   ;;  %v6334_v18 = vld [vmem:[%s9093_s4 + $0x78] sm:$0xff]  }
   0x6   :  { %870 = vmatpush1.bf16.msra.mxu0 %v6320_v2  ;;  %1976 = vmatpush1.bf16.msra.mxu1 %v6320_v2  ;;  %v6329_v13 = vld [vmem:[%s9093_s4 + $0x50] sm:$0xff]   ;;  %v6331_v15 = vld [vmem:[%s9093_s4 + $0x60] sm:$0xff]   ;;  %v6359_v24 = vld [vmem:[%s9093_s4 + $0x88] sm:$0xff]  }
   0x7   :  { %871 = vmatprep.subr.bf16.mxu0 %v6961_v0  ;;  %1977 = vmatprep.subr.bf16.mxu1 %v6961_v0  ;;  %v6333_v17 = vld [vmem:[%s9093_s4 + $0x70] sm:$0xff]   ;;  %v6341_v21 = vld [vmem:[%s9093_s4 + $0x80] sm:$0xff]   ;;  %v6392_v30 = vld [vmem:[%s9093_s4 + $0x98] sm:$0xff]  }
   0x8   :  { %v6335_v19 = vld [vmem:[%s9094_s0] ss:$16 sps:$4 sm:$0xff]   ;;  %v6342_v22 = vld [vmem:[%s9094_s0 + $0x24] ss:$16 sps:$4 sm:$0xff]   ;;  %v6430_v36 = vld [vmem:[%s9093_s4 + $0xa8] sm:$0xff]  }
   0x9   :  { %v6338_v20 = vld [vmem:[%s9095_s1] ss:$16 sps:$4 sm:$0xff]   ;;  %v6344_v23 = vld [vmem:[%s9095_s1 + $0x24] ss:$16 sps:$4 sm:$0xff]   ;;  %v6462_v42 = vld [vmem:[%s9093_s4 + $0xb8] sm:$0xff]  }
   0xa   :  { %872 = vmatpush1.bf16.msra.mxu0 %v6321_v3  ;;  %1978 = vmatpush1.bf16.msra.mxu1 %v6321_v3  ;;  %v6346_v25 = vld [vmem:[%s9094_s0 + $0x20] ss:$16 sps:$4 sm:$0xff]   ;;  %v6348_v27 = vld [vmem:[%s9094_s0 + $0x44] ss:$16 sps:$4 sm:$0xff]  }
   0xb   :  { %873 = vmatprep.subr.bf16.mxu0 %v6961_v0  ;;  %1979 = vmatprep.subr.bf16.mxu1 %v6961_v0  ;;  %v6347_v26 = vld [vmem:[%s9095_s1 + $0x20] ss:$16 sps:$4 sm:$0xff]   ;;  %v6350_v28 = vld [vmem:[%s9095_s1 + $0x44] ss:$16 sps:$4 sm:$0xff]  }
   0xc   :  { %v6373_v29 = vld [vmem:[%s9093_s4 + $0x90] sm:$0xff]   ;;  %v6411_v35 = vld [vmem:[%s9093_s4 + $0xa0] sm:$0xff]  }
   0xd   :  { %v6352_v31 = vld [vmem:[%s9094_s0 + $0x40] ss:$16 sps:$4 sm:$0xff]   ;;  %v6354_v33 = vld [vmem:[%s9094_s0 + $0x64] ss:$16 sps:$4 sm:$0xff]  }
   0xe   :  { %874 = vmatpush1.bf16.msra.mxu0 %v6322_v4  ;;  %1980 = vmatpush1.bf16.msra.mxu1 %v6322_v4  ;;  %v6353_v32 = vld [vmem:[%s9095_s1 + $0x40] ss:$16 sps:$4 sm:$0xff]   ;;  %v6356_v34 = vld [vmem:[%s9095_s1 + $0x64] ss:$16 sps:$4 sm:$0xff]  }
   0xf   :  { %875 = vmatprep.subr.bf16.mxu0 %v6961_v0  ;;  %1981 = vmatprep.subr.bf16.mxu1 %v6961_v0  ;;  %v6358_v37 = vld [vmem:[%s9094_s0 + $0x60] ss:$16 sps:$4 sm:$0xff]   ;;  %v6361_v39 = vld [vmem:[%s9094_s0 + $0x84] ss:$16 sps:$4 sm:$0xff]  }
  0x10   :  { %v6360_v38 = vld [vmem:[%s9095_s1 + $0x60] ss:$16 sps:$4 sm:$0xff]   ;;  %v6363_v40 = vld [vmem:[%s9095_s1 + $0x84] ss:$16 sps:$4 sm:$0xff]  }
  0x11   :  { %v6445_v41 = vld [vmem:[%s9093_s4 + $0xb0] sm:$0xff]   ;;  %v6481_v55 = vld [vmem:[%s9093_s4 + $0xc0] sm:$0xff]  }
  0x12   :  { %876 = vmatpush1.bf16.msra.mxu0 %v6323_v5  ;;  %1982 = vmatpush1.bf16.msra.mxu1 %v6323_v5  ;;  %v6365_v43 = vld [vmem:[%s9094_s0 + $0x80] ss:$16 sps:$4 sm:$0xff]   ;;  %v6367_v45 = vld [vmem:[%s9094_s0 + $0xa4] ss:$16 sps:$4 sm:$0xff]  }
  0x13   :  { %877 = vmatprep.subr.bf16.mxu0 %v6961_v0  ;;  %1983 = vmatprep.subr.bf16.mxu1 %v6961_v0  ;;  %v6366_v44 = vld [vmem:[%s9095_s1 + $0x80] ss:$16 sps:$4 sm:$0xff]   ;;  %v6369_v46 = vld [vmem:[%s9095_s1 + $0xa4] ss:$16 sps:$4 sm:$0xff]  }
  0x14   :  { %v6371_v47 = vld [vmem:[%s9094_s0 + $0xa0] ss:$16 sps:$4 sm:$0xff]   ;;  %v6374_v49 = vld [vmem:[%s9094_s0 + $0xc4] ss:$16 sps:$4 sm:$0xff]  }
  0x15   :  { %v6372_v48 = vld [vmem:[%s9095_s1 + $0xa0] ss:$16 sps:$4 sm:$0xff]   ;;  %v6376_v50 = vld [vmem:[%s9095_s1 + $0xc4] ss:$16 sps:$4 sm:$0xff]  }
  0x16   :  { %878 = vmatpush1.bf16.msra.mxu0 %v6324_v7  ;;  %1984 = vmatpush1.bf16.msra.mxu1 %v6324_v7  ;;  %v6378_v51 = vld [vmem:[%s9094_s0 + $0xc0] ss:$16 sps:$4 sm:$0xff]   ;;  %v6380_v53 = vld [vmem:[%s9094_s0 + $0xe4] ss:$16 sps:$4 sm:$0xff]  }
  0x17   :  { %879 = vmatprep.subr.bf16.mxu0 %v6961_v0  ;;  %1985 = vmatprep.subr.bf16.mxu1 %v6961_v0  ;;  %v6379_v52 = vld [vmem:[%s9095_s1 + $0xc0] ss:$16 sps:$4 sm:$0xff]   ;;  %v6382_v54 = vld [vmem:[%s9095_s1 + $0xe4] ss:$16 sps:$4 sm:$0xff]  }
  0x18   :  { %v6384_v56 = vld [vmem:[%s9094_s0 + $0xe0] ss:$16 sps:$4 sm:$0xff]   ;;  %v6386_v58 = vld [vmem:[%s9094_s0 + $0x104] ss:$16 sps:$4 sm:$0xff]  }
  0x19   :  { %v6385_v57 = vld [vmem:[%s9095_s1 + $0xe0] ss:$16 sps:$4 sm:$0xff]   ;;  %v6388_v59 = vld [vmem:[%s9095_s1 + $0x104] ss:$16 sps:$4 sm:$0xff]  }
  0x1a   :  { %880 = vmatpush1.bf16.msra.mxu0 %v6325_v9  ;;  %1986 = vmatpush1.bf16.msra.mxu1 %v6325_v9  ;;  %v6390_v60 = vld [vmem:[%s9094_s0 + $0x100] ss:$16 sps:$4 sm:$0xff]   ;;  %v6393_v62 = vld [vmem:[%s9094_s0 + $0x124] ss:$16 sps:$4 sm:$0xff]  }
  0x1b   :  { %881 = vmatprep.subr.bf16.mxu0 %v6961_v0  ;;  %1987 = vmatprep.subr.bf16.mxu1 %v6961_v0  ;;  %v6391_v61 = vld [vmem:[%s9095_s1 + $0x100] ss:$16 sps:$4 sm:$0xff]   ;;  %v6395_v63 = vld [vmem:[%s9095_s1 + $0x124] ss:$16 sps:$4 sm:$0xff]  }
  0x1c   :  { %v6397_v1 = vld [vmem:[%s9094_s0 + $0x120] ss:$16 sps:$4 sm:$0xff]   ;;  %v6399_v3 = vld [vmem:[%s9094_s0 + $0x144] ss:$16 sps:$4 sm:$0xff]  }
  0x1d   :  { %v6398_v2 = vld [vmem:[%s9095_s1 + $0x120] ss:$16 sps:$4 sm:$0xff]   ;;  %v6401_v4 = vld [vmem:[%s9095_s1 + $0x144] ss:$16 sps:$4 sm:$0xff]  }
  0x1e   :  { %882 = vmatpush1.bf16.msra.mxu0 %v6326_v10  ;;  %1988 = vmatpush1.bf16.msra.mxu1 %v6326_v10  ;;  %v6403_v5 = vld [vmem:[%s9094_s0 + $0x140] ss:$16 sps:$4 sm:$0xff]   ;;  %v6405_v7 = vld [vmem:[%s9094_s0 + $0x164] ss:$16 sps:$4 sm:$0xff]  }
  0x1f   :  { %883 = vmatprep.subr.bf16.mxu0 %v6961_v0  ;;  %1989 = vmatprep.subr.bf16.mxu1 %v6961_v0  ;;  %v6404_v6 = vld [vmem:[%s9095_s1 + $0x140] ss:$16 sps:$4 sm:$0xff]   ;;  %v6407_v8 = vld [vmem:[%s9095_s1 + $0x164] ss:$16 sps:$4 sm:$0xff]  }
  0x20   :  { %v6409_v9 = vld [vmem:[%s9094_s0 + $0x160] ss:$16 sps:$4 sm:$0xff]  }
  0x21   :  { %v6410_v10 = vld [vmem:[%s9095_s1 + $0x160] ss:$16 sps:$4 sm:$0xff]  }
  0x22   :  { %884 = vmatpush1.bf16.msra.mxu0 %v6327_v11  ;;  %1990 = vmatpush1.bf16.msra.mxu1 %v6327_v11  ;;  %v6412_v11 = vld [vmem:[%s9094_s0 + $0x184] ss:$16 sps:$4 sm:$0xff]  }
  0x23   :  { %885 = vmatprep.subr.bf16.mxu0 %v6961_v0  ;;  %1991 = vmatprep.subr.bf16.mxu1 %v6961_v0 }
  0x26   :  { %886 = vmatpush1.bf16.msra.mxu0 %v6328_v12  ;;  %1992 = vmatpush1.bf16.msra.mxu1 %v6328_v12  ;;  %v6414_v12 = vld [vmem:[%s9095_s1 + $0x184] ss:$16 sps:$4 sm:$0xff]  }
  0x27   :  { %887 = vmatprep.subr.bf16.mxu0 %v6961_v0  ;;  %1993 = vmatprep.subr.bf16.mxu1 %v6961_v0 }
  0x2a   :  { %888 = vmatpush1.bf16.msra.mxu0 %v6329_v13  ;;  %1994 = vmatpush1.bf16.msra.mxu1 %v6329_v13  ;;  %v6416_v13 = vld [vmem:[%s9094_s0 + $0x180] ss:$16 sps:$4 sm:$0xff]  }
  0x2b   :  { %889 = vmatprep.subr.bf16.mxu0 %v6961_v0  ;;  %1995 = vmatprep.subr.bf16.mxu1 %v6961_v0 }
  0x2e   :  { %890 = vmatpush1.bf16.msra.mxu0 %v6330_v14  ;;  %1996 = vmatpush1.bf16.msra.mxu1 %v6330_v14  ;;  %v6417_v14 = vld [vmem:[%s9095_s1 + $0x180] ss:$16 sps:$4 sm:$0xff]  }
  0x2f   :  { %891 = vmatprep.subr.bf16.mxu0 %v6961_v0  ;;  %1997 = vmatprep.subr.bf16.mxu1 %v6961_v0 }
  0x32   :  { %892 = vmatpush1.bf16.msra.mxu0 %v6331_v15  ;;  %1998 = vmatpush1.bf16.msra.mxu1 %v6331_v15  ;;  %v6418_v15 = vld [vmem:[%s9094_s0 + $0x1a4] ss:$16 sps:$4 sm:$0xff]  }
  0x33   :  { %893 = vmatprep.subr.bf16.mxu0 %v6961_v0  ;;  %1999 = vmatprep.subr.bf16.mxu1 %v6961_v0 }
  0x36   :  { %894 = vmatpush1.bf16.msra.mxu0 %v6332_v16  ;;  %2000 = vmatpush1.bf16.msra.mxu1 %v6332_v16  ;;  %v6420_v16 = vld [vmem:[%s9095_s1 + $0x1a4] ss:$16 sps:$4 sm:$0xff]  }
  0x37   :  { %895 = vmatprep.subr.bf16.mxu0 %v6961_v0  ;;  %2001 = vmatprep.subr.bf16.mxu1 %v6961_v0 }
  0x3a   :  { %896 = vmatpush1.bf16.msra.mxu0 %v6333_v17  ;;  %2002 = vmatpush1.bf16.msra.mxu1 %v6333_v17  ;;  %v6422_v17 = vld [vmem:[%s9094_s0 + $0x1a0] ss:$16 sps:$4 sm:$0xff]  }
  0x3b   :  { %897 = vmatprep.subr.bf16.mxu0 %v6961_v0  ;;  %2003 = vmatprep.subr.bf16.mxu1 %v6961_v0 }
  0x3e   :  { %898 = vmatpush1.bf16.msra.mxu0 %v6334_v18  ;;  %2004 = vmatpush1.bf16.msra.mxu1 %v6334_v18  ;;  %v6423_v18 = vld [vmem:[%s9095_s1 + $0x1a0] ss:$16 sps:$4 sm:$0xff]  }
  0x3f   :  { %1099 = vmatprep.subr.bf16.mxu0 %v6961_v0  ;;  %2205 = vmatprep.subr.bf16.mxu1 %v6961_v0 }
  0x41   :  { %900 = vmatmul.mubr.bf16.vlgmr.msra.gmra.mrb[0].mxu0 %v6335_v19  ;;  %2006 = vmatmul.mubr.bf16.vlgmr.msra.gmra.mrb[0].mxu1 %v6338_v20  ;;  %v6424_v19 = vld [vmem:[%s9094_s0 + $0x1c4] ss:$16 sps:$4 sm:$0xff]  }
  0x42   :  { %1100 = vmatpush1.bf16.msra.mxu0 %v6341_v21  ;;  %2206 = vmatpush1.bf16.msra.mxu1 %v6341_v21  ;;  %v6426_v20 = vld [vmem:[%s9095_s1 + $0x1c4] ss:$16 sps:$4 sm:$0xff]   ;;  %v6428_v21 = vld [vmem:[%s9094_s0 + $0x1c0] ss:$16 sps:$4 sm:$0xff]  }
  0x43   :  { %907 = vmatprep.mubr.bf16.mxu0 %v6342_v22  ;;  %2013 = vmatprep.mubr.bf16.mxu1 %v6344_v23  ;;  %v6429_v22 = vld [vmem:[%s9095_s1 + $0x1c0] ss:$16 sps:$4 sm:$0xff]   ;;  %v6431_v23 = vld [vmem:[%s9094_s0 + $0x1e4] ss:$16 sps:$4 sm:$0xff]  }
  0x44   :  { %1101 = vmatprep.subr.bf16.mxu0 %v6961_v0  ;;  %2207 = vmatprep.subr.bf16.mxu1 %v6961_v0 }
  0x46   :  { %1102 = vmatpush1.bf16.msra.mxu0 %v6359_v24  ;;  %2208 = vmatpush1.bf16.msra.mxu1 %v6359_v24  ;;  %v6433_v24 = vld [vmem:[%s9095_s1 + $0x1e4] ss:$16 sps:$4 sm:$0xff]  }
  0x47   :  { %1103 = vmatprep.subr.bf16.mxu0 %v6961_v0  ;;  %2209 = vmatprep.subr.bf16.mxu1 %v6961_v0 }
  0x49   :  { %908 = vmatmul.mubr.bf16.gmra.mrb[4].mxu0 %v6346_v25  ;;  %2014 = vmatmul.mubr.bf16.gmra.mrb[4].mxu1 %v6347_v26  ;;  %v6435_v25 = vld [vmem:[%s9094_s0 + $0x1e0] ss:$16 sps:$4 sm:$0xff]  }
  0x4a   :  { %915 = vmatprep.mubr.bf16.mxu0 %v6348_v27  ;;  %2021 = vmatprep.mubr.bf16.mxu1 %v6350_v28  ;;  %v6436_v26 = vld [vmem:[%s9095_s1 + $0x1e0] ss:$16 sps:$4 sm:$0xff]   ;;  %v6437_v27 = vld [vmem:[%s9094_s0 + $0x204] ss:$16 sps:$4 sm:$0xff]  }
  0x4b   :  { %1104 = vmatpush1.bf16.msra.mxu0 %v6373_v29  ;;  %2210 = vmatpush1.bf16.msra.mxu1 %v6373_v29  ;;  %v6439_v28 = vld [vmem:[%s9095_s1 + $0x204] ss:$16 sps:$4 sm:$0xff]   ;;  %v6441_v29 = vld [vmem:[%s9094_s0 + $0x200] ss:$16 sps:$4 sm:$0xff]  }
  0x4c   :  { %1105 = vmatprep.subr.bf16.mxu0 %v6961_v0  ;;  %2211 = vmatprep.subr.bf16.mxu1 %v6961_v0 }
  0x4f   :  { %1106 = vmatpush1.bf16.msra.mxu0 %v6392_v30  ;;  %2212 = vmatpush1.bf16.msra.mxu1 %v6392_v30  ;;  %v6442_v30 = vld [vmem:[%s9095_s1 + $0x200] ss:$16 sps:$4 sm:$0xff]  }
  0x50   :  { %1107 = vmatprep.subr.bf16.mxu0 %v6961_v0  ;;  %2213 = vmatprep.subr.bf16.mxu1 %v6961_v0 }
  0x51   :  { %916 = vmatmul.mubr.bf16.gmra.mrb[8].mxu0 %v6352_v31  ;;  %2022 = vmatmul.mubr.bf16.gmra.mrb[8].mxu1 %v6353_v32  ;;  %v6443_v31 = vld [vmem:[%s9094_s0 + $0x224] ss:$16 sps:$4 sm:$0xff]  }
  0x52   :  { %923 = vmatprep.mubr.bf16.mxu0 %v6354_v33  ;;  %2029 = vmatprep.mubr.bf16.mxu1 %v6356_v34  ;;  %v6446_v32 = vld [vmem:[%s9095_s1 + $0x224] ss:$16 sps:$4 sm:$0xff]   ;;  %v6448_v33 = vld [vmem:[%s9094_s0 + $0x220] ss:$16 sps:$4 sm:$0xff]  }
  0x53   :  { %1108 = vmatpush1.bf16.msra.mxu0 %v6411_v35  ;;  %2214 = vmatpush1.bf16.msra.mxu1 %v6411_v35  ;;  %v6449_v34 = vld [vmem:[%s9095_s1 + $0x220] ss:$16 sps:$4 sm:$0xff]   ;;  %v6450_v35 = vld [vmem:[%s9094_s0 + $0x244] ss:$16 sps:$4 sm:$0xff]  }
  0x54   :  { %1109 = vmatprep.subr.bf16.mxu0 %v6961_v0  ;;  %2215 = vmatprep.subr.bf16.mxu1 %v6961_v0 }
  0x57   :  { %1110 = vmatpush1.bf16.msra.mxu0 %v6430_v36  ;;  %2216 = vmatpush1.bf16.msra.mxu1 %v6430_v36  ;;  %v6452_v36 = vld [vmem:[%s9095_s1 + $0x244] ss:$16 sps:$4 sm:$0xff]  }
  0x58   :  { %1111 = vmatprep.subr.bf16.mxu0 %v6961_v0  ;;  %2217 = vmatprep.subr.bf16.mxu1 %v6961_v0 }
  0x59   :  { %924 = vmatmul.mubr.bf16.gmra.mrb[12].mxu0 %v6358_v37  ;;  %2030 = vmatmul.mubr.bf16.gmra.mrb[12].mxu1 %v6360_v38  ;;  %v6454_v37 = vld [vmem:[%s9094_s0 + $0x240] ss:$16 sps:$4 sm:$0xff]  }
  0x5a   :  { %931 = vmatprep.mubr.bf16.mxu0 %v6361_v39  ;;  %2037 = vmatprep.mubr.bf16.mxu1 %v6363_v40  ;;  %v6455_v38 = vld [vmem:[%s9095_s1 + $0x240] ss:$16 sps:$4 sm:$0xff]   ;;  %v6456_v39 = vld [vmem:[%s9094_s0 + $0x264] ss:$16 sps:$4 sm:$0xff]  }
  0x5b   :  { %1112 = vmatpush1.bf16.msra.mxu0 %v6445_v41  ;;  %2218 = vmatpush1.bf16.msra.mxu1 %v6445_v41  ;;  %v6458_v40 = vld [vmem:[%s9095_s1 + $0x264] ss:$16 sps:$4 sm:$0xff]   ;;  %v6460_v41 = vld [vmem:[%s9094_s0 + $0x260] ss:$16 sps:$4 sm:$0xff]  }
  0x5c   :  { %1113 = vmatprep.subr.bf16.mxu0 %v6961_v0  ;;  %2219 = vmatprep.subr.bf16.mxu1 %v6961_v0 }
  0x5f   :  { %1114 = vmatpush1.bf16.msra.mxu0 %v6462_v42  ;;  %2220 = vmatpush1.bf16.msra.mxu1 %v6462_v42  ;;  %v6461_v42 = vld [vmem:[%s9095_s1 + $0x260] ss:$16 sps:$4 sm:$0xff]  }
  0x60   :  { %1115 = vmatprep.subr.bf16.mxu0 %v6961_v0  ;;  %2221 = vmatprep.subr.bf16.mxu1 %v6961_v0 }
  0x61   :  { %932 = vmatmul.mubr.bf16.gmra.mrb[16].mxu0 %v6365_v43  ;;  %2038 = vmatmul.mubr.bf16.gmra.mrb[16].mxu1 %v6366_v44  ;;  %v6463_v43 = vld [vmem:[%s9094_s0 + $0x284] ss:$16 sps:$4 sm:$0xff]  }
  0x62   :  { %939 = vmatprep.mubr.bf16.mxu0 %v6367_v45  ;;  %2045 = vmatprep.mubr.bf16.mxu1 %v6369_v46  ;;  %v6465_v44 = vld [vmem:[%s9095_s1 + $0x284] ss:$16 sps:$4 sm:$0xff]   ;;  %v6467_v45 = vld [vmem:[%s9094_s0 + $0x280] ss:$16 sps:$4 sm:$0xff]  }
  0x63   :  { %1116 = vmatpush1.bf16.msra.mxu0 %v6481_v55  ;;  %2222 = vmatpush1.bf16.msra.mxu1 %v6481_v55  ;;  %v6468_v46 = vld [vmem:[%s9095_s1 + $0x280] ss:$16 sps:$4 sm:$0xff]   ;;  %v6482_v55 = vld [vmem:[%s9094_s0 + $0x2e4] ss:$16 sps:$4 sm:$0xff]  }
  0x64   :  { %3079 = vmatprep.subr.bf16.mxu0 %v6961_v0  ;;  %4185 = vmatprep.subr.bf16.mxu1 %v6961_v0 }
  0x69   :  { %940 = vmatmul.mubr.bf16.gmra.mrb[20].mxu0 %v6371_v47  ;;  %2046 = vmatmul.mubr.bf16.gmra.mrb[20].mxu1 %v6372_v48  ;;  %v6469_v47 = vld [vmem:[%s9094_s0 + $0x2a4] ss:$16 sps:$4 sm:$0xff]  }
  0x6a   :  { %947 = vmatprep.mubr.bf16.mxu0 %v6374_v49  ;;  %2053 = vmatprep.mubr.bf16.mxu1 %v6376_v50  ;;  %v6471_v48 = vld [vmem:[%s9095_s1 + $0x2a4] ss:$16 sps:$4 sm:$0xff]   ;;  %v6473_v49 = vld [vmem:[%s9094_s0 + $0x2a0] ss:$16 sps:$4 sm:$0xff]  }
  0x6b   :  { %v6474_v50 = vld [vmem:[%s9095_s1 + $0x2a0] ss:$16 sps:$4 sm:$0xff]  }
  0x71   :  { %948 = vmatmul.mubr.bf16.gmra.mrb[24].mxu0 %v6378_v51  ;;  %2054 = vmatmul.mubr.bf16.gmra.mrb[24].mxu1 %v6379_v52  ;;  %v6475_v51 = vld [vmem:[%s9094_s0 + $0x2c4] ss:$16 sps:$4 sm:$0xff]  }
  0x72   :  { %955 = vmatprep.mubr.bf16.mxu0 %v6380_v53  ;;  %2061 = vmatprep.mubr.bf16.mxu1 %v6382_v54  ;;  %v6477_v52 = vld [vmem:[%s9095_s1 + $0x2c4] ss:$16 sps:$4 sm:$0xff]   ;;  %v6479_v53 = vld [vmem:[%s9094_s0 + $0x2c0] ss:$16 sps:$4 sm:$0xff]  }
  0x73   :  { %v6480_v54 = vld [vmem:[%s9095_s1 + $0x2c0] ss:$16 sps:$4 sm:$0xff]  }
  0x79   :  { %956 = vmatmul.mubr.bf16.gmra.mrb[28].mxu0 %v6384_v56  ;;  %2062 = vmatmul.mubr.bf16.gmra.mrb[28].mxu1 %v6385_v57  ;;  %v6484_v56 = vld [vmem:[%s9095_s1 + $0x2e4] ss:$16 sps:$4 sm:$0xff]  }
  0x7a   :  { %963 = vmatprep.mubr.bf16.mxu0 %v6386_v58  ;;  %2069 = vmatprep.mubr.bf16.mxu1 %v6388_v59  ;;  %v170_v57 = vld [vmem:[%s9094_s0 + $0x300] sm:$0xff] }
  0x7b   :  { %v1427_v58 = vld [vmem:[%s9095_s1 + $0x300] sm:$0xff] }
  0x7c   :  { %v6486_v59 = vld [vmem:[%s9094_s0 + $0x2e0] ss:$16 sps:$4 sm:$0xff]  }
  0x81   :  { %964 = vmatmul.mubr.bf16.gmra.mrb[32].mxu0 %v6390_v60  ;;  %2070 = vmatmul.mubr.bf16.gmra.mrb[32].mxu1 %v6391_v61  ;;  %v6487_v60 = vld [vmem:[%s9095_s1 + $0x2e0] ss:$16 sps:$4 sm:$0xff]   ;;  %v5248_v61 = vcombine.high %v170_v57, %v170_v57 }
  0x82   :  { %971 = vmatprep.mubr.bf16.mxu0 %v6393_v62  ;;  %2077 = vmatprep.mubr.bf16.mxu1 %v6395_v63  ;;  %v5398_v62 = vcombine.high %v1427_v58, %v1427_v58  ;;  %v5247_v63 = vcombine.low %v170_v57, %v170_v57  ;;  %v6551_v57 = vld [vmem:[%s9095_s1 + $0x128] ss:$16 sps:$4 sm:$0xff]  }
  0x89   :  { %972 = vmatmul.mubr.bf16.gmra.mrb[36].mxu0 %v6397_v1  ;;  %2078 = vmatmul.mubr.bf16.gmra.mrb[36].mxu1 %v6398_v2  ;;  %v5397_v1 = vcombine.low %v1427_v58, %v1427_v58  ;;  %v6494_v2 = vld [vmem:[%s9094_s0 + $0xc] ss:$16 sps:$4 sm:$0xff]  }
  0x8a   :  { %979 = vmatprep.mubr.bf16.mxu0 %v6399_v3  ;;  %2085 = vmatprep.mubr.bf16.mxu1 %v6401_v4  ;;  %v6497_v3 = vld [vmem:[%s9095_s1 + $0xc] ss:$16 sps:$4 sm:$0xff]   ;;  %v6492_v4 = vld [vmem:[%s9094_s0 + $0x8] ss:$16 sps:$4 sm:$0xff]  }
  0x8b   :  { %v6552_v58 = vld [vmem:[%s9094_s0 + $0x14c] ss:$16 sps:$4 sm:$0xff]  }
  0x91   :  { %980 = vmatmul.mubr.bf16.gmra.mrb[40].mxu0 %v6403_v5  ;;  %2086 = vmatmul.mubr.bf16.gmra.mrb[40].mxu1 %v6404_v6  ;;  %v6495_v5 = vld [vmem:[%s9095_s1 + $0x8] ss:$16 sps:$4 sm:$0xff]   ;;  %v6498_v6 = vld [vmem:[%s9094_s0 + $0x2c] ss:$16 sps:$4 sm:$0xff]  }
  0x92   :  { %987 = vmatprep.mubr.bf16.mxu0 %v6405_v7  ;;  %2093 = vmatprep.mubr.bf16.mxu1 %v6407_v8  ;;  %v6500_v7 = vld [vmem:[%s9095_s1 + $0x2c] ss:$16 sps:$4 sm:$0xff]   ;;  %v6936_v8 = vld [vmem:[%s9093_s4] sm:$0xff]  }
  0x99   :  { %988 = vmatmul.mubr.bf16.gmra.mrb[44].mxu0 %v6409_v9  ;;  %2094 = vmatmul.mubr.bf16.gmra.mrb[44].mxu1 %v6410_v10  ;;  %v6502_v9 = vld [vmem:[%s9094_s0 + $0x28] ss:$16 sps:$4 sm:$0xff]  }
  0x9a   :  { %995 = vmatprep.mubr.bf16.mxu0 %v6412_v11  ;;  %2101 = vmatprep.mubr.bf16.mxu1 %v6414_v12  ;;  %v6503_v10 = vld [vmem:[%s9095_s1 + $0x28] ss:$16 sps:$4 sm:$0xff]   ;;  %v6504_v12 = vld [vmem:[%s9094_s0 + $0x4c] ss:$16 sps:$4 sm:$0xff]  }
  0x9b   :  { %v6937_v11 = vld [vmem:[%s9093_s4 + $0x8] sm:$0xff]  }
  0xa1   :  { %996 = vmatmul.mubr.bf16.gmra.mrb[48].mxu0 %v6416_v13  ;;  %2102 = vmatmul.mubr.bf16.gmra.mrb[48].mxu1 %v6417_v14  ;;  %v6506_v13 = vld [vmem:[%s9095_s1 + $0x4c] ss:$16 sps:$4 sm:$0xff]   ;;  %v6938_v14 = vld [vmem:[%s9093_s4 + $0x10] sm:$0xff]  }
  0xa2   :  { %1003 = vmatprep.mubr.bf16.mxu0 %v6418_v15  ;;  %2109 = vmatprep.mubr.bf16.mxu1 %v6420_v16  ;;  %v6508_v15 = vld [vmem:[%s9094_s0 + $0x48] ss:$16 sps:$4 sm:$0xff]  }
  0xa3   :  { %v6509_v16 = vld [vmem:[%s9095_s1 + $0x48] ss:$16 sps:$4 sm:$0xff]  }
  0xa9   :  { %1004 = vmatmul.mubr.bf16.gmra.mrb[52].mxu0 %v6422_v17  ;;  %2110 = vmatmul.mubr.bf16.gmra.mrb[52].mxu1 %v6423_v18  ;;  %v6510_v17 = vld [vmem:[%s9094_s0 + $0x6c] ss:$16 sps:$4 sm:$0xff]  }
  0xaa   :  { %1011 = vmatprep.mubr.bf16.mxu0 %v6424_v19  ;;  %2117 = vmatprep.mubr.bf16.mxu1 %v6426_v20  ;;  %v6512_v18 = vld [vmem:[%s9095_s1 + $0x6c] ss:$16 sps:$4 sm:$0xff]   ;;  %v6940_v20 = vld [vmem:[%s9093_s4 + $0x20] sm:$0xff]  }
  0xab   :  { %v6939_v19 = vld [vmem:[%s9093_s4 + $0x18] sm:$0xff]  }
  0xb1   :  { %1012 = vmatmul.mubr.bf16.gmra.mrb[56].mxu0 %v6428_v21  ;;  %2118 = vmatmul.mubr.bf16.gmra.mrb[56].mxu1 %v6429_v22  ;;  %v6514_v21 = vld [vmem:[%s9094_s0 + $0x68] ss:$16 sps:$4 sm:$0xff]  }
  0xb2   :  { %1019 = vmatprep.mubr.bf16.mxu0 %v6431_v23  ;;  %2125 = vmatprep.mubr.bf16.mxu1 %v6433_v24  ;;  %v6515_v22 = vld [vmem:[%s9095_s1 + $0x68] ss:$16 sps:$4 sm:$0xff]   ;;  %v6516_v23 = vld [vmem:[%s9094_s0 + $0x8c] ss:$16 sps:$4 sm:$0xff]  }
  0xb3   :  { %v6518_v24 = vld [vmem:[%s9095_s1 + $0x8c] ss:$16 sps:$4 sm:$0xff]  }
  0xb9   :  { %1020 = vmatmul.mubr.bf16.gmra.mrb[60].mxu0 %v6435_v25  ;;  %2126 = vmatmul.mubr.bf16.gmra.mrb[60].mxu1 %v6436_v26  ;;  %v6941_v25 = vld [vmem:[%s9093_s4 + $0x28] sm:$0xff]   ;;  %v6942_v26 = vld [vmem:[%s9093_s4 + $0x30] sm:$0xff]  }
  0xba   :  { %1027 = vmatprep.mubr.bf16.mxu0 %v6437_v27  ;;  %2133 = vmatprep.mubr.bf16.mxu1 %v6439_v28  ;;  %v6520_v27 = vld [vmem:[%s9094_s0 + $0x88] ss:$16 sps:$4 sm:$0xff]  }
  0xbb   :  { %v6521_v28 = vld [vmem:[%s9095_s1 + $0x88] ss:$16 sps:$4 sm:$0xff]  }
  0xc1   :  { %1028 = vmatmul.mubr.bf16.gmra.mrb[64].mxu0 %v6441_v29  ;;  %2134 = vmatmul.mubr.bf16.gmra.mrb[64].mxu1 %v6442_v30  ;;  %v6522_v29 = vld [vmem:[%s9094_s0 + $0xac] ss:$16 sps:$4 sm:$0xff]  }
  0xc2   :  { %1035 = vmatprep.mubr.bf16.mxu0 %v6443_v31  ;;  %2141 = vmatprep.mubr.bf16.mxu1 %v6446_v32  ;;  %v6524_v30 = vld [vmem:[%s9095_s1 + $0xac] ss:$16 sps:$4 sm:$0xff]   ;;  %v6944_v32 = vld [vmem:[%s9093_s4 + $0x40] sm:$0xff]  }
  0xc3   :  { %v6943_v31 = vld [vmem:[%s9093_s4 + $0x38] sm:$0xff]  }
  0xc9   :  { %1036 = vmatmul.mubr.bf16.gmra.mrb[68].mxu0 %v6448_v33  ;;  %2142 = vmatmul.mubr.bf16.gmra.mrb[68].mxu1 %v6449_v34  ;;  %v6526_v33 = vld [vmem:[%s9094_s0 + $0xa8] ss:$16 sps:$4 sm:$0xff]  }
  0xca   :  { %1043 = vmatprep.mubr.bf16.mxu0 %v6450_v35  ;;  %2149 = vmatprep.mubr.bf16.mxu1 %v6452_v36  ;;  %v6527_v34 = vld [vmem:[%s9095_s1 + $0xa8] ss:$16 sps:$4 sm:$0xff]   ;;  %v6528_v35 = vld [vmem:[%s9094_s0 + $0xcc] ss:$16 sps:$4 sm:$0xff]  }
  0xcb   :  { %v6530_v36 = vld [vmem:[%s9095_s1 + $0xcc] ss:$16 sps:$4 sm:$0xff]  }
  0xd1   :  { %1044 = vmatmul.mubr.bf16.gmra.mrb[72].mxu0 %v6454_v37  ;;  %2150 = vmatmul.mubr.bf16.gmra.mrb[72].mxu1 %v6455_v38  ;;  %v6945_v37 = vld [vmem:[%s9093_s4 + $0x48] sm:$0xff]   ;;  %v6946_v38 = vld [vmem:[%s9093_s4 + $0x50] sm:$0xff]  }
  0xd2   :  { %1051 = vmatprep.mubr.bf16.mxu0 %v6456_v39  ;;  %2157 = vmatprep.mubr.bf16.mxu1 %v6458_v40  ;;  %v6532_v39 = vld [vmem:[%s9094_s0 + $0xc8] ss:$16 sps:$4 sm:$0xff]  }
  0xd3   :  { %v6533_v40 = vld [vmem:[%s9095_s1 + $0xc8] ss:$16 sps:$4 sm:$0xff]  }
  0xd9   :  { %1052 = vmatmul.mubr.bf16.gmra.mrb[76].mxu0 %v6460_v41  ;;  %2158 = vmatmul.mubr.bf16.gmra.mrb[76].mxu1 %v6461_v42  ;;  %v6534_v41 = vld [vmem:[%s9094_s0 + $0xec] ss:$16 sps:$4 sm:$0xff]  }
  0xda   :  { %1059 = vmatprep.mubr.bf16.mxu0 %v6463_v43  ;;  %2165 = vmatprep.mubr.bf16.mxu1 %v6465_v44  ;;  %v6536_v42 = vld [vmem:[%s9095_s1 + $0xec] ss:$16 sps:$4 sm:$0xff]   ;;  %v6948_v44 = vld [vmem:[%s9093_s4 + $0x60] sm:$0xff]  }
  0xdb   :  { %v6947_v43 = vld [vmem:[%s9093_s4 + $0x58] sm:$0xff]  }
  0xe1   :  { %1060 = vmatmul.mubr.bf16.gmra.mrb[80].mxu0 %v6467_v45  ;;  %2166 = vmatmul.mubr.bf16.gmra.mrb[80].mxu1 %v6468_v46  ;;  %v6538_v45 = vld [vmem:[%s9094_s0 + $0xe8] ss:$16 sps:$4 sm:$0xff]  }
  0xe2   :  { %1067 = vmatprep.mubr.bf16.mxu0 %v6469_v47  ;;  %2173 = vmatprep.mubr.bf16.mxu1 %v6471_v48  ;;  %v6539_v46 = vld [vmem:[%s9095_s1 + $0xe8] ss:$16 sps:$4 sm:$0xff]   ;;  %v6540_v47 = vld [vmem:[%s9094_s0 + $0x10c] ss:$16 sps:$4 sm:$0xff]  }
  0xe3   :  { %v6542_v48 = vld [vmem:[%s9095_s1 + $0x10c] ss:$16 sps:$4 sm:$0xff]  }
  0xe9   :  { %1068 = vmatmul.mubr.bf16.gmra.mrb[84].mxu0 %v6473_v49  ;;  %2174 = vmatmul.mubr.bf16.gmra.mrb[84].mxu1 %v6474_v50  ;;  %v6949_v49 = vld [vmem:[%s9093_s4 + $0x68] sm:$0xff]   ;;  %v6950_v50 = vld [vmem:[%s9093_s4 + $0x70] sm:$0xff]  }
  0xea   :  { %1075 = vmatprep.mubr.bf16.mxu0 %v6475_v51  ;;  %2181 = vmatprep.mubr.bf16.mxu1 %v6477_v52  ;;  %v6544_v51 = vld [vmem:[%s9094_s0 + $0x108] ss:$16 sps:$4 sm:$0xff]  }
  0xeb   :  { %v6545_v52 = vld [vmem:[%s9095_s1 + $0x108] ss:$16 sps:$4 sm:$0xff]  }
  0xf1   :  { %1076 = vmatmul.mubr.bf16.gmra.mrb[88].mxu0 %v6479_v53  ;;  %2182 = vmatmul.mubr.bf16.gmra.mrb[88].mxu1 %v6480_v54  ;;  %v6546_v53 = vld [vmem:[%s9094_s0 + $0x12c] ss:$16 sps:$4 sm:$0xff]  }
  0xf2   :  { %1083 = vmatprep.mubr.bf16.mxu0 %v6482_v55  ;;  %2189 = vmatprep.mubr.bf16.mxu1 %v6484_v56  ;;  %v6548_v54 = vld [vmem:[%s9095_s1 + $0x12c] ss:$16 sps:$4 sm:$0xff]   ;;  %v6550_v56 = vld [vmem:[%s9094_s0 + $0x128] ss:$16 sps:$4 sm:$0xff]  }
  0xf3   :  { %v6951_v55 = vld [vmem:[%s9093_s4 + $0x78] sm:$0xff]  }
  0xf9   :  { %1084 = vmatmul.mubr.bf16.gmra.mrb[92].mxu0 %v6486_v59  ;;  %2190 = vmatmul.mubr.bf16.gmra.mrb[92].mxu1 %v6487_v60  ;;  %v6554_v59 = vld [vmem:[%s9095_s1 + $0x14c] ss:$16 sps:$4 sm:$0xff]   ;;  %v6556_v60 = vld [vmem:[%s9094_s0 + $0x148] ss:$16 sps:$4 sm:$0xff]  }
  0xfa   :  { %1091 = vmatprep.mubr.bf16.mxu0 %v5248_v61  ;;  %2197 = vmatprep.mubr.bf16.mxu1 %v5398_v62  ;;  %v6557_v61 = vld [vmem:[%s9095_s1 + $0x148] ss:$16 sps:$4 sm:$0xff]   ;;  %v6558_v62 = vld [vmem:[%s9094_s0 + $0x16c] ss:$16 sps:$4 sm:$0xff]  }
 0x101   :  { %1092 = vmatmul.mubr.bf16.gmra.mrb[96].mxu0 %v5247_v63  ;;  %2198 = vmatmul.mubr.bf16.gmra.mrb[96].mxu1 %v5397_v1  ;;  %v6560_v63 = vld [vmem:[%s9095_s1 + $0x16c] ss:$16 sps:$4 sm:$0xff]   ;;  %v6562_v1 = vld [vmem:[%s9094_s0 + $0x168] ss:$16 sps:$4 sm:$0xff]  }
 0x102   :  { %5276 = vmatprep.mubr.msk.bf16.mxu0 %vm791_vm0, %v6494_v2  ;;  %5401 = vmatprep.mubr.msk.bf16.mxu1 %vm791_vm0, %v6497_v3  ;;  %v6563_v2 = vld [vmem:[%s9095_s1 + $0x168] ss:$16 sps:$4 sm:$0xff]   ;;  %v6564_v3 = vld [vmem:[%s9094_s0 + $0x18c] ss:$16 sps:$4 sm:$0xff]  }
 0x109   :  { %1132 = vmatmul.mubr.bf16.vlgmr.msra.gmra.mrb[0].mxu0 %v6492_v4  ;;  %2238 = vmatmul.mubr.bf16.vlgmr.msra.gmra.mrb[0].mxu1 %v6495_v5  ;;  %v6566_v4 = vld [vmem:[%s9095_s1 + $0x18c] ss:$16 sps:$4 sm:$0xff]   ;;  %v6568_v5 = vld [vmem:[%s9094_s0 + $0x188] ss:$16 sps:$4 sm:$0xff]  }
 0x10a   :  { %3080 = vmatpush1.bf16.msra.mxu0 %v6936_v8  ;;  %4186 = vmatpush1.bf16.msra.mxu1 %v6936_v8  ;;  %v6572_v8 = vld [vmem:[%s9095_s1 + $0x1ac] ss:$16 sps:$4 sm:$0xff]  }
 0x10b   :  { %5277 = vmatprep.mubr.msk.bf16.mxu0 %vm791_vm0, %v6498_v6  ;;  %5402 = vmatprep.mubr.msk.bf16.mxu1 %vm791_vm0, %v6500_v7  ;;  %v6569_v6 = vld [vmem:[%s9095_s1 + $0x188] ss:$16 sps:$4 sm:$0xff]   ;;  %v6570_v7 = vld [vmem:[%s9094_s0 + $0x1ac] ss:$16 sps:$4 sm:$0xff]  }
 0x10c   :  { %3081 = vmatprep.subr.bf16.mxu0 %v6961_v0  ;;  %4187 = vmatprep.subr.bf16.mxu1 %v6961_v0 }
 0x10e   :  { %3082 = vmatpush1.bf16.msra.mxu0 %v6937_v11  ;;  %4188 = vmatpush1.bf16.msra.mxu1 %v6937_v11  ;;  %v6576_v11 = vld [vmem:[%s9094_s0 + $0x1cc] ss:$16 sps:$4 sm:$0xff]  }
 0x10f   :  { %3083 = vmatprep.subr.bf16.mxu0 %v6961_v0  ;;  %4189 = vmatprep.subr.bf16.mxu1 %v6961_v0 }
 0x111   :  { %1140 = vmatmul.mubr.bf16.gmra.mrb[4].mxu0 %v6502_v9  ;;  %2246 = vmatmul.mubr.bf16.gmra.mrb[4].mxu1 %v6503_v10  ;;  %v6574_v9 = vld [vmem:[%s9094_s0 + $0x1a8] ss:$16 sps:$4 sm:$0xff]  }
 0x112   :  { %5278 = vmatprep.mubr.msk.bf16.mxu0 %vm791_vm0, %v6504_v12  ;;  %5403 = vmatprep.mubr.msk.bf16.mxu1 %vm791_vm0, %v6506_v13  ;;  %v6575_v10 = vld [vmem:[%s9095_s1 + $0x1a8] ss:$16 sps:$4 sm:$0xff]   ;;  %v6578_v12 = vld [vmem:[%s9095_s1 + $0x1cc] ss:$16 sps:$4 sm:$0xff]  }
 0x113   :  { %3084 = vmatpush1.bf16.msra.mxu0 %v6938_v14  ;;  %4190 = vmatpush1.bf16.msra.mxu1 %v6938_v14  ;;  %v6580_v13 = vld [vmem:[%s9094_s0 + $0x1c8] ss:$16 sps:$4 sm:$0xff]  }
 0x114   :  { %3085 = vmatprep.subr.bf16.mxu0 %v6961_v0  ;;  %4191 = vmatprep.subr.bf16.mxu1 %v6961_v0  ;;  %v6581_v14 = vld [vmem:[%s9095_s1 + $0x1c8] ss:$16 sps:$4 sm:$0xff]  }
 0x117   :  { %3086 = vmatpush1.bf16.msra.mxu0 %v6939_v19  ;;  %4192 = vmatpush1.bf16.msra.mxu1 %v6939_v19  ;;  %v6588_v19 = vld [vmem:[%s9094_s0 + $0x20c] ss:$16 sps:$4 sm:$0xff]  }
 0x118   :  { %3087 = vmatprep.subr.bf16.mxu0 %v6961_v0  ;;  %4193 = vmatprep.subr.bf16.mxu1 %v6961_v0 }
 0x119   :  { %1148 = vmatmul.mubr.bf16.gmra.mrb[8].mxu0 %v6508_v15  ;;  %2254 = vmatmul.mubr.bf16.gmra.mrb[8].mxu1 %v6509_v16  ;;  %v6582_v15 = vld [vmem:[%s9094_s0 + $0x1ec] ss:$16 sps:$4 sm:$0xff]  }
 0x11a   :  { %5279 = vmatprep.mubr.msk.bf16.mxu0 %vm791_vm0, %v6510_v17  ;;  %5404 = vmatprep.mubr.msk.bf16.mxu1 %vm791_vm0, %v6512_v18  ;;  %v6584_v16 = vld [vmem:[%s9095_s1 + $0x1ec] ss:$16 sps:$4 sm:$0xff]   ;;  %v6586_v17 = vld [vmem:[%s9094_s0 + $0x1e8] ss:$16 sps:$4 sm:$0xff]  }
 0x11b   :  { %3088 = vmatpush1.bf16.msra.mxu0 %v6940_v20  ;;  %4194 = vmatpush1.bf16.msra.mxu1 %v6940_v20  ;;  %v6587_v18 = vld [vmem:[%s9095_s1 + $0x1e8] ss:$16 sps:$4 sm:$0xff]   ;;  %v6590_v20 = vld [vmem:[%s9095_s1 + $0x20c] ss:$16 sps:$4 sm:$0xff]  }
 0x11c   :  { %3089 = vmatprep.subr.bf16.mxu0 %v6961_v0  ;;  %4195 = vmatprep.subr.bf16.mxu1 %v6961_v0 }
 0x11f   :  { %3090 = vmatpush1.bf16.msra.mxu0 %v6941_v25  ;;  %4196 = vmatpush1.bf16.msra.mxu1 %v6941_v25  ;;  %v6598_v25 = vld [vmem:[%s9094_s0 + $0x228] ss:$16 sps:$4 sm:$0xff]  }
 0x120   :  { %3091 = vmatprep.subr.bf16.mxu0 %v6961_v0  ;;  %4197 = vmatprep.subr.bf16.mxu1 %v6961_v0 }
 0x121   :  { %1156 = vmatmul.mubr.bf16.gmra.mrb[12].mxu0 %v6514_v21  ;;  %2262 = vmatmul.mubr.bf16.gmra.mrb[12].mxu1 %v6515_v22  ;;  %v6592_v21 = vld [vmem:[%s9094_s0 + $0x208] ss:$16 sps:$4 sm:$0xff]  }
 0x122   :  { %5280 = vmatprep.mubr.msk.bf16.mxu0 %vm791_vm0, %v6516_v23  ;;  %5405 = vmatprep.mubr.msk.bf16.mxu1 %vm791_vm0, %v6518_v24  ;;  %v6593_v22 = vld [vmem:[%s9095_s1 + $0x208] ss:$16 sps:$4 sm:$0xff]   ;;  %v6594_v23 = vld [vmem:[%s9094_s0 + $0x22c] ss:$16 sps:$4 sm:$0xff]  }
 0x123   :  { %3092 = vmatpush1.bf16.msra.mxu0 %v6942_v26  ;;  %4198 = vmatpush1.bf16.msra.mxu1 %v6942_v26  ;;  %v6596_v24 = vld [vmem:[%s9095_s1 + $0x22c] ss:$16 sps:$4 sm:$0xff]   ;;  %v6599_v26 = vld [vmem:[%s9095_s1 + $0x228] ss:$16 sps:$4 sm:$0xff]  }
 0x124   :  { %3093 = vmatprep.subr.bf16.mxu0 %v6961_v0  ;;  %4199 = vmatprep.subr.bf16.mxu1 %v6961_v0 }
 0x127   :  { %3094 = vmatpush1.bf16.msra.mxu0 %v6943_v31  ;;  %4200 = vmatpush1.bf16.msra.mxu1 %v6943_v31  ;;  %v6606_v31 = vld [vmem:[%s9094_s0 + $0x26c] ss:$16 sps:$4 sm:$0xff]  }
 0x128   :  { %3095 = vmatprep.subr.bf16.mxu0 %v6961_v0  ;;  %4201 = vmatprep.subr.bf16.mxu1 %v6961_v0 }
 0x129   :  { %1164 = vmatmul.mubr.bf16.gmra.mrb[16].mxu0 %v6520_v27  ;;  %2270 = vmatmul.mubr.bf16.gmra.mrb[16].mxu1 %v6521_v28  ;;  %v6600_v27 = vld [vmem:[%s9094_s0 + $0x24c] ss:$16 sps:$4 sm:$0xff]  }
 0x12a   :  { %5281 = vmatprep.mubr.msk.bf16.mxu0 %vm791_vm0, %v6522_v29  ;;  %5406 = vmatprep.mubr.msk.bf16.mxu1 %vm791_vm0, %v6524_v30  ;;  %v6602_v28 = vld [vmem:[%s9095_s1 + $0x24c] ss:$16 sps:$4 sm:$0xff]   ;;  %v6604_v29 = vld [vmem:[%s9094_s0 + $0x248] ss:$16 sps:$4 sm:$0xff]  }
 0x12b   :  { %3096 = vmatpush1.bf16.msra.mxu0 %v6944_v32  ;;  %4202 = vmatpush1.bf16.msra.mxu1 %v6944_v32  ;;  %v6605_v30 = vld [vmem:[%s9095_s1 + $0x248] ss:$16 sps:$4 sm:$0xff]   ;;  %v6608_v32 = vld [vmem:[%s9095_s1 + $0x26c] ss:$16 sps:$4 sm:$0xff]  }
 0x12c   :  { %3097 = vmatprep.subr.bf16.mxu0 %v6961_v0  ;;  %4203 = vmatprep.subr.bf16.mxu1 %v6961_v0 }
 0x12f   :  { %3098 = vmatpush1.bf16.msra.mxu0 %v6945_v37  ;;  %4204 = vmatpush1.bf16.msra.mxu1 %v6945_v37  ;;  %v6616_v37 = vld [vmem:[%s9094_s0 + $0x288] ss:$16 sps:$4 sm:$0xff]  }
 0x130   :  { %3099 = vmatprep.subr.bf16.mxu0 %v6961_v0  ;;  %4205 = vmatprep.subr.bf16.mxu1 %v6961_v0 }
 0x131   :  { %1172 = vmatmul.mubr.bf16.gmra.mrb[20].mxu0 %v6526_v33  ;;  %2278 = vmatmul.mubr.bf16.gmra.mrb[20].mxu1 %v6527_v34  ;;  %v6610_v33 = vld [vmem:[%s9094_s0 + $0x268] ss:$16 sps:$4 sm:$0xff]  }
 0x132   :  { %5282 = vmatprep.mubr.msk.bf16.mxu0 %vm791_vm0, %v6528_v35  ;;  %5407 = vmatprep.mubr.msk.bf16.mxu1 %vm791_vm0, %v6530_v36  ;;  %v6611_v34 = vld [vmem:[%s9095_s1 + $0x268] ss:$16 sps:$4 sm:$0xff]   ;;  %v6612_v35 = vld [vmem:[%s9094_s0 + $0x28c] ss:$16 sps:$4 sm:$0xff]  }
 0x133   :  { %3100 = vmatpush1.bf16.msra.mxu0 %v6946_v38  ;;  %4206 = vmatpush1.bf16.msra.mxu1 %v6946_v38  ;;  %v6614_v36 = vld [vmem:[%s9095_s1 + $0x28c] ss:$16 sps:$4 sm:$0xff]   ;;  %v6617_v38 = vld [vmem:[%s9095_s1 + $0x288] ss:$16 sps:$4 sm:$0xff]  }
 0x134   :  { %3101 = vmatprep.subr.bf16.mxu0 %v6961_v0  ;;  %4207 = vmatprep.subr.bf16.mxu1 %v6961_v0 }
 0x137   :  { %3102 = vmatpush1.bf16.msra.mxu0 %v6947_v43  ;;  %4208 = vmatpush1.bf16.msra.mxu1 %v6947_v43  ;;  %v6624_v43 = vld [vmem:[%s9094_s0 + $0x2cc] ss:$16 sps:$4 sm:$0xff]  }
 0x138   :  { %3103 = vmatprep.subr.bf16.mxu0 %v6961_v0  ;;  %4209 = vmatprep.subr.bf16.mxu1 %v6961_v0 }
 0x139   :  { %1180 = vmatmul.mubr.bf16.gmra.mrb[24].mxu0 %v6532_v39  ;;  %2286 = vmatmul.mubr.bf16.gmra.mrb[24].mxu1 %v6533_v40  ;;  %v6618_v39 = vld [vmem:[%s9094_s0 + $0x2ac] ss:$16 sps:$4 sm:$0xff]  }
 0x13a   :  { %5283 = vmatprep.mubr.msk.bf16.mxu0 %vm791_vm0, %v6534_v41  ;;  %5408 = vmatprep.mubr.msk.bf16.mxu1 %vm791_vm0, %v6536_v42  ;;  %v6620_v40 = vld [vmem:[%s9095_s1 + $0x2ac] ss:$16 sps:$4 sm:$0xff]   ;;  %v6622_v41 = vld [vmem:[%s9094_s0 + $0x2a8] ss:$16 sps:$4 sm:$0xff]  }
 0x13b   :  { %3104 = vmatpush1.bf16.msra.mxu0 %v6948_v44  ;;  %4210 = vmatpush1.bf16.msra.mxu1 %v6948_v44  ;;  %v6623_v42 = vld [vmem:[%s9095_s1 + $0x2a8] ss:$16 sps:$4 sm:$0xff]   ;;  %v6626_v44 = vld [vmem:[%s9095_s1 + $0x2cc] ss:$16 sps:$4 sm:$0xff]  }
 0x13c   :  { %3105 = vmatprep.subr.bf16.mxu0 %v6961_v0  ;;  %4211 = vmatprep.subr.bf16.mxu1 %v6961_v0 }
 0x13f   :  { %3106 = vmatpush1.bf16.msra.mxu0 %v6949_v49  ;;  %4212 = vmatpush1.bf16.msra.mxu1 %v6949_v49  ;;  %v171_v49 = vld [vmem:[%s9094_s0 + $0x308] sm:$0xff] }
 0x140   :  { %3107 = vmatprep.subr.bf16.mxu0 %v6961_v0  ;;  %4213 = vmatprep.subr.bf16.mxu1 %v6961_v0 }
 0x141   :  { %1188 = vmatmul.mubr.bf16.gmra.mrb[28].mxu0 %v6538_v45  ;;  %2294 = vmatmul.mubr.bf16.gmra.mrb[28].mxu1 %v6539_v46  ;;  %v6628_v45 = vld [vmem:[%s9094_s0 + $0x2c8] ss:$16 sps:$4 sm:$0xff]  }
 0x142   :  { %5284 = vmatprep.mubr.msk.bf16.mxu0 %vm791_vm0, %v6540_v47  ;;  %5409 = vmatprep.mubr.msk.bf16.mxu1 %vm791_vm0, %v6542_v48  ;;  %v6629_v46 = vld [vmem:[%s9095_s1 + $0x2c8] ss:$16 sps:$4 sm:$0xff]   ;;  %v6630_v47 = vld [vmem:[%s9094_s0 + $0x2ec] ss:$16 sps:$4 sm:$0xff]  }
 0x143   :  { %3108 = vmatpush1.bf16.msra.mxu0 %v6950_v50  ;;  %4214 = vmatpush1.bf16.msra.mxu1 %v6950_v50  ;;  %v6632_v48 = vld [vmem:[%s9095_s1 + $0x2ec] ss:$16 sps:$4 sm:$0xff]  }
 0x144   :  { %3109 = vmatprep.subr.bf16.mxu0 %v6961_v0  ;;  %4215 = vmatprep.subr.bf16.mxu1 %v6961_v0  ;;  %v1428_v50 = vld [vmem:[%s9095_s1 + $0x308] sm:$0xff] }
 0x147   :  { %3110 = vmatpush1.bf16.msra.mxu0 %v6951_v55  ;;  %4216 = vmatpush1.bf16.msra.mxu1 %v6951_v55  ;;  %v5249_v55 = vcombine.low %v171_v49, %v171_v49 }
 0x148   :  { %3311 = vmatprep.subr.bf16.mxu0 %v6961_v0  ;;  %4417 = vmatprep.subr.bf16.mxu1 %v6961_v0 }
 0x149   :  { %1196 = vmatmul.mubr.bf16.gmra.mrb[32].mxu0 %v6544_v51  ;;  %2302 = vmatmul.mubr.bf16.gmra.mrb[32].mxu1 %v6545_v52  ;;  %v6634_v51 = vld [vmem:[%s9094_s0 + $0x2e8] ss:$16 sps:$4 sm:$0xff]  }
 0x14a   :  { %5285 = vmatprep.mubr.msk.bf16.mxu0 %vm791_vm0, %v6546_v53  ;;  %5410 = vmatprep.mubr.msk.bf16.mxu1 %vm791_vm0, %v6548_v54  ;;  %v6635_v52 = vld [vmem:[%s9095_s1 + $0x2e8] ss:$16 sps:$4 sm:$0xff]   ;;  %v5250_v53 = vcombine.high %v171_v49, %v171_v49  ;;  %v5400_v54 = vcombine.high %v1428_v50, %v1428_v50  ;;  %v6672_v49 = vld [vmem:[%s9097_s3 + $0xa4] ss:$16 sps:$4 sm:$0xff]  }
 0x151   :  { %1204 = vmatmul.mubr.bf16.gmra.mrb[36].mxu0 %v6550_v56  ;;  %2310 = vmatmul.mubr.bf16.gmra.mrb[36].mxu1 %v6551_v57  ;;  %v5399_v56 = vcombine.low %v1428_v50, %v1428_v50  ;;  %v6642_v57 = vld [vmem:[%s9096_s2 + $0x4] ss:$16 sps:$4 sm:$0xff]  }
 0x152   :  { %5286 = vmatprep.mubr.msk.bf16.mxu0 %vm791_vm0, %v6552_v58  ;;  %5411 = vmatprep.mubr.msk.bf16.mxu1 %vm791_vm0, %v6554_v59  ;;  %v6645_v58 = vld [vmem:[%s9097_s3 + $0x4] ss:$16 sps:$4 sm:$0xff]   ;;  %v6640_v59 = vld [vmem:[%s9096_s2] ss:$16 sps:$4 sm:$0xff]  }
 0x159   :  { %1212 = vmatmul.mubr.bf16.gmra.mrb[40].mxu0 %v6556_v60  ;;  %2318 = vmatmul.mubr.bf16.gmra.mrb[40].mxu1 %v6557_v61  ;;  %v6643_v60 = vld [vmem:[%s9097_s3] ss:$16 sps:$4 sm:$0xff]   ;;  %v6646_v61 = vld [vmem:[%s9096_s2 + $0x24] ss:$16 sps:$4 sm:$0xff]  }
 0x15a   :  { %5287 = vmatprep.mubr.msk.bf16.mxu0 %vm791_vm0, %v6558_v62  ;;  %5412 = vmatprep.mubr.msk.bf16.mxu1 %vm791_vm0, %v6560_v63  ;;  %v6648_v62 = vld [vmem:[%s9097_s3 + $0x24] ss:$16 sps:$4 sm:$0xff]  }
 0x15b   :  { %v6952_v63 = vld [vmem:[%s9093_s4 + $0x80] sm:$0xff]  }
 0x161   :  { %1220 = vmatmul.mubr.bf16.gmra.mrb[44].mxu0 %v6562_v1  ;;  %2326 = vmatmul.mubr.bf16.gmra.mrb[44].mxu1 %v6563_v2  ;;  %v6650_v1 = vld [vmem:[%s9096_s2 + $0x20] ss:$16 sps:$4 sm:$0xff]  }
 0x162   :  { %5288 = vmatprep.mubr.msk.bf16.mxu0 %vm791_vm0, %v6564_v3  ;;  %5413 = vmatprep.mubr.msk.bf16.mxu1 %vm791_vm0, %v6566_v4  ;;  %v6651_v2 = vld [vmem:[%s9097_s3 + $0x20] ss:$16 sps:$4 sm:$0xff]   ;;  %v6652_v3 = vld [vmem:[%s9096_s2 + $0x44] ss:$16 sps:$4 sm:$0xff]  }
 0x163   :  { %v6654_v4 = vld [vmem:[%s9097_s3 + $0x44] ss:$16 sps:$4 sm:$0xff]  }
 0x169   :  { %1228 = vmatmul.mubr.bf16.gmra.mrb[48].mxu0 %v6568_v5  ;;  %2334 = vmatmul.mubr.bf16.gmra.mrb[48].mxu1 %v6569_v6  ;;  %v6953_v5 = vld [vmem:[%s9093_s4 + $0x88] sm:$0xff]   ;;  %v6954_v6 = vld [vmem:[%s9093_s4 + $0x90] sm:$0xff]  }
 0x16a   :  { %5289 = vmatprep.mubr.msk.bf16.mxu0 %vm791_vm0, %v6570_v7  ;;  %5414 = vmatprep.mubr.msk.bf16.mxu1 %vm791_vm0, %v6572_v8 }
 0x171   :  { %1236 = vmatmul.mubr.bf16.gmra.mrb[52].mxu0 %v6574_v9  ;;  %2342 = vmatmul.mubr.bf16.gmra.mrb[52].mxu1 %v6575_v10 }
 0x172   :  { %5290 = vmatprep.mubr.msk.bf16.mxu0 %vm791_vm0, %v6576_v11  ;;  %5415 = vmatprep.mubr.msk.bf16.mxu1 %vm791_vm0, %v6578_v12  ;;  %v6656_v12 = vld [vmem:[%s9096_s2 + $0x40] ss:$16 sps:$4 sm:$0xff]  }
 0x179   :  { %1244 = vmatmul.mubr.bf16.gmra.mrb[56].mxu0 %v6580_v13  ;;  %2350 = vmatmul.mubr.bf16.gmra.mrb[56].mxu1 %v6581_v14  ;;  %v6657_v13 = vld [vmem:[%s9097_s3 + $0x40] ss:$16 sps:$4 sm:$0xff]  }
 0x17a   :  { %5291 = vmatprep.mubr.msk.bf16.mxu0 %vm791_vm0, %v6582_v15  ;;  %5416 = vmatprep.mubr.msk.bf16.mxu1 %vm791_vm0, %v6584_v16  ;;  %v6658_v16 = vld [vmem:[%s9096_s2 + $0x64] ss:$16 sps:$4 sm:$0xff]  }
 0x181   :  { %1252 = vmatmul.mubr.bf16.gmra.mrb[60].mxu0 %v6586_v17  ;;  %2358 = vmatmul.mubr.bf16.gmra.mrb[60].mxu1 %v6587_v18  ;;  %v6660_v17 = vld [vmem:[%s9097_s3 + $0x64] ss:$16 sps:$4 sm:$0xff]  }
 0x182   :  { %5292 = vmatprep.mubr.msk.bf16.mxu0 %vm791_vm0, %v6588_v19  ;;  %5417 = vmatprep.mubr.msk.bf16.mxu1 %vm791_vm0, %v6590_v20 }
 0x189   :  { %1260 = vmatmul.mubr.bf16.gmra.mrb[64].mxu0 %v6592_v21  ;;  %2366 = vmatmul.mubr.bf16.gmra.mrb[64].mxu1 %v6593_v22  ;;  %v6955_v21 = vld [vmem:[%s9093_s4 + $0x98] sm:$0xff]   ;;  %v6956_v22 = vld [vmem:[%s9093_s4 + $0xa0] sm:$0xff]  }
 0x18a   :  { %5293 = vmatprep.mubr.msk.bf16.mxu0 %vm791_vm0, %v6594_v23  ;;  %5418 = vmatprep.mubr.msk.bf16.mxu1 %vm791_vm0, %v6596_v24 }
 0x191   :  { %1268 = vmatmul.mubr.bf16.gmra.mrb[68].mxu0 %v6598_v25  ;;  %2374 = vmatmul.mubr.bf16.gmra.mrb[68].mxu1 %v6599_v26 }
 0x192   :  { %5294 = vmatprep.mubr.msk.bf16.mxu0 %vm791_vm0, %v6600_v27  ;;  %5419 = vmatprep.mubr.msk.bf16.mxu1 %vm791_vm0, %v6602_v28  ;;  %v6662_v28 = vld [vmem:[%s9096_s2 + $0x60] ss:$16 sps:$4 sm:$0xff]  }
 0x199   :  { %1276 = vmatmul.mubr.bf16.gmra.mrb[72].mxu0 %v6604_v29  ;;  %2382 = vmatmul.mubr.bf16.gmra.mrb[72].mxu1 %v6605_v30  ;;  %v6663_v29 = vld [vmem:[%s9097_s3 + $0x60] ss:$16 sps:$4 sm:$0xff]  }
 0x19a   :  { %5295 = vmatprep.mubr.msk.bf16.mxu0 %vm791_vm0, %v6606_v31  ;;  %5420 = vmatprep.mubr.msk.bf16.mxu1 %vm791_vm0, %v6608_v32  ;;  %v6664_v32 = vld [vmem:[%s9096_s2 + $0x84] ss:$16 sps:$4 sm:$0xff]  }
 0x1a1   :  { %1284 = vmatmul.mubr.bf16.gmra.mrb[76].mxu0 %v6610_v33  ;;  %2390 = vmatmul.mubr.bf16.gmra.mrb[76].mxu1 %v6611_v34  ;;  %v6666_v33 = vld [vmem:[%s9097_s3 + $0x84] ss:$16 sps:$4 sm:$0xff]   ;;  %v6728_v34 = vld [vmem:[%s9096_s2 + $0x1c0] ss:$16 sps:$4 sm:$0xff]  }
 0x1a2   :  { %5296 = vmatprep.mubr.msk.bf16.mxu0 %vm791_vm0, %v6612_v35  ;;  %5421 = vmatprep.mubr.msk.bf16.mxu1 %vm791_vm0, %v6614_v36 }
 0x1a9   :  { %1292 = vmatmul.mubr.bf16.gmra.mrb[80].mxu0 %v6616_v37  ;;  %2398 = vmatmul.mubr.bf16.gmra.mrb[80].mxu1 %v6617_v38  ;;  %v6957_v37 = vld [vmem:[%s9093_s4 + $0xa8] sm:$0xff]   ;;  %v6958_v38 = vld [vmem:[%s9093_s4 + $0xb0] sm:$0xff]  }
 0x1aa   :  { %5297 = vmatprep.mubr.msk.bf16.mxu0 %vm791_vm0, %v6618_v39  ;;  %5422 = vmatprep.mubr.msk.bf16.mxu1 %vm791_vm0, %v6620_v40 }
 0x1b1   :  { %1300 = vmatmul.mubr.bf16.gmra.mrb[84].mxu0 %v6622_v41  ;;  %2406 = vmatmul.mubr.bf16.gmra.mrb[84].mxu1 %v6623_v42 }
 0x1b2   :  { %5298 = vmatprep.mubr.msk.bf16.mxu0 %vm791_vm0, %v6624_v43  ;;  %5423 = vmatprep.mubr.msk.bf16.mxu1 %vm791_vm0, %v6626_v44  ;;  %v6668_v44 = vld [vmem:[%s9096_s2 + $0x80] ss:$16 sps:$4 sm:$0xff]  }
 0x1b9   :  { %1308 = vmatmul.mubr.bf16.gmra.mrb[88].mxu0 %v6628_v45  ;;  %2414 = vmatmul.mubr.bf16.gmra.mrb[88].mxu1 %v6629_v46  ;;  %v6669_v45 = vld [vmem:[%s9097_s3 + $0x80] ss:$16 sps:$4 sm:$0xff]  }
 0x1ba   :  { %5299 = vmatprep.mubr.msk.bf16.mxu0 %vm791_vm0, %v6630_v47  ;;  %5424 = vmatprep.mubr.msk.bf16.mxu1 %vm791_vm0, %v6632_v48  ;;  %v6670_v48 = vld [vmem:[%s9096_s2 + $0xa4] ss:$16 sps:$4 sm:$0xff]  }
 0x1c1   :  { %1316 = vmatmul.mubr.bf16.gmra.mrb[92].mxu0 %v6634_v51  ;;  %2422 = vmatmul.mubr.bf16.gmra.mrb[92].mxu1 %v6635_v52 }
 0x1c2   :  { %5300 = vmatprep.mubr.msk.bf16.mxu0 %vm791_vm0, %v5250_v53  ;;  %5425 = vmatprep.mubr.msk.bf16.mxu1 %vm791_vm0, %v5400_v54  ;;  %v6959_v53 = vld [vmem:[%s9093_s4 + $0xb8] sm:$0xff]   ;;  %v6960_v54 = vld [vmem:[%s9093_s4 + $0xc0] sm:$0xff]  }
 0x1c9   :  { %1324 = vmatmul.mubr.bf16.gmra.mrb[96].mxu0 %v5249_v55  ;;  %2430 = vmatmul.mubr.bf16.gmra.mrb[96].mxu1 %v5399_v56 }
 0x1ca   :  { %3111 = vmatprep.mubr.bf16.mxu0 %v6642_v57  ;;  %4217 = vmatprep.mubr.bf16.mxu1 %v6645_v58 }
 0x1d1   :  { %3112 = vmatmul.mubr.bf16.vlgmr.msra.gmra.mrb[100].mxu0 %v6640_v59  ;;  %4218 = vmatmul.mubr.bf16.vlgmr.msra.gmra.mrb[100].mxu1 %v6643_v60  ;;  %v6675_v60 = vld [vmem:[%s9097_s3 + $0xa0] ss:$16 sps:$4 sm:$0xff]  }
 0x1d2   :  { %3312 = vmatpush1.bf16.msra.mxu0 %v6952_v63  ;;  %4418 = vmatpush1.bf16.msra.mxu1 %v6952_v63  ;;  %v6676_v63 = vld [vmem:[%s9096_s2 + $0xc4] ss:$16 sps:$4 sm:$0xff]  }
 0x1d3   :  { %3119 = vmatprep.mubr.bf16.mxu0 %v6646_v61  ;;  %4225 = vmatprep.mubr.bf16.mxu1 %v6648_v62 }
 0x1d4   :  { %3313 = vmatprep.subr.bf16.mxu0 %v6961_v0  ;;  %4419 = vmatprep.subr.bf16.mxu1 %v6961_v0 }
 0x1d6   :  { %3314 = vmatpush1.bf16.msra.mxu0 %v6953_v5  ;;  %4420 = vmatpush1.bf16.msra.mxu1 %v6953_v5 }
 0x1d7   :  { %3315 = vmatprep.subr.bf16.mxu0 %v6961_v0  ;;  %4421 = vmatprep.subr.bf16.mxu1 %v6961_v0 }
 0x1d9   :  { %3120 = vmatmul.mubr.bf16.gmra.mrb[104].mxu0 %v6650_v1  ;;  %4226 = vmatmul.mubr.bf16.gmra.mrb[104].mxu1 %v6651_v2  ;;  %v6678_v1 = vld [vmem:[%s9097_s3 + $0xc4] ss:$16 sps:$4 sm:$0xff]   ;;  %v6722_v2 = vld [vmem:[%s9096_s2 + $0x1a0] ss:$16 sps:$4 sm:$0xff]  }
 0x1da   :  { %3127 = vmatprep.mubr.bf16.mxu0 %v6652_v3  ;;  %4233 = vmatprep.mubr.bf16.mxu1 %v6654_v4 }
 0x1db   :  { %3316 = vmatpush1.bf16.msra.mxu0 %v6954_v6  ;;  %4422 = vmatpush1.bf16.msra.mxu1 %v6954_v6 }
 0x1dc   :  { %v7885_v7 = vpop.f32.mrb[0].mxu0  ;;  %v7887_v8 = vpop.f32.mrb[0].mxu1  ;;  %3317 = vmatprep.subr.bf16.mxu0 %v6961_v0  ;;  %4423 = vmatprep.subr.bf16.mxu1 %v6961_v0 }
 0x1dd   :  { %v1135_v10 = vpop.f32.mrb[1].mxu0  ;;  %v2241_v11 = vpop.f32.mrb[1].mxu1 }
 0x1de   :  { %v7899_v14 = vpop.f32.mrb[2].mxu0  ;;  %v7901_v15 = vpop.f32.mrb[2].mxu1 }
 0x1df   :  { %v1138_v19 = vpop.f32.mrb[3].mxu0  ;;  %v2244_v20 = vpop.f32.mrb[3].mxu1  ;;  %3318 = vmatpush1.bf16.msra.mxu0 %v6955_v21  ;;  %4424 = vmatpush1.bf16.msra.mxu1 %v6955_v21  ;;  %v6684_v21 = vld [vmem:[%s9097_s3 + $0xe4] ss:$16 sps:$4 sm:$0xff]  }
 0x1e0   :  { %3319 = vmatprep.subr.bf16.mxu0 %v6961_v0  ;;  %4425 = vmatprep.subr.bf16.mxu1 %v6961_v0  ;;  %v6682_v20 = vld [vmem:[%s9096_s2 + $0xe4] ss:$16 sps:$4 sm:$0xff]  }
 0x1e1   :  { %3128 = vmatmul.mubr.bf16.gmra.mrb[108].mxu0 %v6656_v12  ;;  %4234 = vmatmul.mubr.bf16.gmra.mrb[108].mxu1 %v6657_v13  ;;  %v6680_v13 = vld [vmem:[%s9096_s2 + $0xc0] ss:$16 sps:$4 sm:$0xff]  }
 0x1e2   :  { %3135 = vmatprep.mubr.bf16.mxu0 %v6658_v16  ;;  %4241 = vmatprep.mubr.bf16.mxu1 %v6660_v17  ;;  %v6681_v16 = vld [vmem:[%s9097_s3 + $0xc0] ss:$16 sps:$4 sm:$0xff]  }
 0x1e3   :  { %3320 = vmatpush1.bf16.msra.mxu0 %v6956_v22  ;;  %4426 = vmatpush1.bf16.msra.mxu1 %v6956_v22 }
 0x1e4   :  { %v7919_v23 = vpop.f32.mrb[4].mxu0  ;;  %v7921_v24 = vpop.f32.mrb[4].mxu1  ;;  %3321 = vmatprep.subr.bf16.mxu0 %v6961_v0  ;;  %4427 = vmatprep.subr.bf16.mxu1 %v6961_v0 }
 0x1e5   :  { %v1143_v26 = vpop.f32.mrb[5].mxu0  ;;  %v2249_v27 = vpop.f32.mrb[5].mxu1 }
 0x1e6   :  { %v7933_v30 = vpop.f32.mrb[6].mxu0  ;;  %v7935_v31 = vpop.f32.mrb[6].mxu1 }
 0x1e7   :  { %v1146_v35 = vpop.f32.mrb[7].mxu0  ;;  %v2252_v36 = vpop.f32.mrb[7].mxu1  ;;  %3322 = vmatpush1.bf16.msra.mxu0 %v6957_v37  ;;  %4428 = vmatpush1.bf16.msra.mxu1 %v6957_v37  ;;  %v6687_v37 = vld [vmem:[%s9097_s3 + $0xe0] ss:$16 sps:$4 sm:$0xff]  }
 0x1e8   :  { %3323 = vmatprep.subr.bf16.mxu0 %v6961_v0  ;;  %4429 = vmatprep.subr.bf16.mxu1 %v6961_v0  ;;  %v6686_v36 = vld [vmem:[%s9096_s2 + $0xe0] ss:$16 sps:$4 sm:$0xff]  }
 0x1e9   :  { %3136 = vmatmul.mubr.bf16.gmra.mrb[112].mxu0 %v6662_v28  ;;  %4242 = vmatmul.mubr.bf16.gmra.mrb[112].mxu1 %v6663_v29 }
 0x1ea   :  { %3143 = vmatprep.mubr.bf16.mxu0 %v6664_v32  ;;  %4249 = vmatprep.mubr.bf16.mxu1 %v6666_v33 }
 0x1eb   :  { %3324 = vmatpush1.bf16.msra.mxu0 %v6958_v38  ;;  %4430 = vmatpush1.bf16.msra.mxu1 %v6958_v38 }
 0x1ec   :  { %v7953_v39 = vpop.f32.mrb[8].mxu0  ;;  %v7955_v40 = vpop.f32.mrb[8].mxu1  ;;  %3325 = vmatprep.subr.bf16.mxu0 %v6961_v0  ;;  %4431 = vmatprep.subr.bf16.mxu1 %v6961_v0 }
 0x1ed   :  { %v1151_v42 = vpop.f32.mrb[9].mxu0  ;;  %v2257_v43 = vpop.f32.mrb[9].mxu1 }
 0x1ee   :  { %v7967_v46 = vpop.f32.mrb[10].mxu0  ;;  %v7969_v47 = vpop.f32.mrb[10].mxu1  ;;  %v6688_v43 = vld [vmem:[%s9096_s2 + $0x104] ss:$16 sps:$4 sm:$0xff]  }
 0x1ef   :  { %v1154_v51 = vpop.f32.mrb[11].mxu0  ;;  %v2260_v52 = vpop.f32.mrb[11].mxu1  ;;  %3326 = vmatpush1.bf16.msra.mxu0 %v6959_v53  ;;  %4432 = vmatpush1.bf16.msra.mxu1 %v6959_v53 }
 0x1f0   :  { %3327 = vmatprep.subr.bf16.mxu0 %v6961_v0  ;;  %4433 = vmatprep.subr.bf16.mxu1 %v6961_v0  ;;  %v6674_v0 = vld [vmem:[%s9096_s2 + $0xa0] ss:$16 sps:$4 sm:$0xff]  }
 0x1f1   :  { %3144 = vmatmul.mubr.bf16.gmra.mrb[116].mxu0 %v6668_v44  ;;  %4250 = vmatmul.mubr.bf16.gmra.mrb[116].mxu1 %v6669_v45  ;;  %v6690_v44 = vld [vmem:[%s9097_s3 + $0x104] ss:$16 sps:$4 sm:$0xff]   ;;  %v6716_v45 = vld [vmem:[%s9096_s2 + $0x180] ss:$16 sps:$4 sm:$0xff]  }
 0x1f2   :  { %3151 = vmatprep.mubr.bf16.mxu0 %v6670_v48  ;;  %4257 = vmatprep.mubr.bf16.mxu1 %v6672_v49 }
 0x1f3   :  { %3328 = vmatpush1.bf16.msra.mxu0 %v6960_v54  ;;  %4434 = vmatpush1.bf16.msra.mxu1 %v6960_v54 }
 0x1f4   :  { %v7987_v55 = vpop.f32.mrb[12].mxu0  ;;  %v7989_v56 = vpop.f32.mrb[12].mxu1 }
 0x1f5   :  { %v1159_v58 = vpop.f32.mrb[13].mxu0  ;;  %v2265_v59 = vpop.f32.mrb[13].mxu1 }
 0x1f6   :  { %v7999_v61 = vpop.f32.mrb[14].mxu0  ;;  %v8001_v62 = vpop.f32.mrb[14].mxu1  ;;  %v6692_v59 = vld [vmem:[%s9096_s2 + $0x100] ss:$16 sps:$4 sm:$0xff]  }
 0x1f7   :  { %v1162_v3 = vpop.f32.mrb[15].mxu0  ;;  %v2268_v4 = vpop.f32.mrb[15].mxu1 }
 0x1f8   :  { %v6696_v3 = vld [vmem:[%s9097_s3 + $0x124] ss:$16 sps:$4 sm:$0xff]  }
 0x1f9   :  { %3152 = vmatmul.mubr.bf16.gmra.mrb[120].mxu0 %v6674_v0  ;;  %4258 = vmatmul.mubr.bf16.gmra.mrb[120].mxu1 %v6675_v60  ;;  %v6693_v0 = vld [vmem:[%s9097_s3 + $0x100] ss:$16 sps:$4 sm:$0xff]  }
 0x1fa   :  { %3159 = vmatprep.mubr.bf16.mxu0 %v6676_v63  ;;  %4265 = vmatprep.mubr.bf16.mxu1 %v6678_v1  ;;  %v6694_v1 = vld [vmem:[%s9096_s2 + $0x124] ss:$16 sps:$4 sm:$0xff]  }
 0x1fc   :  { %v8011_v5 = vpop.f32.mrb[16].mxu0  ;;  %v8013_v6 = vpop.f32.mrb[16].mxu1 }
 0x1fd   :  { %v1167_v11 = vpop.f32.mrb[17].mxu0  ;;  %v2273_v12 = vpop.f32.mrb[17].mxu1 }
 0x1fe   :  { %v8023_v17 = vpop.f32.mrb[18].mxu0  ;;  %v8025_v19 = vpop.f32.mrb[18].mxu1 }
 0x1ff   :  { %v1170_v26 = vpop.f32.mrb[19].mxu0  ;;  %v2276_v27 = vpop.f32.mrb[19].mxu1 }
 0x200   :  { %v6698_v27 = vld [vmem:[%s9096_s2 + $0x120] ss:$16 sps:$4 sm:$0xff]  }
 0x201   :  { %3160 = vmatmul.mubr.bf16.gmra.mrb[124].mxu0 %v6680_v13  ;;  %4266 = vmatmul.mubr.bf16.gmra.mrb[124].mxu1 %v6681_v16 }
 0x202   :  { %3167 = vmatprep.mubr.bf16.mxu0 %v6682_v20  ;;  %4273 = vmatprep.mubr.bf16.mxu1 %v6684_v21 }
 0x204   :  { %v8035_v28 = vpop.f32.mrb[20].mxu0  ;;  %v8037_v29 = vpop.f32.mrb[20].mxu1 }
 0x205   :  { %v1175_v33 = vpop.f32.mrb[21].mxu0  ;;  %v2281_v35 = vpop.f32.mrb[21].mxu1 }
 0x206   :  { %v8047_v38 = vpop.f32.mrb[22].mxu0  ;;  %v8049_v42 = vpop.f32.mrb[22].mxu1  ;;  %v6699_v33 = vld [vmem:[%s9097_s3 + $0x120] ss:$16 sps:$4 sm:$0xff]  }
 0x207   :  { %v1178_v48 = vpop.f32.mrb[23].mxu0  ;;  %v2284_v49 = vpop.f32.mrb[23].mxu1 }
 0x209   :  { %3168 = vmatmul.mubr.bf16.gmra.mrb[128].mxu0 %v6686_v36  ;;  %4274 = vmatmul.mubr.bf16.gmra.mrb[128].mxu1 %v6687_v37  ;;  %v6700_v37 = vld [vmem:[%s9096_s2 + $0x144] ss:$16 sps:$4 sm:$0xff]  }
 0x20a   :  { %3175 = vmatprep.mubr.bf16.mxu0 %v6688_v43  ;;  %4281 = vmatprep.mubr.bf16.mxu1 %v6690_v44  ;;  %v6702_v43 = vld [vmem:[%s9097_s3 + $0x144] ss:$16 sps:$4 sm:$0xff]   ;;  %v6710_v44 = vld [vmem:[%s9096_s2 + $0x160] ss:$16 sps:$4 sm:$0xff]  }
 0x20c   :  { %v8059_v51 = vpop.f32.mrb[24].mxu0  ;;  %v8061_v52 = vpop.f32.mrb[24].mxu1 }
 0x20d   :  { %v1183_v54 = vpop.f32.mrb[25].mxu0  ;;  %v2289_v58 = vpop.f32.mrb[25].mxu1 }
 0x20e   :  { %v8071_v60 = vpop.f32.mrb[26].mxu0  ;;  %v8073_v63 = vpop.f32.mrb[26].mxu1 }
 0x20f   :  { %v1186_v11 = vpop.f32.mrb[27].mxu0  ;;  %v2292_v12 = vpop.f32.mrb[27].mxu1 }
 0x210   :  { %v6705_v11 = vld [vmem:[%s9097_s3 + $0x140] ss:$16 sps:$4 sm:$0xff]  }
 0x211   :  { %3176 = vmatmul.mubr.bf16.gmra.mrb[132].mxu0 %v6692_v59  ;;  %4282 = vmatmul.mubr.bf16.gmra.mrb[132].mxu1 %v6693_v0 }
 0x212   :  { %3183 = vmatprep.mubr.bf16.mxu0 %v6694_v1  ;;  %4289 = vmatprep.mubr.bf16.mxu1 %v6696_v3  ;;  %v6704_v3 = vld [vmem:[%s9096_s2 + $0x140] ss:$16 sps:$4 sm:$0xff]  }
 0x214   :  { %v8083_v13 = vpop.f32.mrb[28].mxu0  ;;  %v8085_v16 = vpop.f32.mrb[28].mxu1 }
 0x215   :  { %v1191_v21 = vpop.f32.mrb[29].mxu0  ;;  %v2297_v26 = vpop.f32.mrb[29].mxu1 }
 0x216   :  { %v8095_v35 = vpop.f32.mrb[30].mxu0  ;;  %v8097_v36 = vpop.f32.mrb[30].mxu1  ;;  %v6706_v26 = vld [vmem:[%s9096_s2 + $0x164] ss:$16 sps:$4 sm:$0xff]  }
 0x217   :  { %v1194_v48 = vpop.f32.mrb[31].mxu0  ;;  %v2300_v49 = vpop.f32.mrb[31].mxu1 }
 0x219   :  { %3184 = vmatmul.mubr.bf16.gmra.mrb[136].mxu0 %v6698_v27  ;;  %4290 = vmatmul.mubr.bf16.gmra.mrb[136].mxu1 %v6699_v33  ;;  %v6708_v27 = vld [vmem:[%s9097_s3 + $0x164] ss:$16 sps:$4 sm:$0xff]  }
 0x21a   :  { %3191 = vmatprep.mubr.bf16.mxu0 %v6700_v37  ;;  %4297 = vmatprep.mubr.bf16.mxu1 %v6702_v43 }
 0x21c   :  { %v8107_v54 = vpop.f32.mrb[32].mxu0  ;;  %v8109_v58 = vpop.f32.mrb[32].mxu1 }
 0x21d   :  { %v1199_v0 = vpop.f32.mrb[33].mxu0  ;;  %v2305_v1 = vpop.f32.mrb[33].mxu1 }
 0x21e   :  { %v8119_v12 = vpop.f32.mrb[34].mxu0  ;;  %v8121_v21 = vpop.f32.mrb[34].mxu1 }
 0x21f   :  { %v1202_v37 = vpop.f32.mrb[35].mxu0  ;;  %v2308_v43 = vpop.f32.mrb[35].mxu1 }
 0x221   :  { %3192 = vmatmul.mubr.bf16.gmra.mrb[140].mxu0 %v6704_v3  ;;  %4298 = vmatmul.mubr.bf16.gmra.mrb[140].mxu1 %v6705_v11  ;;  %v6711_v3 = vld [vmem:[%s9097_s3 + $0x160] ss:$16 sps:$4 sm:$0xff]  }
 0x222   :  { %3199 = vmatprep.mubr.bf16.mxu0 %v6706_v26  ;;  %4305 = vmatprep.mubr.bf16.mxu1 %v6708_v27  ;;  %v6712_v27 = vld [vmem:[%s9096_s2 + $0x184] ss:$16 sps:$4 sm:$0xff]  }
 0x224   :  { %v8131_v48 = vpop.f32.mrb[36].mxu0  ;;  %v8133_v49 = vpop.f32.mrb[36].mxu1 }
 0x225   :  { %v1207_v1 = vpop.f32.mrb[37].mxu0  ;;  %v2313_v59 = vpop.f32.mrb[37].mxu1 }
 0x226   :  { %v8143_v11 = vpop.f32.mrb[38].mxu0  ;;  %v8145_v26 = vpop.f32.mrb[38].mxu1  ;;  %v6714_v59 = vld [vmem:[%s9097_s3 + $0x184] ss:$16 sps:$4 sm:$0xff]  }
 0x227   :  { %v1210_v43 = vpop.f32.mrb[39].mxu0  ;;  %v2316_v1 = vpop.f32.mrb[39].mxu1 }
 0x229   :  { %3200 = vmatmul.mubr.bf16.gmra.mrb[144].mxu0 %v6710_v44  ;;  %4306 = vmatmul.mubr.bf16.gmra.mrb[144].mxu1 %v6711_v3  ;;  %v6717_v44 = vld [vmem:[%s9097_s3 + $0x180] ss:$16 sps:$4 sm:$0xff]  }
 0x22a   :  { %3207 = vmatprep.mubr.bf16.mxu0 %v6712_v27  ;;  %4313 = vmatprep.mubr.bf16.mxu1 %v6714_v59  ;;  %v6718_v59 = vld [vmem:[%s9096_s2 + $0x1a4] ss:$16 sps:$4 sm:$0xff]  }
 0x22c   :  { %v8155_v0 = vpop.f32.mrb[40].mxu0  ;;  %v8157_v33 = vpop.f32.mrb[40].mxu1 }
 0x22d   :  { %v1215_v4 = vpop.f32.mrb[41].mxu0  ;;  %v2321_v53 = vpop.f32.mrb[41].mxu1 }
 0x22e   :  { %v8167_v3 = vpop.f32.mrb[42].mxu0  ;;  %v8169_v27 = vpop.f32.mrb[42].mxu1  ;;  %v6720_v53 = vld [vmem:[%s9097_s3 + $0x1a4] ss:$16 sps:$4 sm:$0xff]  }
 0x22f   :  { %v1218_v43 = vpop.f32.mrb[43].mxu0  ;;  %v2324_v1 = vpop.f32.mrb[43].mxu1 }
 0x231   :  { %3208 = vmatmul.mubr.bf16.gmra.mrb[148].mxu0 %v6716_v45  ;;  %4314 = vmatmul.mubr.bf16.gmra.mrb[148].mxu1 %v6717_v44  ;;  %v6723_v45 = vld [vmem:[%s9097_s3 + $0x1a0] ss:$16 sps:$4 sm:$0xff]  }
 0x232   :  { %3215 = vmatprep.mubr.bf16.mxu0 %v6718_v59  ;;  %4321 = vmatprep.mubr.bf16.mxu1 %v6720_v53  ;;  %v6724_v53 = vld [vmem:[%s9096_s2 + $0x1c4] ss:$16 sps:$4 sm:$0xff]  }
 0x234   :  { %v8179_v20 = vpop.f32.mrb[44].mxu0  ;;  %v8181_v37 = vpop.f32.mrb[44].mxu1 }
 0x235   :  { %9154 = vst [vmem:[#allocation2_spill] sm:$0xff] %v8179_v20  ;;  %9155 = vst [vmem:[#allocation3_spill] sm:$0xff] %v8181_v37  ;;  %v1223_v22 = vpop.f32.mrb[45].mxu0  ;;  %v2329_v10 = vpop.f32.mrb[45].mxu1 }
 0x236   :  { %v8191_v44 = vpop.f32.mrb[46].mxu0  ;;  %v8193_v59 = vpop.f32.mrb[46].mxu1  ;;  %v6726_v10 = vld [vmem:[%s9097_s3 + $0x1c4] ss:$16 sps:$4 sm:$0xff]  }
 0x237   :  { %9156 = vst [vmem:[#allocation4_spill] sm:$0xff] %v8191_v44  ;;  %9157 = vst [vmem:[#allocation5_spill] sm:$0xff] %v8193_v59  ;;  %v1226_v43 = vpop.f32.mrb[47].mxu0  ;;  %v2332_v1 = vpop.f32.mrb[47].mxu1 }
 0x239   :  { %3216 = vmatmul.mubr.bf16.gmra.mrb[152].mxu0 %v6722_v2  ;;  %4322 = vmatmul.mubr.bf16.gmra.mrb[152].mxu1 %v6723_v45  ;;  %v6729_v2 = vld [vmem:[%s9097_s3 + $0x1c0] ss:$16 sps:$4 sm:$0xff]  }
 0x23a   :  { %3223 = vmatprep.mubr.bf16.mxu0 %v6724_v53  ;;  %4329 = vmatprep.mubr.bf16.mxu1 %v6726_v10  ;;  %v6730_v10 = vld [vmem:[%s9096_s2 + $0x1e4] ss:$16 sps:$4 sm:$0xff]  }
 0x23c   :  { %v8203_v32 = vpop.f32.mrb[48].mxu0  ;;  %v8205_v4 = vpop.f32.mrb[48].mxu1 }
 0x23d   :  { %9158 = vst [vmem:[#allocation6_spill] sm:$0xff] %v8203_v32  ;;  %9159 = vst [vmem:[#allocation7_spill] sm:$0xff] %v8205_v4  ;;  %v1231_v50 = vpop.f32.mrb[49].mxu0  ;;  %v2337_v41 = vpop.f32.mrb[49].mxu1  ;;  %v6734_v4 = vld [vmem:[%s9096_s2 + $0x1e0] ss:$16 sps:$4 sm:$0xff]  }
 0x23e   :  { %v8215_v45 = vpop.f32.mrb[50].mxu0  ;;  %v8217_v53 = vpop.f32.mrb[50].mxu1  ;;  %v6732_v41 = vld [vmem:[%s9097_s3 + $0x1e4] ss:$16 sps:$4 sm:$0xff]  }
 0x23f   :  { %9160 = vst [vmem:[#allocation8_spill] sm:$0xff] %v8215_v45  ;;  %9161 = vst [vmem:[#allocation9_spill] sm:$0xff] %v8217_v53  ;;  %v1234_v43 = vpop.f32.mrb[51].mxu0  ;;  %v2340_v1 = vpop.f32.mrb[51].mxu1  ;;  %v6740_v45 = vld [vmem:[%s9096_s2 + $0x200] ss:$16 sps:$4 sm:$0xff]  }
 0x241   :  { %3224 = vmatmul.mubr.bf16.gmra.mrb[156].mxu0 %v6728_v34  ;;  %4330 = vmatmul.mubr.bf16.gmra.mrb[156].mxu1 %v6729_v2  ;;  %v6735_v34 = vld [vmem:[%s9097_s3 + $0x1e0] ss:$16 sps:$4 sm:$0xff]  }
 0x242   :  { %3231 = vmatprep.mubr.bf16.mxu0 %v6730_v10  ;;  %4337 = vmatprep.mubr.bf16.mxu1 %v6732_v41  ;;  %v6736_v41 = vld [vmem:[%s9096_s2 + $0x204] ss:$16 sps:$4 sm:$0xff]  }
 0x244   :  { %v8227_v57 = vpop.f32.mrb[52].mxu0  ;;  %v8229_v22 = vpop.f32.mrb[52].mxu1 }
 0x245   :  { %9162 = vst [vmem:[#allocation10_spill] sm:$0xff] %v8227_v57  ;;  %9163 = vst [vmem:[#allocation11_spill] sm:$0xff] %v8229_v22  ;;  %v1239_v18 = vpop.f32.mrb[53].mxu0  ;;  %v2345_v9 = vpop.f32.mrb[53].mxu1 }
 0x246   :  { %v8239_v2 = vpop.f32.mrb[54].mxu0  ;;  %v8241_v10 = vpop.f32.mrb[54].mxu1  ;;  %v6738_v9 = vld [vmem:[%s9097_s3 + $0x204] ss:$16 sps:$4 sm:$0xff]  }
 0x247   :  { %9164 = vst [vmem:[#allocation12_spill] sm:$0xff] %v8239_v2  ;;  %9165 = vst [vmem:[#allocation13_spill] sm:$0xff] %v8241_v10  ;;  %v1242_v43 = vpop.f32.mrb[55].mxu0  ;;  %v2348_v1 = vpop.f32.mrb[55].mxu1  ;;  %v6746_v2 = vld [vmem:[%s9096_s2 + $0x220] ss:$16 sps:$4 sm:$0xff]  }
 0x249   :  { %3232 = vmatmul.mubr.bf16.gmra.mrb[160].mxu0 %v6734_v4  ;;  %4338 = vmatmul.mubr.bf16.gmra.mrb[160].mxu1 %v6735_v34  ;;  %v6741_v4 = vld [vmem:[%s9097_s3 + $0x200] ss:$16 sps:$4 sm:$0xff]  }
 0x24a   :  { %3239 = vmatprep.mubr.bf16.mxu0 %v6736_v41  ;;  %4345 = vmatprep.mubr.bf16.mxu1 %v6738_v9  ;;  %v6742_v9 = vld [vmem:[%s9096_s2 + $0x224] ss:$16 sps:$4 sm:$0xff]  }
 0x24c   :  { %v8251_v25 = vpop.f32.mrb[56].mxu0  ;;  %v8253_v50 = vpop.f32.mrb[56].mxu1 }
 0x24d   :  { %9166 = vst [vmem:[#allocation14_spill] sm:$0xff] %v8251_v25  ;;  %9167 = vst [vmem:[#allocation15_spill] sm:$0xff] %v8253_v50  ;;  %v1247_v57 = vpop.f32.mrb[57].mxu0  ;;  %v2353_v53 = vpop.f32.mrb[57].mxu1 }
 0x24e   :  { %v8263_v34 = vpop.f32.mrb[58].mxu0  ;;  %v8265_v41 = vpop.f32.mrb[58].mxu1  ;;  %v6744_v57 = vld [vmem:[%s9097_s3 + $0x224] ss:$16 sps:$4 sm:$0xff]  }
 0x24f   :  { %9168 = vst [vmem:[#allocation16_spill] sm:$0xff] %v8263_v34  ;;  %9169 = vst [vmem:[#allocation17_spill] sm:$0xff] %v8265_v41  ;;  %v1250_v43 = vpop.f32.mrb[59].mxu0  ;;  %v2356_v1 = vpop.f32.mrb[59].mxu1  ;;  %v6752_v34 = vld [vmem:[%s9096_s2 + $0x240] ss:$16 sps:$4 sm:$0xff]  }
 0x251   :  { %3240 = vmatmul.mubr.bf16.gmra.mrb[164].mxu0 %v6740_v45  ;;  %4346 = vmatmul.mubr.bf16.gmra.mrb[164].mxu1 %v6741_v4  ;;  %v6747_v45 = vld [vmem:[%s9097_s3 + $0x220] ss:$16 sps:$4 sm:$0xff]  }
 0x252   :  { %3247 = vmatprep.mubr.bf16.mxu0 %v6742_v9  ;;  %4353 = vmatprep.mubr.bf16.mxu1 %v6744_v57  ;;  %v6748_v57 = vld [vmem:[%s9096_s2 + $0x244] ss:$16 sps:$4 sm:$0xff]  }
 0x254   :  { %v8275_v22 = vpop.f32.mrb[60].mxu0  ;;  %v8277_v18 = vpop.f32.mrb[60].mxu1 }
 0x255   :  { %9170 = vst [vmem:[#allocation18_spill] sm:$0xff] %v8275_v22  ;;  %9171 = vst [vmem:[#allocation19_spill] sm:$0xff] %v8277_v18  ;;  %v1255_v25 = vpop.f32.mrb[61].mxu0  ;;  %v2361_v10 = vpop.f32.mrb[61].mxu1 }
 0x256   :  { %v8287_v4 = vpop.f32.mrb[62].mxu0  ;;  %v8289_v9 = vpop.f32.mrb[62].mxu1  ;;  %v6750_v25 = vld [vmem:[%s9097_s3 + $0x244] ss:$16 sps:$4 sm:$0xff]  }
 0x257   :  { %9172 = vst [vmem:[#allocation20_spill] sm:$0xff] %v8287_v4  ;;  %9173 = vst [vmem:[#allocation21_spill] sm:$0xff] %v8289_v9  ;;  %v1258_v43 = vpop.f32.mrb[63].mxu0  ;;  %v2364_v1 = vpop.f32.mrb[63].mxu1  ;;  %v6758_v4 = vld [vmem:[%s9096_s2 + $0x260] ss:$16 sps:$4 sm:$0xff]  }
 0x259   :  { %3248 = vmatmul.mubr.bf16.gmra.mrb[168].mxu0 %v6746_v2  ;;  %4354 = vmatmul.mubr.bf16.gmra.mrb[168].mxu1 %v6747_v45  ;;  %v6753_v2 = vld [vmem:[%s9097_s3 + $0x240] ss:$16 sps:$4 sm:$0xff]  }
 0x25a   :  { %3255 = vmatprep.mubr.bf16.mxu0 %v6748_v57  ;;  %4361 = vmatprep.mubr.bf16.mxu1 %v6750_v25  ;;  %v6754_v25 = vld [vmem:[%s9096_s2 + $0x264] ss:$16 sps:$4 sm:$0xff]  }
 0x25c   :  { %v8299_v50 = vpop.f32.mrb[64].mxu0  ;;  %v8301_v53 = vpop.f32.mrb[64].mxu1 }
 0x25d   :  { %9174 = vst [vmem:[#allocation22_spill] sm:$0xff] %v8299_v50  ;;  %9175 = vst [vmem:[#allocation23_spill] sm:$0xff] %v8301_v53  ;;  %v1263_v22 = vpop.f32.mrb[65].mxu0  ;;  %v2369_v41 = vpop.f32.mrb[65].mxu1 }
 0x25e   :  { %v8311_v45 = vpop.f32.mrb[66].mxu0  ;;  %v8313_v57 = vpop.f32.mrb[66].mxu1  ;;  %v6756_v22 = vld [vmem:[%s9097_s3 + $0x264] ss:$16 sps:$4 sm:$0xff]  }
 0x25f   :  { %9176 = vst [vmem:[#allocation24_spill] sm:$0xff] %v8311_v45  ;;  %9177 = vst [vmem:[#allocation25_spill] sm:$0xff] %v8313_v57  ;;  %v1266_v43 = vpop.f32.mrb[67].mxu0  ;;  %v2372_v1 = vpop.f32.mrb[67].mxu1  ;;  %v6764_v45 = vld [vmem:[%s9096_s2 + $0x280] ss:$16 sps:$4 sm:$0xff]  }
 0x261   :  { %3256 = vmatmul.mubr.bf16.gmra.mrb[172].mxu0 %v6752_v34  ;;  %4362 = vmatmul.mubr.bf16.gmra.mrb[172].mxu1 %v6753_v2  ;;  %v6759_v34 = vld [vmem:[%s9097_s3 + $0x260] ss:$16 sps:$4 sm:$0xff]  }
 0x262   :  { %3263 = vmatprep.mubr.bf16.mxu0 %v6754_v25  ;;  %4369 = vmatprep.mubr.bf16.mxu1 %v6756_v22  ;;  %v6760_v22 = vld [vmem:[%s9096_s2 + $0x284] ss:$16 sps:$4 sm:$0xff]  }
 0x264   :  { %v8323_v18 = vpop.f32.mrb[68].mxu0  ;;  %v8325_v10 = vpop.f32.mrb[68].mxu1 }
 0x265   :  { %9178 = vst [vmem:[#allocation26_spill] sm:$0xff] %v8323_v18  ;;  %9179 = vst [vmem:[#allocation27_spill] sm:$0xff] %v8325_v10  ;;  %v1271_v50 = vpop.f32.mrb[69].mxu0  ;;  %v2377_v9 = vpop.f32.mrb[69].mxu1 }
 0x266   :  { %v8335_v2 = vpop.f32.mrb[70].mxu0  ;;  %v8337_v25 = vpop.f32.mrb[70].mxu1  ;;  %v6762_v50 = vld [vmem:[%s9097_s3 + $0x284] ss:$16 sps:$4 sm:$0xff]  }
 0x267   :  { %9180 = vst [vmem:[#allocation28_spill] sm:$0xff] %v8335_v2  ;;  %9181 = vst [vmem:[#allocation29_spill] sm:$0xff] %v8337_v25  ;;  %v1274_v43 = vpop.f32.mrb[71].mxu0  ;;  %v2380_v1 = vpop.f32.mrb[71].mxu1  ;;  %v6770_v2 = vld [vmem:[%s9096_s2 + $0x2a0] ss:$16 sps:$4 sm:$0xff]  }
 0x269   :  { %3264 = vmatmul.mubr.bf16.gmra.mrb[176].mxu0 %v6758_v4  ;;  %4370 = vmatmul.mubr.bf16.gmra.mrb[176].mxu1 %v6759_v34  ;;  %v6765_v4 = vld [vmem:[%s9097_s3 + $0x280] ss:$16 sps:$4 sm:$0xff]  }
 0x26a   :  { %3271 = vmatprep.mubr.bf16.mxu0 %v6760_v22  ;;  %4377 = vmatprep.mubr.bf16.mxu1 %v6762_v50  ;;  %v6766_v50 = vld [vmem:[%s9096_s2 + $0x2a4] ss:$16 sps:$4 sm:$0xff]  }
 0x26c   :  { %v8347_v53 = vpop.f32.mrb[72].mxu0  ;;  %v8349_v41 = vpop.f32.mrb[72].mxu1 }
 0x26d   :  { %9182 = vst [vmem:[#allocation30_spill] sm:$0xff] %v8347_v53  ;;  %9183 = vst [vmem:[#allocation31_spill] sm:$0xff] %v8349_v41  ;;  %v1279_v18 = vpop.f32.mrb[73].mxu0  ;;  %v2385_v57 = vpop.f32.mrb[73].mxu1 }
 0x26e   :  { %v8359_v34 = vpop.f32.mrb[74].mxu0  ;;  %v8361_v22 = vpop.f32.mrb[74].mxu1  ;;  %v6768_v18 = vld [vmem:[%s9097_s3 + $0x2a4] ss:$16 sps:$4 sm:$0xff]  }
 0x26f   :  { %9184 = vst [vmem:[#allocation32_spill] sm:$0xff] %v8359_v34  ;;  %9185 = vst [vmem:[#allocation33_spill] sm:$0xff] %v8361_v22  ;;  %v1282_v43 = vpop.f32.mrb[75].mxu0  ;;  %v2388_v1 = vpop.f32.mrb[75].mxu1  ;;  %v6776_v34 = vld [vmem:[%s9096_s2 + $0x2c0] ss:$16 sps:$4 sm:$0xff]  }
 0x271   :  { %3272 = vmatmul.mubr.bf16.gmra.mrb[180].mxu0 %v6764_v45  ;;  %4378 = vmatmul.mubr.bf16.gmra.mrb[180].mxu1 %v6765_v4  ;;  %v6771_v45 = vld [vmem:[%s9097_s3 + $0x2a0] ss:$16 sps:$4 sm:$0xff]  }
 0x272   :  { %3279 = vmatprep.mubr.bf16.mxu0 %v6766_v50  ;;  %4385 = vmatprep.mubr.bf16.mxu1 %v6768_v18  ;;  %v6772_v18 = vld [vmem:[%s9096_s2 + $0x2c4] ss:$16 sps:$4 sm:$0xff]  }
 0x274   :  { %v8371_v10 = vpop.f32.mrb[76].mxu0  ;;  %v8373_v9 = vpop.f32.mrb[76].mxu1 }
 0x275   :  { %9186 = vst [vmem:[#allocation34_spill] sm:$0xff] %v8371_v10  ;;  %9187 = vst [vmem:[#allocation35_spill] sm:$0xff] %v8373_v9  ;;  %v1287_v53 = vpop.f32.mrb[77].mxu0  ;;  %v2393_v25 = vpop.f32.mrb[77].mxu1  ;;  %v2533_v9 = vld [vmem:[%s9096_s2 + $0x300] sm:$0xff] }
 0x276   :  { %v8383_v4 = vpop.f32.mrb[78].mxu0  ;;  %v8385_v50 = vpop.f32.mrb[78].mxu1  ;;  %v6774_v53 = vld [vmem:[%s9097_s3 + $0x2c4] ss:$16 sps:$4 sm:$0xff]   ;;  %v5522_v59 = vcombine.low %v2533_v9, %v2533_v9 }
 0x277   :  { %9188 = vst [vmem:[#allocation36_spill] sm:$0xff] %v8383_v4  ;;  %9189 = vst [vmem:[#allocation37_spill] sm:$0xff] %v8385_v50  ;;  %v1290_v43 = vpop.f32.mrb[79].mxu0  ;;  %v2396_v1 = vpop.f32.mrb[79].mxu1  ;;  %v3639_v25 = vld [vmem:[%s9097_s3 + $0x300] sm:$0xff] }
 0x278   :  { %v5647_v44 = vcombine.low %v3639_v25, %v3639_v25 }
 0x279   :  { %3280 = vmatmul.mubr.bf16.gmra.mrb[184].mxu0 %v6770_v2  ;;  %4386 = vmatmul.mubr.bf16.gmra.mrb[184].mxu1 %v6771_v45  ;;  %v6777_v2 = vld [vmem:[%s9097_s3 + $0x2c0] ss:$16 sps:$4 sm:$0xff]  }
 0x27a   :  { %3287 = vmatprep.mubr.bf16.mxu0 %v6772_v18  ;;  %4393 = vmatprep.mubr.bf16.mxu1 %v6774_v53  ;;  %v6778_v53 = vld [vmem:[%s9096_s2 + $0x2e4] ss:$16 sps:$4 sm:$0xff]  }
 0x27c   :  { %v8395_v41 = vpop.f32.mrb[80].mxu0  ;;  %v8397_v57 = vpop.f32.mrb[80].mxu1 }
 0x27d   :  { %9190 = vst [vmem:[#allocation38_spill] sm:$0xff] %v8395_v41  ;;  %9191 = vst [vmem:[#allocation39_spill] sm:$0xff] %v8397_v57  ;;  %v1295_v10 = vpop.f32.mrb[81].mxu0  ;;  %v2401_v22 = vpop.f32.mrb[81].mxu1 }
 0x27e   :  { %v8407_v45 = vpop.f32.mrb[82].mxu0  ;;  %v8409_v18 = vpop.f32.mrb[82].mxu1  ;;  %v6780_v10 = vld [vmem:[%s9097_s3 + $0x2e4] ss:$16 sps:$4 sm:$0xff]  }
 0x27f   :  { %9192 = vst [vmem:[#allocation40_spill] sm:$0xff] %v8407_v45  ;;  %9193 = vst [vmem:[#allocation41_spill] sm:$0xff] %v8409_v18  ;;  %v1298_v43 = vpop.f32.mrb[83].mxu0  ;;  %v2404_v1 = vpop.f32.mrb[83].mxu1  ;;  %v5523_v18 = vcombine.high %v2533_v9, %v2533_v9  ;;  %v5648_v45 = vcombine.high %v3639_v25, %v3639_v25 }
 0x281   :  { %3288 = vmatmul.mubr.bf16.gmra.mrb[188].mxu0 %v6776_v34  ;;  %4394 = vmatmul.mubr.bf16.gmra.mrb[188].mxu1 %v6777_v2  ;;  %v6782_v2 = vld [vmem:[%s9096_s2 + $0x2e0] ss:$16 sps:$4 sm:$0xff]  }
 0x282   :  { %3295 = vmatprep.mubr.bf16.mxu0 %v6778_v53  ;;  %4401 = vmatprep.mubr.bf16.mxu1 %v6780_v10  ;;  %v6783_v53 = vld [vmem:[%s9097_s3 + $0x2e0] ss:$16 sps:$4 sm:$0xff]  }
 0x284   :  { %v8425_v57 = vpop.f32.mrb[84].mxu0  ;;  %v8427_v41 = vpop.f32.mrb[84].mxu1 }
 0x285   :  { %9194 = vst [vmem:[#allocation42_spill] sm:$0xff] %v8425_v57  ;;  %9195 = vst [vmem:[#allocation43_spill] sm:$0xff] %v8427_v41  ;;  %v1303_v1 = vpop.f32.mrb[85].mxu0  ;;  %v2409_v34 = vpop.f32.mrb[85].mxu1 }
 0x286   :  { %v8437_v10 = vpop.f32.mrb[86].mxu0  ;;  %v8439_v22 = vpop.f32.mrb[86].mxu1 }
 0x287   :  { %9196 = vst [vmem:[#allocation44_spill] sm:$0xff] %v8437_v10  ;;  %9197 = vst [vmem:[#allocation45_spill] sm:$0xff] %v8439_v22  ;;  %v1306_v43 = vpop.f32.mrb[87].mxu0  ;;  %v2412_v1 = vpop.f32.mrb[87].mxu1 }
 0x289   :  { %3296 = vmatmul.mubr.bf16.gmra.mrb[192].mxu0 %v6782_v2  ;;  %4402 = vmatmul.mubr.bf16.gmra.mrb[192].mxu1 %v6783_v53 }
 0x28a   :  { %3303 = vmatprep.mubr.bf16.mxu0 %v5523_v18  ;;  %4409 = vmatprep.mubr.bf16.mxu1 %v5648_v45  ;;  %v6790_v18 = vld [vmem:[%s9096_s2 + $0xc] ss:$16 sps:$4 sm:$0xff]  }
 0x28b   :  { %v6793_v45 = vld [vmem:[%s9097_s3 + $0xc] ss:$16 sps:$4 sm:$0xff]  }
 0x28c   :  { %v8443_v34 = vpop.f32.mrb[88].mxu0  ;;  %v8445_v41 = vpop.f32.mrb[88].mxu1 }
 0x28d   :  { %9198 = vst [vmem:[#allocation46_spill] sm:$0xff] %v8443_v34  ;;  %9199 = vst [vmem:[#allocation47_spill] sm:$0xff] %v8445_v41  ;;  %v1311_v4 = vpop.f32.mrb[89].mxu0  ;;  %v2417_v32 = vpop.f32.mrb[89].mxu1 }
 0x28e   :  { %v8449_v37 = vpop.f32.mrb[90].mxu0  ;;  %v8451_v50 = vpop.f32.mrb[90].mxu1 }
 0x28f   :  { %9200 = vst [vmem:[#allocation48_spill] sm:$0xff] %v8449_v37  ;;  %9201 = vst [vmem:[#allocation49_spill] sm:$0xff] %v8451_v50  ;;  %v1314_v2 = vpop.f32.mrb[91].mxu0  ;;  %v2420_v4 = vpop.f32.mrb[91].mxu1 }
 0x290   :  { %v6788_v2 = vld [vmem:[%s9096_s2 + $0x8] ss:$16 sps:$4 sm:$0xff]   ;;  %v6796_v4 = vld [vmem:[%s9097_s3 + $0x2c] ss:$16 sps:$4 sm:$0xff]  }
 0x291   :  { %3304 = vmatmul.mubr.bf16.gmra.mrb[196].mxu0 %v5522_v59  ;;  %4410 = vmatmul.mubr.bf16.gmra.mrb[196].mxu1 %v5647_v44  ;;  %v6791_v44 = vld [vmem:[%s9097_s3 + $0x8] ss:$16 sps:$4 sm:$0xff]  }
 0x292   :  { %5526 = vmatprep.mubr.msk.bf16.mxu0 %vm791_vm0, %v6790_v18  ;;  %5651 = vmatprep.mubr.msk.bf16.mxu1 %vm791_vm0, %v6793_v45  ;;  %v6794_v45 = vld [vmem:[%s9096_s2 + $0x2c] ss:$16 sps:$4 sm:$0xff]  }
 0x294   :  { %v8463_v32 = vpop.f32.mrb[92].mxu0  ;;  %v8465_v9 = vpop.f32.mrb[92].mxu1 }
 0x295   :  { %9202 = vst [vmem:[#allocation50_spill] sm:$0xff] %v8463_v32  ;;  %9203 = vst [vmem:[#allocation51_spill] sm:$0xff] %v8465_v9  ;;  %v1319_v53 = vpop.f32.mrb[93].mxu0  ;;  %v2425_v1 = vpop.f32.mrb[93].mxu1  ;;  %v6806_v9 = vld [vmem:[%s9096_s2 + $0x6c] ss:$16 sps:$4 sm:$0xff]  }
 0x296   :  { %v8475_v59 = vpop.f32.mrb[94].mxu0  ;;  %v8477_v18 = vpop.f32.mrb[94].mxu1 }
 0x297   :  { %9204 = vst [vmem:[#allocation52_spill] sm:$0xff] %v8475_v59  ;;  %9205 = vst [vmem:[#allocation53_spill] sm:$0xff] %v8477_v18  ;;  %v1322_v1 = vpop.f32.mrb[95].mxu0  ;;  %v2428_v25 = vpop.f32.mrb[95].mxu1  ;;  %v8820_v59 = vld [vmem:[%s9098_s5] ss:$0 sm:$0xff] }
 0x298   :  { %v6798_v1 = vld [vmem:[%s9096_s2 + $0x28] ss:$16 sps:$4 sm:$0xff]  }
 0x299   :  { %3344 = vmatmul.mubr.bf16.vlgmr.msra.gmra.mrb[100].mxu0 %v6788_v2  ;;  %4450 = vmatmul.mubr.bf16.vlgmr.msra.gmra.mrb[100].mxu1 %v6791_v44  ;;  %v6799_v25 = vld [vmem:[%s9097_s3 + $0x28] ss:$16 sps:$4 sm:$0xff]  }
 0x29a   :  { %5527 = vmatprep.mubr.msk.bf16.mxu0 %vm791_vm0, %v6794_v45  ;;  %5652 = vmatprep.mubr.msk.bf16.mxu1 %vm791_vm0, %v6796_v4  ;;  %v6800_v45 = vld [vmem:[%s9096_s2 + $0x4c] ss:$16 sps:$4 sm:$0xff]  }
 0x29b   :  { %v6802_v4 = vld [vmem:[%s9097_s3 + $0x4c] ss:$16 sps:$4 sm:$0xff]  }
 0x29c   :  { %v8489_v43 = vpop.f32.mrb[96].mxu0  ;;  %v8491_v57 = vpop.f32.mrb[96].mxu1 }
 0x29d   :  { %9206 = vst [vmem:[#allocation54_spill] sm:$0xff] %v8489_v43  ;;  %9207 = vst [vmem:[#allocation55_spill] sm:$0xff] %v8491_v57  ;;  %v1327_v32 = vpop.f32.mrb[97].mxu0  ;;  %v2433_v50 = vpop.f32.mrb[97].mxu1 }
 0x29e   :  { %v1328_v2 = vpop.f32.mrb[98].mxu0  ;;  %v2434_v44 = vpop.f32.mrb[98].mxu1 }
 0x29f   :  { %v1329_v32 = vpop.f32.mrb[99].mxu0  ;;  %v2435_v50 = vpop.f32.mrb[99].mxu1  ;;  %v6804_v2 = vld [vmem:[%s9096_s2 + $0x48] ss:$16 sps:$4 sm:$0xff]  }
 0x2a0   :  { %v6805_v44 = vld [vmem:[%s9097_s3 + $0x48] ss:$16 sps:$4 sm:$0xff]   ;;  %v6814_v32 = vld [vmem:[%s9097_s3 + $0x8c] ss:$16 sps:$4 sm:$0xff]  }
 0x2a1   :  { %3352 = vmatmul.mubr.bf16.gmra.mrb[104].mxu0 %v6798_v1  ;;  %4458 = vmatmul.mubr.bf16.gmra.mrb[104].mxu1 %v6799_v25  ;;  %v6808_v1 = vld [vmem:[%s9097_s3 + $0x6c] ss:$16 sps:$4 sm:$0xff]   ;;  %v6810_v25 = vld [vmem:[%s9096_s2 + $0x68] ss:$16 sps:$4 sm:$0xff]  }
 0x2a2   :  { %5528 = vmatprep.mubr.msk.bf16.mxu0 %vm791_vm0, %v6800_v45  ;;  %5653 = vmatprep.mubr.msk.bf16.mxu1 %vm791_vm0, %v6802_v4  ;;  %v6811_v45 = vld [vmem:[%s9097_s3 + $0x68] ss:$16 sps:$4 sm:$0xff]   ;;  %v6812_v4 = vld [vmem:[%s9096_s2 + $0x8c] ss:$16 sps:$4 sm:$0xff]  }
 0x2a3   :  { %v6817_v50 = vld [vmem:[%s9097_s3 + $0x88] ss:$16 sps:$4 sm:$0xff]  }
 0x2a9   :  { %3360 = vmatmul.mubr.bf16.gmra.mrb[108].mxu0 %v6804_v2  ;;  %4466 = vmatmul.mubr.bf16.gmra.mrb[108].mxu1 %v6805_v44  ;;  %v6818_v2 = vld [vmem:[%s9096_s2 + $0xac] ss:$16 sps:$4 sm:$0xff]  }
 0x2aa   :  { %5529 = vmatprep.mubr.msk.bf16.mxu0 %vm791_vm0, %v6806_v9  ;;  %5654 = vmatprep.mubr.msk.bf16.mxu1 %vm791_vm0, %v6808_v1  ;;  %v6816_v9 = vld [vmem:[%s9096_s2 + $0x88] ss:$16 sps:$4 sm:$0xff]   ;;  %v6820_v44 = vld [vmem:[%s9097_s3 + $0xac] ss:$16 sps:$4 sm:$0xff]  }
 0x2ab   :  { %v6822_v1 = vld [vmem:[%s9096_s2 + $0xa8] ss:$16 sps:$4 sm:$0xff]  }
 0x2b1   :  { %3368 = vmatmul.mubr.bf16.gmra.mrb[112].mxu0 %v6810_v25  ;;  %4474 = vmatmul.mubr.bf16.gmra.mrb[112].mxu1 %v6811_v45  ;;  %v6823_v25 = vld [vmem:[%s9097_s3 + $0xa8] ss:$16 sps:$4 sm:$0xff]   ;;  %v6824_v45 = vld [vmem:[%s9096_s2 + $0xcc] ss:$16 sps:$4 sm:$0xff]  }
 0x2b2   :  { %5530 = vmatprep.mubr.msk.bf16.mxu0 %vm791_vm0, %v6812_v4  ;;  %5655 = vmatprep.mubr.msk.bf16.mxu1 %vm791_vm0, %v6814_v32  ;;  %v6826_v4 = vld [vmem:[%s9097_s3 + $0xcc] ss:$16 sps:$4 sm:$0xff]   ;;  %v6828_v32 = vld [vmem:[%s9096_s2 + $0xc8] ss:$16 sps:$4 sm:$0xff]  }
 0x2b9   :  { %3376 = vmatmul.mubr.bf16.gmra.mrb[116].mxu0 %v6816_v9  ;;  %4482 = vmatmul.mubr.bf16.gmra.mrb[116].mxu1 %v6817_v50  ;;  %v6829_v9 = vld [vmem:[%s9097_s3 + $0xc8] ss:$16 sps:$4 sm:$0xff]   ;;  %v6830_v50 = vld [vmem:[%s9096_s2 + $0xec] ss:$16 sps:$4 sm:$0xff]  }
 0x2ba   :  { %5531 = vmatprep.mubr.msk.bf16.mxu0 %vm791_vm0, %v6818_v2  ;;  %5656 = vmatprep.mubr.msk.bf16.mxu1 %vm791_vm0, %v6820_v44  ;;  %v6832_v2 = vld [vmem:[%s9097_s3 + $0xec] ss:$16 sps:$4 sm:$0xff]   ;;  %v6834_v44 = vld [vmem:[%s9096_s2 + $0xe8] ss:$16 sps:$4 sm:$0xff]  }
 0x2c1   :  { %3384 = vmatmul.mubr.bf16.gmra.mrb[120].mxu0 %v6822_v1  ;;  %4490 = vmatmul.mubr.bf16.gmra.mrb[120].mxu1 %v6823_v25  ;;  %v6835_v1 = vld [vmem:[%s9097_s3 + $0xe8] ss:$16 sps:$4 sm:$0xff]   ;;  %v6836_v25 = vld [vmem:[%s9096_s2 + $0x10c] ss:$16 sps:$4 sm:$0xff]  }
 0x2c2   :  { %5532 = vmatprep.mubr.msk.bf16.mxu0 %vm791_vm0, %v6824_v45  ;;  %5657 = vmatprep.mubr.msk.bf16.mxu1 %vm791_vm0, %v6826_v4  ;;  %v6838_v45 = vld [vmem:[%s9097_s3 + $0x10c] ss:$16 sps:$4 sm:$0xff]   ;;  %v6840_v4 = vld [vmem:[%s9096_s2 + $0x108] ss:$16 sps:$4 sm:$0xff]  }
 0x2c9   :  { %3392 = vmatmul.mubr.bf16.gmra.mrb[124].mxu0 %v6828_v32  ;;  %4498 = vmatmul.mubr.bf16.gmra.mrb[124].mxu1 %v6829_v9  ;;  %v6841_v32 = vld [vmem:[%s9097_s3 + $0x108] ss:$16 sps:$4 sm:$0xff]   ;;  %v6842_v9 = vld [vmem:[%s9096_s2 + $0x12c] ss:$16 sps:$4 sm:$0xff]  }
 0x2ca   :  { %5533 = vmatprep.mubr.msk.bf16.mxu0 %vm791_vm0, %v6830_v50  ;;  %5658 = vmatprep.mubr.msk.bf16.mxu1 %vm791_vm0, %v6832_v2  ;;  %v6844_v50 = vld [vmem:[%s9097_s3 + $0x12c] ss:$16 sps:$4 sm:$0xff]   ;;  %v6846_v2 = vld [vmem:[%s9096_s2 + $0x128] ss:$16 sps:$4 sm:$0xff]  }
 0x2d1   :  { %3400 = vmatmul.mubr.bf16.gmra.mrb[128].mxu0 %v6834_v44  ;;  %4506 = vmatmul.mubr.bf16.gmra.mrb[128].mxu1 %v6835_v1  ;;  %v6847_v44 = vld [vmem:[%s9097_s3 + $0x128] ss:$16 sps:$4 sm:$0xff]   ;;  %v6848_v1 = vld [vmem:[%s9096_s2 + $0x14c] ss:$16 sps:$4 sm:$0xff]  }
 0x2d2   :  { %5534 = vmatprep.mubr.msk.bf16.mxu0 %vm791_vm0, %v6836_v25  ;;  %5659 = vmatprep.mubr.msk.bf16.mxu1 %vm791_vm0, %v6838_v45  ;;  %v6850_v25 = vld [vmem:[%s9097_s3 + $0x14c] ss:$16 sps:$4 sm:$0xff]   ;;  %v6852_v45 = vld [vmem:[%s9096_s2 + $0x148] ss:$16 sps:$4 sm:$0xff]  }
 0x2d9   :  { %3408 = vmatmul.mubr.bf16.gmra.mrb[132].mxu0 %v6840_v4  ;;  %4514 = vmatmul.mubr.bf16.gmra.mrb[132].mxu1 %v6841_v32  ;;  %v6853_v4 = vld [vmem:[%s9097_s3 + $0x148] ss:$16 sps:$4 sm:$0xff]   ;;  %v6854_v32 = vld [vmem:[%s9096_s2 + $0x16c] ss:$16 sps:$4 sm:$0xff]  }
 0x2da   :  { %5535 = vmatprep.mubr.msk.bf16.mxu0 %vm791_vm0, %v6842_v9  ;;  %5660 = vmatprep.mubr.msk.bf16.mxu1 %vm791_vm0, %v6844_v50  ;;  %v6856_v9 = vld [vmem:[%s9097_s3 + $0x16c] ss:$16 sps:$4 sm:$0xff]   ;;  %v6858_v50 = vld [vmem:[%s9096_s2 + $0x168] ss:$16 sps:$4 sm:$0xff]  }
 0x2e1   :  { %3416 = vmatmul.mubr.bf16.gmra.mrb[136].mxu0 %v6846_v2  ;;  %4522 = vmatmul.mubr.bf16.gmra.mrb[136].mxu1 %v6847_v44  ;;  %v6859_v2 = vld [vmem:[%s9097_s3 + $0x168] ss:$16 sps:$4 sm:$0xff]   ;;  %v6860_v44 = vld [vmem:[%s9096_s2 + $0x18c] ss:$16 sps:$4 sm:$0xff]  }
 0x2e2   :  { %5536 = vmatprep.mubr.msk.bf16.mxu0 %vm791_vm0, %v6848_v1  ;;  %5661 = vmatprep.mubr.msk.bf16.mxu1 %vm791_vm0, %v6850_v25  ;;  %v6862_v1 = vld [vmem:[%s9097_s3 + $0x18c] ss:$16 sps:$4 sm:$0xff]   ;;  %v6864_v25 = vld [vmem:[%s9096_s2 + $0x188] ss:$16 sps:$4 sm:$0xff]  }
 0x2e9   :  { %3424 = vmatmul.mubr.bf16.gmra.mrb[140].mxu0 %v6852_v45  ;;  %4530 = vmatmul.mubr.bf16.gmra.mrb[140].mxu1 %v6853_v4  ;;  %v6865_v45 = vld [vmem:[%s9097_s3 + $0x188] ss:$16 sps:$4 sm:$0xff]   ;;  %v6866_v4 = vld [vmem:[%s9096_s2 + $0x1ac] ss:$16 sps:$4 sm:$0xff]  }
 0x2ea   :  { %5537 = vmatprep.mubr.msk.bf16.mxu0 %vm791_vm0, %v6854_v32  ;;  %5662 = vmatprep.mubr.msk.bf16.mxu1 %vm791_vm0, %v6856_v9  ;;  %v6868_v32 = vld [vmem:[%s9097_s3 + $0x1ac] ss:$16 sps:$4 sm:$0xff]   ;;  %v6870_v9 = vld [vmem:[%s9096_s2 + $0x1a8] ss:$16 sps:$4 sm:$0xff]  }
 0x2f1   :  { %3432 = vmatmul.mubr.bf16.gmra.mrb[144].mxu0 %v6858_v50  ;;  %4538 = vmatmul.mubr.bf16.gmra.mrb[144].mxu1 %v6859_v2  ;;  %v6871_v50 = vld [vmem:[%s9097_s3 + $0x1a8] ss:$16 sps:$4 sm:$0xff]   ;;  %v6872_v2 = vld [vmem:[%s9096_s2 + $0x1cc] ss:$16 sps:$4 sm:$0xff]  }
 0x2f2   :  { %5538 = vmatprep.mubr.msk.bf16.mxu0 %vm791_vm0, %v6860_v44  ;;  %5663 = vmatprep.mubr.msk.bf16.mxu1 %vm791_vm0, %v6862_v1  ;;  %v6874_v44 = vld [vmem:[%s9097_s3 + $0x1cc] ss:$16 sps:$4 sm:$0xff]   ;;  %v6876_v1 = vld [vmem:[%s9096_s2 + $0x1c8] ss:$16 sps:$4 sm:$0xff]  }
 0x2f9   :  { %3440 = vmatmul.mubr.bf16.gmra.mrb[148].mxu0 %v6864_v25  ;;  %4546 = vmatmul.mubr.bf16.gmra.mrb[148].mxu1 %v6865_v45  ;;  %v6877_v25 = vld [vmem:[%s9097_s3 + $0x1c8] ss:$16 sps:$4 sm:$0xff]   ;;  %v6878_v45 = vld [vmem:[%s9096_s2 + $0x1ec] ss:$16 sps:$4 sm:$0xff]  }
 0x2fa   :  { %5539 = vmatprep.mubr.msk.bf16.mxu0 %vm791_vm0, %v6866_v4  ;;  %5664 = vmatprep.mubr.msk.bf16.mxu1 %vm791_vm0, %v6868_v32  ;;  %v6880_v4 = vld [vmem:[%s9097_s3 + $0x1ec] ss:$16 sps:$4 sm:$0xff]   ;;  %v6882_v32 = vld [vmem:[%s9096_s2 + $0x1e8] ss:$16 sps:$4 sm:$0xff]  }
 0x301   :  { %3448 = vmatmul.mubr.bf16.gmra.mrb[152].mxu0 %v6870_v9  ;;  %4554 = vmatmul.mubr.bf16.gmra.mrb[152].mxu1 %v6871_v50  ;;  %v6883_v9 = vld [vmem:[%s9097_s3 + $0x1e8] ss:$16 sps:$4 sm:$0xff]   ;;  %v6884_v50 = vld [vmem:[%s9096_s2 + $0x20c] ss:$16 sps:$4 sm:$0xff]  }
 0x302   :  { %5540 = vmatprep.mubr.msk.bf16.mxu0 %vm791_vm0, %v6872_v2  ;;  %5665 = vmatprep.mubr.msk.bf16.mxu1 %vm791_vm0, %v6874_v44  ;;  %v6886_v2 = vld [vmem:[%s9097_s3 + $0x20c] ss:$16 sps:$4 sm:$0xff]   ;;  %v6888_v44 = vld [vmem:[%s9096_s2 + $0x208] ss:$16 sps:$4 sm:$0xff]  }
 0x309   :  { %3456 = vmatmul.mubr.bf16.gmra.mrb[156].mxu0 %v6876_v1  ;;  %4562 = vmatmul.mubr.bf16.gmra.mrb[156].mxu1 %v6877_v25  ;;  %v6889_v1 = vld [vmem:[%s9097_s3 + $0x208] ss:$16 sps:$4 sm:$0xff]   ;;  %v6890_v25 = vld [vmem:[%s9096_s2 + $0x22c] ss:$16 sps:$4 sm:$0xff]  }
 0x30a   :  { %5541 = vmatprep.mubr.msk.bf16.mxu0 %vm791_vm0, %v6878_v45  ;;  %5666 = vmatprep.mubr.msk.bf16.mxu1 %vm791_vm0, %v6880_v4  ;;  %v6892_v45 = vld [vmem:[%s9097_s3 + $0x22c] ss:$16 sps:$4 sm:$0xff]   ;;  %v6894_v4 = vld [vmem:[%s9096_s2 + $0x228] ss:$16 sps:$4 sm:$0xff]  }
 0x311   :  { %3464 = vmatmul.mubr.bf16.gmra.mrb[160].mxu0 %v6882_v32  ;;  %4570 = vmatmul.mubr.bf16.gmra.mrb[160].mxu1 %v6883_v9  ;;  %v6895_v32 = vld [vmem:[%s9097_s3 + $0x228] ss:$16 sps:$4 sm:$0xff]   ;;  %v6896_v9 = vld [vmem:[%s9096_s2 + $0x24c] ss:$16 sps:$4 sm:$0xff]  }
 0x312   :  { %5542 = vmatprep.mubr.msk.bf16.mxu0 %vm791_vm0, %v6884_v50  ;;  %5667 = vmatprep.mubr.msk.bf16.mxu1 %vm791_vm0, %v6886_v2  ;;  %v6898_v50 = vld [vmem:[%s9097_s3 + $0x24c] ss:$16 sps:$4 sm:$0xff]   ;;  %v6900_v2 = vld [vmem:[%s9096_s2 + $0x248] ss:$16 sps:$4 sm:$0xff]  }
 0x319   :  { %3472 = vmatmul.mubr.bf16.gmra.mrb[164].mxu0 %v6888_v44  ;;  %4578 = vmatmul.mubr.bf16.gmra.mrb[164].mxu1 %v6889_v1  ;;  %v6901_v44 = vld [vmem:[%s9097_s3 + $0x248] ss:$16 sps:$4 sm:$0xff]   ;;  %v6902_v1 = vld [vmem:[%s9096_s2 + $0x26c] ss:$16 sps:$4 sm:$0xff]  }
 0x31a   :  { %5543 = vmatprep.mubr.msk.bf16.mxu0 %vm791_vm0, %v6890_v25  ;;  %5668 = vmatprep.mubr.msk.bf16.mxu1 %vm791_vm0, %v6892_v45  ;;  %v6904_v25 = vld [vmem:[%s9097_s3 + $0x26c] ss:$16 sps:$4 sm:$0xff]   ;;  %v6906_v45 = vld [vmem:[%s9096_s2 + $0x268] ss:$16 sps:$4 sm:$0xff]  }
 0x321   :  { %3480 = vmatmul.mubr.bf16.gmra.mrb[168].mxu0 %v6894_v4  ;;  %4586 = vmatmul.mubr.bf16.gmra.mrb[168].mxu1 %v6895_v32  ;;  %v6907_v4 = vld [vmem:[%s9097_s3 + $0x268] ss:$16 sps:$4 sm:$0xff]   ;;  %v6908_v32 = vld [vmem:[%s9096_s2 + $0x28c] ss:$16 sps:$4 sm:$0xff]  }
 0x322   :  { %5544 = vmatprep.mubr.msk.bf16.mxu0 %vm791_vm0, %v6896_v9  ;;  %5669 = vmatprep.mubr.msk.bf16.mxu1 %vm791_vm0, %v6898_v50  ;;  %v6910_v9 = vld [vmem:[%s9097_s3 + $0x28c] ss:$16 sps:$4 sm:$0xff]   ;;  %v6912_v50 = vld [vmem:[%s9096_s2 + $0x288] ss:$16 sps:$4 sm:$0xff]  }
 0x329   :  { %3488 = vmatmul.mubr.bf16.gmra.mrb[172].mxu0 %v6900_v2  ;;  %4594 = vmatmul.mubr.bf16.gmra.mrb[172].mxu1 %v6901_v44  ;;  %v6913_v2 = vld [vmem:[%s9097_s3 + $0x288] ss:$16 sps:$4 sm:$0xff]   ;;  %v6914_v44 = vld [vmem:[%s9096_s2 + $0x2ac] ss:$16 sps:$4 sm:$0xff]  }
 0x32a   :  { %5545 = vmatprep.mubr.msk.bf16.mxu0 %vm791_vm0, %v6902_v1  ;;  %5670 = vmatprep.mubr.msk.bf16.mxu1 %vm791_vm0, %v6904_v25  ;;  %v6916_v1 = vld [vmem:[%s9097_s3 + $0x2ac] ss:$16 sps:$4 sm:$0xff]   ;;  %v6918_v25 = vld [vmem:[%s9096_s2 + $0x2a8] ss:$16 sps:$4 sm:$0xff]  }
 0x331   :  { %3496 = vmatmul.mubr.bf16.gmra.mrb[176].mxu0 %v6906_v45  ;;  %4602 = vmatmul.mubr.bf16.gmra.mrb[176].mxu1 %v6907_v4  ;;  %v6919_v45 = vld [vmem:[%s9097_s3 + $0x2a8] ss:$16 sps:$4 sm:$0xff]   ;;  %v6920_v4 = vld [vmem:[%s9096_s2 + $0x2cc] ss:$16 sps:$4 sm:$0xff]  }
 0x332   :  { %5546 = vmatprep.mubr.msk.bf16.mxu0 %vm791_vm0, %v6908_v32  ;;  %5671 = vmatprep.mubr.msk.bf16.mxu1 %vm791_vm0, %v6910_v9  ;;  %v6922_v32 = vld [vmem:[%s9097_s3 + $0x2cc] ss:$16 sps:$4 sm:$0xff]   ;;  %v6924_v9 = vld [vmem:[%s9096_s2 + $0x2c8] ss:$16 sps:$4 sm:$0xff]  }
 0x339   :  { %3504 = vmatmul.mubr.bf16.gmra.mrb[180].mxu0 %v6912_v50  ;;  %4610 = vmatmul.mubr.bf16.gmra.mrb[180].mxu1 %v6913_v2  ;;  %v6925_v50 = vld [vmem:[%s9097_s3 + $0x2c8] ss:$16 sps:$4 sm:$0xff]   ;;  %v6926_v2 = vld [vmem:[%s9096_s2 + $0x2ec] ss:$16 sps:$4 sm:$0xff]  }
 0x33a   :  { %5547 = vmatprep.mubr.msk.bf16.mxu0 %vm791_vm0, %v6914_v44  ;;  %5672 = vmatprep.mubr.msk.bf16.mxu1 %vm791_vm0, %v6916_v1  ;;  %v6928_v44 = vld [vmem:[%s9097_s3 + $0x2ec] ss:$16 sps:$4 sm:$0xff]  }
 0x33b   :  { %v2534_v1 = vld [vmem:[%s9096_s2 + $0x308] sm:$0xff] }
 0x341   :  { %3512 = vmatmul.mubr.bf16.gmra.mrb[184].mxu0 %v6918_v25  ;;  %4618 = vmatmul.mubr.bf16.gmra.mrb[184].mxu1 %v6919_v45  ;;  %v3640_v25 = vld [vmem:[%s9097_s3 + $0x308] sm:$0xff] }
 0x342   :  { %5548 = vmatprep.mubr.msk.bf16.mxu0 %vm791_vm0, %v6920_v4  ;;  %5673 = vmatprep.mubr.msk.bf16.mxu1 %vm791_vm0, %v6922_v32  ;;  %v6930_v45 = vld [vmem:[%s9096_s2 + $0x2e8] ss:$16 sps:$4 sm:$0xff]   ;;  %v5525_v32 = vcombine.high %v2534_v1, %v2534_v1 }
 0x343   :  { %v6931_v4 = vld [vmem:[%s9097_s3 + $0x2e8] ss:$16 sps:$4 sm:$0xff]  }
 0x349   :  { %3520 = vmatmul.mubr.bf16.gmra.mrb[188].mxu0 %v6924_v9  ;;  %4626 = vmatmul.mubr.bf16.gmra.mrb[188].mxu1 %v6925_v50  ;;  %v5650_v9 = vcombine.high %v3640_v25, %v3640_v25  ;;  %v5524_v50 = vcombine.low %v2534_v1, %v2534_v1 }
 0x34a   :  { %5549 = vmatprep.mubr.msk.bf16.mxu0 %vm791_vm0, %v6926_v2  ;;  %5674 = vmatprep.mubr.msk.bf16.mxu1 %vm791_vm0, %v6928_v44  ;;  %v5649_v2 = vcombine.low %v3640_v25, %v3640_v25 }
 0x351   :  { %3528 = vmatmul.mubr.bf16.gmra.mrb[192].mxu0 %v6930_v45  ;;  %4634 = vmatmul.mubr.bf16.gmra.mrb[192].mxu1 %v6931_v4 }
 0x352   :  { %5550 = vmatprep.mubr.msk.bf16.mxu0 %vm791_vm0, %v5525_v32  ;;  %5675 = vmatprep.mubr.msk.bf16.mxu1 %vm791_vm0, %v5650_v9  ;;  %v9208_v32 = vmax.f32 %v7885_v7, %v7887_v8 }
 0x359   :  { %3536 = vmatmul.mubr.bf16.gmra.mrb[196].mxu0 %v5524_v50  ;;  %4642 = vmatmul.mubr.bf16.gmra.mrb[196].mxu1 %v5649_v2 }
 0x36c   :  { %v3345_v44 = vpop.f32.mrb[100].mxu0  ;;  %v4451_v53 = vpop.f32.mrb[100].mxu1 }
 0x36d   :  { %v4698_v57 = vmax.f32 %v3345_v44, %v4451_v53  ;;  %v3347_v43 = vpop.f32.mrb[101].mxu0  ;;  %v4453_v18 = vpop.f32.mrb[101].mxu1 }
 0x36e   :  { %v3348_v45 = vpop.f32.mrb[102].mxu0  ;;  %v4454_v4 = vpop.f32.mrb[102].mxu1  ;;  %v9209_v43 = vmax.f32 %v7899_v14, %v7901_v15 }
 0x36f   :  { %v4747_v9 = vmax.f32 %v9208_v32, %v4698_v57  ;;  %v4699_v1 = vmax.f32 %v3348_v45, %v4454_v4  ;;  %v3350_v25 = vpop.f32.mrb[103].mxu0  ;;  %v4456_v50 = vpop.f32.mrb[103].mxu1  ;;  %v9210_v45 = vmax.f32 %v7919_v23, %v7921_v24 }
 0x371   :  { %v4803_v2 = vadd.f32 %v8820_v59, %v4747_v9  ;;  %v4748_v18 = vmax.f32 %v9209_v43, %v4699_v1 }
 0x373   :  { %v4804_v53 = vadd.f32 %v8820_v59, %v4748_v18  ;;  %v4852_v41 = vmax.f32 %v4803_v2, 0.0  ;;  %v9212_v18 = vmax.f32 %v7953_v39, %v7955_v40 }
 0x374   :  { %v3353_v44 = vpop.f32.mrb[104].mxu0  ;;  %v4459_v37 = vpop.f32.mrb[104].mxu1 }
 0x375   :  { %v4853_v34 = vmax.f32 %v4804_v53, 0.0  ;;  %v4700_v22 = vmax.f32 %v3353_v44, %v4459_v37  ;;  %v3355_v10 = vpop.f32.mrb[105].mxu0  ;;  %v4461_v20 = vpop.f32.mrb[105].mxu1  ;;  %v9211_v37 = vmax.f32 %v7933_v30, %v7935_v31 }
 0x376   :  { %v3356_v7 = vpop.f32.mrb[106].mxu0  ;;  %v4462_v8 = vpop.f32.mrb[106].mxu1 }
 0x377   :  { %v5778_v57 = vpack.c.bf16 %v4853_v34, %v4852_v41  ;;  %v4749_v4 = vmax.f32 %v9210_v45, %v4700_v22  ;;  %v4701_v32 = vmax.f32 %v3356_v7, %v4462_v8  ;;  %v3358_v9 = vpop.f32.mrb[107].mxu0  ;;  %v4464_v14 = vpop.f32.mrb[107].mxu1  ;;  %v9213_v8 = vmax.f32 %v7967_v46, %v7969_v47 }
 0x379   :  { %5779 = vst [vmem:[%s9099_s6] sm:$0xff] %v5778_v57   ;;  %v4805_v15 = vadd.f32 %v8820_v59, %v4749_v4  ;;  %v4750_v20 = vmax.f32 %v9211_v37, %v4701_v32 }
 0x37b   :  { %v4806_v10 = vadd.f32 %v8820_v59, %v4750_v20  ;;  %v4854_v1 = vmax.f32 %v4805_v15, 0.0 }
 0x37c   :  { %v3361_v41 = vpop.f32.mrb[108].mxu0  ;;  %v4467_v34 = vpop.f32.mrb[108].mxu1 }
 0x37d   :  { %v4855_v23 = vmax.f32 %v4806_v10, 0.0  ;;  %v4702_v24 = vmax.f32 %v3361_v41, %v4467_v34  ;;  %v3363_v22 = vpop.f32.mrb[109].mxu0  ;;  %v4469_v25 = vpop.f32.mrb[109].mxu1  ;;  %v9214_v41 = vmax.f32 %v7987_v55, %v7989_v56 }
 0x37e   :  { %v3364_v50 = vpop.f32.mrb[110].mxu0  ;;  %v4470_v2 = vpop.f32.mrb[110].mxu1 }
 0x37f   :  { %v5783_v43 = vpack.c.bf16 %v4855_v23, %v4854_v1  ;;  %v4751_v53 = vmax.f32 %v9212_v18, %v4702_v24  ;;  %v4703_v44 = vmax.f32 %v3364_v50, %v4470_v2  ;;  %v3366_v7 = vpop.f32.mrb[111].mxu0  ;;  %v4472_v30 = vpop.f32.mrb[111].mxu1  ;;  %v9215_v24 = vmax.f32 %v7999_v61, %v8001_v62 }
 0x381   :  { %5895 = vst [vmem:[%s9099_s6 + $0x8] sm:$0xff] %v5783_v43   ;;  %v4807_v31 = vadd.f32 %v8820_v59, %v4751_v53  ;;  %v4752_v57 = vmax.f32 %v9213_v8, %v4703_v44 }
 0x383   :  { %v4808_v45 = vadd.f32 %v8820_v59, %v4752_v57  ;;  %v4856_v9 = vmax.f32 %v4807_v31, 0.0  ;;  %v9216_v31 = vmax.f32 %v8011_v5, %v8013_v6 }
 0x384   :  { %v3369_v4 = vpop.f32.mrb[112].mxu0  ;;  %v4475_v32 = vpop.f32.mrb[112].mxu1 }
 0x385   :  { %v4857_v39 = vmax.f32 %v4808_v45, 0.0  ;;  %v4704_v40 = vmax.f32 %v3369_v4, %v4475_v32  ;;  %v3371_v14 = vpop.f32.mrb[113].mxu0  ;;  %v4477_v15 = vpop.f32.mrb[113].mxu1  ;;  %v9217_v4 = vmax.f32 %v8023_v17, %v8025_v19 }
 0x386   :  { %v3372_v37 = vpop.f32.mrb[114].mxu0  ;;  %v4478_v20 = vpop.f32.mrb[114].mxu1 }
 0x387   :  { %v5788_v10 = vpack.c.bf16 %v4857_v39, %v4856_v9  ;;  %v4753_v34 = vmax.f32 %v9214_v41, %v4704_v40  ;;  %v4705_v1 = vmax.f32 %v3372_v37, %v4478_v20  ;;  %v3374_v23 = vpop.f32.mrb[115].mxu0  ;;  %v4480_v46 = vpop.f32.mrb[115].mxu1 }
 0x389   :  { %5896 = vst [vmem:[%s9099_s6 + $0x10] sm:$0xff] %v5788_v10   ;;  %v4809_v47 = vadd.f32 %v8820_v59, %v4753_v34  ;;  %v4754_v22 = vmax.f32 %v9215_v24, %v4705_v1  ;;  %v9218_v34 = vmax.f32 %v8035_v28, %v8037_v29 }
 0x38b   :  { %v4810_v25 = vadd.f32 %v8820_v59, %v4754_v22  ;;  %v4858_v43 = vmax.f32 %v4809_v47, 0.0  ;;  %v9219_v47 = vmax.f32 %v8047_v38, %v8049_v42 }
 0x38c   :  { %v3377_v50 = vpop.f32.mrb[116].mxu0  ;;  %v4483_v2 = vpop.f32.mrb[116].mxu1 }
 0x38d   :  { %v4859_v55 = vmax.f32 %v4810_v25, 0.0  ;;  %v4706_v56 = vmax.f32 %v3377_v50, %v4483_v2  ;;  %v3379_v18 = vpop.f32.mrb[117].mxu0  ;;  %v4485_v53 = vpop.f32.mrb[117].mxu1 }
 0x38e   :  { %v3380_v44 = vpop.f32.mrb[118].mxu0  ;;  %v4486_v7 = vpop.f32.mrb[118].mxu1 }
 0x38f   :  { %v5793_v30 = vpack.c.bf16 %v4859_v55, %v4858_v43  ;;  %v4755_v8 = vmax.f32 %v9216_v31, %v4706_v56  ;;  %v4707_v57 = vmax.f32 %v3380_v44, %v4486_v7  ;;  %v3382_v45 = vpop.f32.mrb[119].mxu0  ;;  %v4488_v61 = vpop.f32.mrb[119].mxu1  ;;  %v9220_v44 = vmax.f32 %v8059_v51, %v8061_v52 }
 0x391   :  { %5897 = vst [vmem:[%s9099_s6 + $0x18] sm:$0xff] %v5793_v30   ;;  %v4811_v62 = vadd.f32 %v8820_v59, %v4755_v8  ;;  %v4756_v32 = vmax.f32 %v9217_v4, %v4707_v57  ;;  %v9221_v8 = vmax.f32 %v8071_v60, %v8073_v63 }
 0x393   :  { %v4812_v9 = vadd.f32 %v8820_v59, %v4756_v32  ;;  %v4860_v14 = vmax.f32 %v4811_v62, 0.0 }
 0x394   :  { %v3385_v39 = vpop.f32.mrb[120].mxu0  ;;  %v4491_v40 = vpop.f32.mrb[120].mxu1 }
 0x395   :  { %v4861_v5 = vmax.f32 %v4812_v9, 0.0  ;;  %v4708_v6 = vmax.f32 %v3385_v39, %v4491_v40  ;;  %v3387_v15 = vpop.f32.mrb[121].mxu0  ;;  %v4493_v37 = vpop.f32.mrb[121].mxu1 }
 0x396   :  { %v3388_v20 = vpop.f32.mrb[122].mxu0  ;;  %v4494_v10 = vpop.f32.mrb[122].mxu1 }
 0x397   :  { %v5798_v41 = vpack.c.bf16 %v4861_v5, %v4860_v14  ;;  %v4757_v1 = vmax.f32 %v9218_v34, %v4708_v6  ;;  %v4709_v23 = vmax.f32 %v3388_v20, %v4494_v10  ;;  %v3390_v46 = vpop.f32.mrb[123].mxu0  ;;  %v4496_v17 = vpop.f32.mrb[123].mxu1  ;;  %v9222_v5 = vmax.f32 %v8083_v13, %v8085_v16 }
 0x398   :  { %v9223_v20 = vmax.f32 %v8095_v35, %v8097_v36 }
 0x399   :  { %5898 = vst [vmem:[%s9099_s6 + $0x20] sm:$0xff] %v5798_v41   ;;  %v4813_v19 = vadd.f32 %v8820_v59, %v4757_v1  ;;  %v4758_v24 = vmax.f32 %v9219_v47, %v4709_v23 }
 0x39b   :  { %v4814_v22 = vadd.f32 %v8820_v59, %v4758_v24  ;;  %v4862_v2 = vmax.f32 %v4813_v19, 0.0 }
 0x39c   :  { %v3393_v25 = vpop.f32.mrb[124].mxu0  ;;  %v4499_v50 = vpop.f32.mrb[124].mxu1 }
 0x39d   :  { %v4863_v28 = vmax.f32 %v4814_v22, 0.0  ;;  %v4710_v29 = vmax.f32 %v3393_v25, %v4499_v50  ;;  %v3395_v43 = vpop.f32.mrb[125].mxu0  ;;  %v4501_v55 = vpop.f32.mrb[125].mxu1  ;;  %v9224_v22 = vmax.f32 %v8107_v54, %v8109_v58 }
 0x39e   :  { %v3396_v56 = vpop.f32.mrb[126].mxu0  ;;  %v4502_v18 = vpop.f32.mrb[126].mxu1 }
 0x39f   :  { %v5803_v53 = vpack.c.bf16 %v4863_v28, %v4862_v2  ;;  %v4759_v7 = vmax.f32 %v9220_v44, %v4710_v29  ;;  %v4711_v30 = vmax.f32 %v3396_v56, %v4502_v18  ;;  %v3398_v31 = vpop.f32.mrb[127].mxu0  ;;  %v4504_v38 = vpop.f32.mrb[127].mxu1  ;;  %v9225_v28 = vmax.f32 %v8119_v12, %v8121_v21 }
 0x3a0   :  { %v9226_v38 = vmax.f32 %v8131_v48, %v8133_v49 }
 0x3a1   :  { %5899 = vst [vmem:[%s9099_s6 + $0x28] sm:$0xff] %v5803_v53   ;;  %v4815_v42 = vadd.f32 %v8820_v59, %v4759_v7  ;;  %v4760_v57 = vmax.f32 %v9221_v8, %v4711_v30 }
 0x3a3   :  { %v4816_v45 = vadd.f32 %v8820_v59, %v4760_v57  ;;  %v4864_v4 = vmax.f32 %v4815_v42, 0.0 }
 0x3a4   :  { %v3401_v61 = vpop.f32.mrb[128].mxu0  ;;  %v4507_v62 = vpop.f32.mrb[128].mxu1 }
 0x3a5   :  { %v4865_v51 = vmax.f32 %v4816_v45, 0.0  ;;  %v4712_v52 = vmax.f32 %v3401_v61, %v4507_v62  ;;  %v3403_v32 = vpop.f32.mrb[129].mxu0  ;;  %v4509_v9 = vpop.f32.mrb[129].mxu1  ;;  %v9227_v45 = vmax.f32 %v8143_v11, %v8145_v26 }
 0x3a6   :  { %v3404_v39 = vpop.f32.mrb[130].mxu0  ;;  %v4510_v40 = vpop.f32.mrb[130].mxu1 }
 0x3a7   :  { %v5808_v14 = vpack.c.bf16 %v4865_v51, %v4864_v4  ;;  %v4761_v6 = vmax.f32 %v9222_v5, %v4712_v52  ;;  %v4713_v15 = vmax.f32 %v3404_v39, %v4510_v40  ;;  %v3406_v37 = vpop.f32.mrb[131].mxu0  ;;  %v4512_v60 = vpop.f32.mrb[131].mxu1  ;;  %v9228_v5 = vmax.f32 %v8155_v0, %v8157_v33 }
 0x3a8   :  { %v9229_v60 = vmax.f32 %v8167_v3, %v8169_v27 }
 0x3a9   :  { %5900 = vst [vmem:[%s9099_s6 + $0x30] sm:$0xff] %v5808_v14   ;;  %v4817_v63 = vadd.f32 %v8820_v59, %v4761_v6  ;;  %v4762_v10 = vmax.f32 %v9223_v20, %v4713_v15 }
 0x3ab   :  { %v4818_v41 = vadd.f32 %v8820_v59, %v4762_v10  ;;  %v4866_v23 = vmax.f32 %v4817_v63, 0.0 }
 0x3ac   :  { %v3409_v34 = vpop.f32.mrb[132].mxu0  ;;  %v4515_v1 = vpop.f32.mrb[132].mxu1 }
 0x3ad   :  { %v4867_v13 = vmax.f32 %v4818_v41, 0.0  ;;  %v4714_v16 = vmax.f32 %v3409_v34, %v4515_v1  ;;  %v3411_v46 = vpop.f32.mrb[133].mxu0  ;;  %v4517_v17 = vpop.f32.mrb[133].mxu1 }
 0x3ae   :  { %v3412_v19 = vpop.f32.mrb[134].mxu0  ;;  %v4518_v47 = vpop.f32.mrb[134].mxu1  ;;  %v9230_v17 = vld [vmem:[#allocation2_spill] sm:$0xff] }
 0x3af   :  { %v5813_v24 = vpack.c.bf16 %v4867_v13, %v4866_v23  ;;  %v4763_v25 = vmax.f32 %v9224_v22, %v4714_v16  ;;  %v4715_v50 = vmax.f32 %v3412_v19, %v4518_v47  ;;  %v3414_v2 = vpop.f32.mrb[135].mxu0  ;;  %v4520_v35 = vpop.f32.mrb[135].mxu1  ;;  %v9231_v19 = vld [vmem:[#allocation3_spill] sm:$0xff] }
 0x3b0   :  { %v9232_v47 = vmax.f32 %v9230_v17, %v9231_v19  ;;  %v9234_v2 = vld [vmem:[#allocation5_spill] sm:$0xff] }
 0x3b1   :  { %5901 = vst [vmem:[%s9099_s6 + $0x38] sm:$0xff] %v5813_v24   ;;  %v4819_v36 = vadd.f32 %v8820_v59, %v4763_v25  ;;  %v4764_v29 = vmax.f32 %v9225_v28, %v4715_v50  ;;  %v9233_v50 = vld [vmem:[#allocation4_spill] sm:$0xff] }
 0x3b2   :  { %v9235_v35 = vmax.f32 %v9233_v50, %v9234_v2 }
 0x3b3   :  { %v4820_v43 = vadd.f32 %v8820_v59, %v4764_v29  ;;  %v4868_v18 = vmax.f32 %v4819_v36, 0.0 }
 0x3b4   :  { %v3417_v55 = vpop.f32.mrb[136].mxu0  ;;  %v4523_v56 = vpop.f32.mrb[136].mxu1 }
 0x3b5   :  { %v4869_v54 = vmax.f32 %v4820_v43, 0.0  ;;  %v4716_v58 = vmax.f32 %v3417_v55, %v4523_v56  ;;  %v3419_v53 = vpop.f32.mrb[137].mxu0  ;;  %v4525_v44 = vpop.f32.mrb[137].mxu1 }
 0x3b6   :  { %v3420_v7 = vpop.f32.mrb[138].mxu0  ;;  %v4526_v30 = vpop.f32.mrb[138].mxu1 }
 0x3b7   :  { %v5818_v31 = vpack.c.bf16 %v4869_v54, %v4868_v18  ;;  %v4765_v42 = vmax.f32 %v9226_v38, %v4716_v58  ;;  %v4717_v8 = vmax.f32 %v3420_v7, %v4526_v30  ;;  %v3422_v57 = vpop.f32.mrb[139].mxu0  ;;  %v4528_v12 = vpop.f32.mrb[139].mxu1  ;;  %v9236_v30 = vld [vmem:[#allocation6_spill] sm:$0xff] }
 0x3b9   :  { %5902 = vst [vmem:[%s9099_s6 + $0x40] sm:$0xff] %v5818_v31   ;;  %v4821_v21 = vadd.f32 %v8820_v59, %v4765_v42  ;;  %v4766_v61 = vmax.f32 %v9227_v45, %v4717_v8  ;;  %v9237_v31 = vld [vmem:[#allocation7_spill] sm:$0xff]  ;;  %v9239_v45 = vld [vmem:[#allocation8_spill] sm:$0xff] }
 0x3ba   :  { %v9238_v38 = vmax.f32 %v9236_v30, %v9237_v31 }
 0x3bb   :  { %v4822_v62 = vadd.f32 %v8820_v59, %v4766_v61  ;;  %v4870_v52 = vmax.f32 %v4821_v21, 0.0  ;;  %v9240_v61 = vld [vmem:[#allocation9_spill] sm:$0xff] }
 0x3bc   :  { %v3425_v4 = vpop.f32.mrb[140].mxu0  ;;  %v4531_v51 = vpop.f32.mrb[140].mxu1 }
 0x3bd   :  { %v4871_v48 = vmax.f32 %v4822_v62, 0.0  ;;  %v4718_v49 = vmax.f32 %v3425_v4, %v4531_v51  ;;  %v3427_v32 = vpop.f32.mrb[141].mxu0  ;;  %v4533_v9 = vpop.f32.mrb[141].mxu1  ;;  %v9241_v62 = vmax.f32 %v9239_v45, %v9240_v61 }
 0x3be   :  { %v3428_v39 = vpop.f32.mrb[142].mxu0  ;;  %v4534_v40 = vpop.f32.mrb[142].mxu1 }
 0x3bf   :  { %v5823_v14 = vpack.c.bf16 %v4871_v48, %v4870_v52  ;;  %v4767_v6 = vmax.f32 %v9228_v5, %v4718_v49  ;;  %v4719_v15 = vmax.f32 %v3428_v39, %v4534_v40  ;;  %v3430_v37 = vpop.f32.mrb[143].mxu0  ;;  %v4536_v11 = vpop.f32.mrb[143].mxu1 }
 0x3c0   :  { %v9243_v37 = vld [vmem:[#allocation11_spill] sm:$0xff] }
 0x3c1   :  { %5903 = vst [vmem:[%s9099_s6 + $0x48] sm:$0xff] %v5823_v14   ;;  %v4823_v26 = vadd.f32 %v8820_v59, %v4767_v6  ;;  %v4768_v63 = vmax.f32 %v9229_v60, %v4719_v15  ;;  %v9242_v15 = vld [vmem:[#allocation10_spill] sm:$0xff] }
 0x3c2   :  { %v9244_v11 = vmax.f32 %v9242_v15, %v9243_v37 }
 0x3c3   :  { %v4824_v20 = vadd.f32 %v8820_v59, %v4768_v63  ;;  %v4872_v34 = vmax.f32 %v4823_v26, 0.0 }
 0x3c4   :  { %v3433_v10 = vpop.f32.mrb[144].mxu0  ;;  %v4539_v41 = vpop.f32.mrb[144].mxu1 }
 0x3c5   :  { %v4873_v33 = vmax.f32 %v4824_v20, 0.0  ;;  %v4720_v0 = vmax.f32 %v3433_v10, %v4539_v41  ;;  %v3435_v1 = vpop.f32.mrb[145].mxu0  ;;  %v4541_v23 = vpop.f32.mrb[145].mxu1  ;;  %v9245_v41 = vld [vmem:[#allocation12_spill] sm:$0xff] }
 0x3c6   :  { %v3436_v13 = vpop.f32.mrb[146].mxu0  ;;  %v4542_v16 = vpop.f32.mrb[146].mxu1 }
 0x3c7   :  { %v5828_v46 = vpack.c.bf16 %v4873_v33, %v4872_v34  ;;  %v4769_v24 = vmax.f32 %v9232_v47, %v4720_v0  ;;  %v4721_v22 = vmax.f32 %v3436_v13, %v4542_v16  ;;  %v3438_v25 = vpop.f32.mrb[147].mxu0  ;;  %v4544_v3 = vpop.f32.mrb[147].mxu1  ;;  %v9246_v34 = vld [vmem:[#allocation13_spill] sm:$0xff] }
 0x3c8   :  { %v9247_v33 = vmax.f32 %v9245_v41, %v9246_v34  ;;  %v9248_v3 = vld [vmem:[#allocation14_spill] sm:$0xff] }
 0x3c9   :  { %5904 = vst [vmem:[%s9099_s6 + $0x50] sm:$0xff] %v5828_v46   ;;  %v4825_v27 = vadd.f32 %v8820_v59, %v4769_v24  ;;  %v4770_v36 = vmax.f32 %v9235_v35, %v4721_v22 }
 0x3cb   :  { %v4826_v28 = vadd.f32 %v8820_v59, %v4770_v36  ;;  %v4874_v55 = vmax.f32 %v4825_v27, 0.0  ;;  %v9249_v27 = vld [vmem:[#allocation15_spill] sm:$0xff] }
 0x3cc   :  { %v3441_v29 = vpop.f32.mrb[148].mxu0  ;;  %v4547_v43 = vpop.f32.mrb[148].mxu1  ;;  %v9250_v50 = vmax.f32 %v9248_v3, %v9249_v27 }
 0x3cd   :  { %v4875_v56 = vmax.f32 %v4826_v28, 0.0  ;;  %v4722_v18 = vmax.f32 %v3441_v29, %v4547_v43  ;;  %v3443_v54 = vpop.f32.mrb[149].mxu0  ;;  %v4549_v58 = vpop.f32.mrb[149].mxu1  ;;  %v9251_v43 = vld [vmem:[#allocation16_spill] sm:$0xff] }
 0x3ce   :  { %v3444_v53 = vpop.f32.mrb[150].mxu0  ;;  %v4550_v44 = vpop.f32.mrb[150].mxu1 }
 0x3cf   :  { %v5833_v7 = vpack.c.bf16 %v4875_v56, %v4874_v55  ;;  %v4771_v42 = vmax.f32 %v9238_v38, %v4722_v18  ;;  %v4723_v8 = vmax.f32 %v3444_v53, %v4550_v44  ;;  %v3446_v57 = vpop.f32.mrb[151].mxu0  ;;  %v4552_v12 = vpop.f32.mrb[151].mxu1  ;;  %v9252_v55 = vld [vmem:[#allocation17_spill] sm:$0xff] }
 0x3d0   :  { %v9253_v56 = vmax.f32 %v9251_v43, %v9252_v55  ;;  %v9254_v12 = vld [vmem:[#allocation18_spill] sm:$0xff] }
 0x3d1   :  { %5905 = vst [vmem:[%s9099_s6 + $0x58] sm:$0xff] %v5833_v7   ;;  %v4827_v21 = vadd.f32 %v8820_v59, %v4771_v42  ;;  %v4772_v4 = vmax.f32 %v9241_v62, %v4723_v8 }
 0x3d3   :  { %v4828_v51 = vadd.f32 %v8820_v59, %v4772_v4  ;;  %v4876_v49 = vmax.f32 %v4827_v21, 0.0  ;;  %v9255_v21 = vld [vmem:[#allocation19_spill] sm:$0xff] }
 0x3d4   :  { %v3449_v52 = vpop.f32.mrb[152].mxu0  ;;  %v4555_v48 = vpop.f32.mrb[152].mxu1  ;;  %v9256_v45 = vmax.f32 %v9254_v12, %v9255_v21 }
 0x3d5   :  { %v4877_v32 = vmax.f32 %v4828_v51, 0.0  ;;  %v4724_v9 = vmax.f32 %v3449_v52, %v4555_v48  ;;  %v3451_v39 = vpop.f32.mrb[153].mxu0  ;;  %v4557_v40 = vpop.f32.mrb[153].mxu1  ;;  %v9257_v48 = vld [vmem:[#allocation20_spill] sm:$0xff] }
 0x3d6   :  { %v3452_v14 = vpop.f32.mrb[154].mxu0  ;;  %v4558_v5 = vpop.f32.mrb[154].mxu1 }
 0x3d7   :  { %v5838_v6 = vpack.c.bf16 %v4877_v32, %v4876_v49  ;;  %v4773_v26 = vmax.f32 %v9244_v11, %v4724_v9  ;;  %v4725_v60 = vmax.f32 %v3452_v14, %v4558_v5  ;;  %v3454_v63 = vpop.f32.mrb[155].mxu0  ;;  %v4560_v20 = vpop.f32.mrb[155].mxu1  ;;  %v9258_v49 = vld [vmem:[#allocation21_spill] sm:$0xff] }
 0x3d8   :  { %v9259_v32 = vmax.f32 %v9257_v48, %v9258_v49  ;;  %v9260_v20 = vld [vmem:[#allocation22_spill] sm:$0xff] }
 0x3d9   :  { %5906 = vst [vmem:[%s9099_s6 + $0x60] sm:$0xff] %v5838_v6   ;;  %v4829_v10 = vadd.f32 %v8820_v59, %v4773_v26  ;;  %v4774_v0 = vmax.f32 %v9247_v33, %v4725_v60 }
 0x3db   :  { %v4830_v1 = vadd.f32 %v8820_v59, %v4774_v0  ;;  %v4878_v16 = vmax.f32 %v4829_v10, 0.0  ;;  %v9261_v10 = vld [vmem:[#allocation23_spill] sm:$0xff] }
 0x3dc   :  { %v3457_v23 = vpop.f32.mrb[156].mxu0  ;;  %v4563_v13 = vpop.f32.mrb[156].mxu1  ;;  %v9262_v41 = vmax.f32 %v9260_v20, %v9261_v10 }
 0x3dd   :  { %v4879_v46 = vmax.f32 %v4830_v1, 0.0  ;;  %v4726_v17 = vmax.f32 %v3457_v23, %v4563_v13  ;;  %v3459_v19 = vpop.f32.mrb[157].mxu0  ;;  %v4565_v47 = vpop.f32.mrb[157].mxu1  ;;  %v9263_v13 = vld [vmem:[#allocation24_spill] sm:$0xff] }
 0x3de   :  { %v3460_v24 = vpop.f32.mrb[158].mxu0  ;;  %v4566_v22 = vpop.f32.mrb[158].mxu1 }
 0x3df   :  { %v5843_v25 = vpack.c.bf16 %v4879_v46, %v4878_v16  ;;  %v4775_v2 = vmax.f32 %v9250_v50, %v4726_v17  ;;  %v4727_v35 = vmax.f32 %v3460_v24, %v4566_v22  ;;  %v3462_v36 = vpop.f32.mrb[159].mxu0  ;;  %v4568_v28 = vpop.f32.mrb[159].mxu1  ;;  %v9264_v16 = vld [vmem:[#allocation25_spill] sm:$0xff] }
 0x3e0   :  { %v9265_v46 = vmax.f32 %v9263_v13, %v9264_v16  ;;  %v9266_v28 = vld [vmem:[#allocation26_spill] sm:$0xff] }
 0x3e1   :  { %5907 = vst [vmem:[%s9099_s6 + $0x68] sm:$0xff] %v5843_v25   ;;  %v4831_v29 = vadd.f32 %v8820_v59, %v4775_v2  ;;  %v4776_v18 = vmax.f32 %v9253_v56, %v4727_v35 }
 0x3e3   :  { %v4832_v54 = vadd.f32 %v8820_v59, %v4776_v18  ;;  %v4880_v44 = vmax.f32 %v4831_v29, 0.0  ;;  %v9267_v29 = vld [vmem:[#allocation27_spill] sm:$0xff] }
 0x3e4   :  { %v3465_v58 = vpop.f32.mrb[160].mxu0  ;;  %v4571_v53 = vpop.f32.mrb[160].mxu1  ;;  %v9268_v43 = vmax.f32 %v9266_v28, %v9267_v29 }
 0x3e5   :  { %v4881_v7 = vmax.f32 %v4832_v54, 0.0  ;;  %v4728_v30 = vmax.f32 %v3465_v58, %v4571_v53  ;;  %v3467_v31 = vpop.f32.mrb[161].mxu0  ;;  %v4573_v38 = vpop.f32.mrb[161].mxu1  ;;  %v9269_v53 = vld [vmem:[#allocation28_spill] sm:$0xff] }
 0x3e6   :  { %v3468_v42 = vpop.f32.mrb[162].mxu0  ;;  %v4574_v8 = vpop.f32.mrb[162].mxu1 }
 0x3e7   :  { %v5848_v57 = vpack.c.bf16 %v4881_v7, %v4880_v44  ;;  %v4777_v61 = vmax.f32 %v9256_v45, %v4728_v30  ;;  %v4729_v62 = vmax.f32 %v3468_v42, %v4574_v8  ;;  %v3470_v4 = vpop.f32.mrb[163].mxu0  ;;  %v4576_v51 = vpop.f32.mrb[163].mxu1  ;;  %v9270_v44 = vld [vmem:[#allocation29_spill] sm:$0xff] }
 0x3e8   :  { %v9271_v7 = vmax.f32 %v9269_v53, %v9270_v44  ;;  %v9272_v51 = vld [vmem:[#allocation30_spill] sm:$0xff] }
 0x3e9   :  { %5908 = vst [vmem:[%s9099_s6 + $0x70] sm:$0xff] %v5848_v57   ;;  %v4833_v52 = vadd.f32 %v8820_v59, %v4777_v61  ;;  %v4778_v9 = vmax.f32 %v9259_v32, %v4729_v62 }
 0x3eb   :  { %v4834_v39 = vadd.f32 %v8820_v59, %v4778_v9  ;;  %v4882_v5 = vmax.f32 %v4833_v52, 0.0  ;;  %v9273_v52 = vld [vmem:[#allocation31_spill] sm:$0xff] }
 0x3ec   :  { %v3473_v40 = vpop.f32.mrb[164].mxu0  ;;  %v4579_v14 = vpop.f32.mrb[164].mxu1  ;;  %v9274_v48 = vmax.f32 %v9272_v51, %v9273_v52 }
 0x3ed   :  { %v4883_v6 = vmax.f32 %v4834_v39, 0.0  ;;  %v4730_v15 = vmax.f32 %v3473_v40, %v4579_v14  ;;  %v3475_v37 = vpop.f32.mrb[165].mxu0  ;;  %v4581_v11 = vpop.f32.mrb[165].mxu1  ;;  %v9275_v14 = vld [vmem:[#allocation32_spill] sm:$0xff] }
 0x3ee   :  { %v3476_v26 = vpop.f32.mrb[166].mxu0  ;;  %v4582_v60 = vpop.f32.mrb[166].mxu1 }
 0x3ef   :  { %v5853_v63 = vpack.c.bf16 %v4883_v6, %v4882_v5  ;;  %v4779_v34 = vmax.f32 %v9262_v41, %v4730_v15  ;;  %v4731_v33 = vmax.f32 %v3476_v26, %v4582_v60  ;;  %v3478_v0 = vpop.f32.mrb[167].mxu0  ;;  %v4584_v1 = vpop.f32.mrb[167].mxu1  ;;  %v9276_v5 = vld [vmem:[#allocation33_spill] sm:$0xff] }
 0x3f0   :  { %v9277_v6 = vmax.f32 %v9275_v14, %v9276_v5  ;;  %v9278_v1 = vld [vmem:[#allocation34_spill] sm:$0xff] }
 0x3f1   :  { %5909 = vst [vmem:[%s9099_s6 + $0x78] sm:$0xff] %v5853_v63   ;;  %v4835_v23 = vadd.f32 %v8820_v59, %v4779_v34  ;;  %v4780_v17 = vmax.f32 %v9265_v46, %v4731_v33 }
 0x3f3   :  { %v4836_v19 = vadd.f32 %v8820_v59, %v4780_v17  ;;  %v4884_v22 = vmax.f32 %v4835_v23, 0.0  ;;  %v9279_v23 = vld [vmem:[#allocation35_spill] sm:$0xff] }
 0x3f4   :  { %v3481_v47 = vpop.f32.mrb[168].mxu0  ;;  %v4587_v24 = vpop.f32.mrb[168].mxu1  ;;  %v9280_v13 = vmax.f32 %v9278_v1, %v9279_v23 }
 0x3f5   :  { %v4885_v25 = vmax.f32 %v4836_v19, 0.0  ;;  %v4732_v3 = vmax.f32 %v3481_v47, %v4587_v24  ;;  %v3483_v27 = vpop.f32.mrb[169].mxu0  ;;  %v4589_v50 = vpop.f32.mrb[169].mxu1  ;;  %v9281_v24 = vld [vmem:[#allocation36_spill] sm:$0xff] }
 0x3f6   :  { %v3484_v2 = vpop.f32.mrb[170].mxu0  ;;  %v4590_v35 = vpop.f32.mrb[170].mxu1 }
 0x3f7   :  { %v5858_v36 = vpack.c.bf16 %v4885_v25, %v4884_v22  ;;  %v4781_v55 = vmax.f32 %v9268_v43, %v4732_v3  ;;  %v4733_v56 = vmax.f32 %v3484_v2, %v4590_v35  ;;  %v3486_v18 = vpop.f32.mrb[171].mxu0  ;;  %v4592_v54 = vpop.f32.mrb[171].mxu1  ;;  %v9282_v22 = vld [vmem:[#allocation37_spill] sm:$0xff] }
 0x3f8   :  { %v9283_v25 = vmax.f32 %v9281_v24, %v9282_v22  ;;  %v9284_v54 = vld [vmem:[#allocation38_spill] sm:$0xff] }
 0x3f9   :  { %5910 = vst [vmem:[%s9099_s6 + $0x80] sm:$0xff] %v5858_v36   ;;  %v4837_v58 = vadd.f32 %v8820_v59, %v4781_v55  ;;  %v4782_v30 = vmax.f32 %v9271_v7, %v4733_v56 }
 0x3fb   :  { %v4838_v31 = vadd.f32 %v8820_v59, %v4782_v30  ;;  %v4886_v8 = vmax.f32 %v4837_v58, 0.0  ;;  %v9285_v58 = vld [vmem:[#allocation39_spill] sm:$0xff] }
 0x3fc   :  { %v3489_v38 = vpop.f32.mrb[172].mxu0  ;;  %v4595_v42 = vpop.f32.mrb[172].mxu1  ;;  %v9286_v53 = vmax.f32 %v9284_v54, %v9285_v58 }
 0x3fd   :  { %v4887_v57 = vmax.f32 %v4838_v31, 0.0  ;;  %v4734_v12 = vmax.f32 %v3489_v38, %v4595_v42  ;;  %v3491_v21 = vpop.f32.mrb[173].mxu0  ;;  %v4597_v45 = vpop.f32.mrb[173].mxu1  ;;  %v9287_v42 = vld [vmem:[#allocation40_spill] sm:$0xff] }
 0x3fe   :  { %v3492_v61 = vpop.f32.mrb[174].mxu0  ;;  %v4598_v62 = vpop.f32.mrb[174].mxu1 }
 0x3ff   :  { %v5863_v4 = vpack.c.bf16 %v4887_v57, %v4886_v8  ;;  %v4783_v49 = vmax.f32 %v9274_v48, %v4734_v12  ;;  %v4735_v32 = vmax.f32 %v3492_v61, %v4598_v62  ;;  %v3494_v9 = vpop.f32.mrb[175].mxu0  ;;  %v4600_v39 = vpop.f32.mrb[175].mxu1  ;;  %v9288_v8 = vld [vmem:[#allocation41_spill] sm:$0xff] }
 0x400   :  { %v9289_v57 = vmax.f32 %v9287_v42, %v9288_v8  ;;  %v9290_v39 = vld [vmem:[#allocation42_spill] sm:$0xff] }
 0x401   :  { %5911 = vst [vmem:[%s9099_s6 + $0x88] sm:$0xff] %v5863_v4   ;;  %v4839_v40 = vadd.f32 %v8820_v59, %v4783_v49  ;;  %v4784_v15 = vmax.f32 %v9277_v6, %v4735_v32 }
 0x403   :  { %v4840_v37 = vadd.f32 %v8820_v59, %v4784_v15  ;;  %v4888_v60 = vmax.f32 %v4839_v40, 0.0  ;;  %v9291_v40 = vld [vmem:[#allocation43_spill] sm:$0xff] }
 0x404   :  { %v3497_v11 = vpop.f32.mrb[176].mxu0  ;;  %v4603_v26 = vpop.f32.mrb[176].mxu1  ;;  %v9292_v14 = vmax.f32 %v9290_v39, %v9291_v40 }
 0x405   :  { %v4889_v63 = vmax.f32 %v4840_v37, 0.0  ;;  %v4736_v20 = vmax.f32 %v3497_v11, %v4603_v26  ;;  %v3499_v10 = vpop.f32.mrb[177].mxu0  ;;  %v4605_v41 = vpop.f32.mrb[177].mxu1  ;;  %v9293_v26 = vld [vmem:[#allocation44_spill] sm:$0xff] }
 0x406   :  { %v3500_v34 = vpop.f32.mrb[178].mxu0  ;;  %v4606_v33 = vpop.f32.mrb[178].mxu1 }
 0x407   :  { %v5868_v0 = vpack.c.bf16 %v4889_v63, %v4888_v60  ;;  %v4785_v16 = vmax.f32 %v9280_v13, %v4736_v20  ;;  %v4737_v46 = vmax.f32 %v3500_v34, %v4606_v33  ;;  %v3502_v17 = vpop.f32.mrb[179].mxu0  ;;  %v4608_v19 = vpop.f32.mrb[179].mxu1  ;;  %v9294_v60 = vld [vmem:[#allocation45_spill] sm:$0xff] }
 0x408   :  { %v9295_v63 = vmax.f32 %v9293_v26, %v9294_v60  ;;  %v9296_v19 = vld [vmem:[#allocation46_spill] sm:$0xff] }
 0x409   :  { %5912 = vst [vmem:[%s9099_s6 + $0x90] sm:$0xff] %v5868_v0   ;;  %v4841_v47 = vadd.f32 %v8820_v59, %v4785_v16  ;;  %v4786_v3 = vmax.f32 %v9283_v25, %v4737_v46 }
 0x40b   :  { %v4842_v27 = vadd.f32 %v8820_v59, %v4786_v3  ;;  %v4890_v35 = vmax.f32 %v4841_v47, 0.0  ;;  %v9297_v47 = vld [vmem:[#allocation47_spill] sm:$0xff] }
 0x40c   :  { %v3505_v50 = vpop.f32.mrb[180].mxu0  ;;  %v4611_v2 = vpop.f32.mrb[180].mxu1  ;;  %v9298_v24 = vmax.f32 %v9296_v19, %v9297_v47 }
 0x40d   :  { %v4891_v36 = vmax.f32 %v4842_v27, 0.0  ;;  %v4738_v28 = vmax.f32 %v3505_v50, %v4611_v2  ;;  %v3507_v29 = vpop.f32.mrb[181].mxu0  ;;  %v4613_v43 = vpop.f32.mrb[181].mxu1  ;;  %v9299_v2 = vld [vmem:[#allocation48_spill] sm:$0xff] }
 0x40e   :  { %v3508_v55 = vpop.f32.mrb[182].mxu0  ;;  %v4614_v56 = vpop.f32.mrb[182].mxu1 }
 0x40f   :  { %v5873_v18 = vpack.c.bf16 %v4891_v36, %v4890_v35  ;;  %v4787_v44 = vmax.f32 %v9286_v53, %v4738_v28  ;;  %v4739_v7 = vmax.f32 %v3508_v55, %v4614_v56  ;;  %v3510_v30 = vpop.f32.mrb[183].mxu0  ;;  %v4616_v31 = vpop.f32.mrb[183].mxu1  ;;  %v9300_v35 = vld [vmem:[#allocation49_spill] sm:$0xff] }
 0x410   :  { %v9301_v36 = vmax.f32 %v9299_v2, %v9300_v35  ;;  %v9302_v31 = vld [vmem:[#allocation50_spill] sm:$0xff] }
 0x411   :  { %5913 = vst [vmem:[%s9099_s6 + $0x98] sm:$0xff] %v5873_v18   ;;  %v4843_v38 = vadd.f32 %v8820_v59, %v4787_v44  ;;  %v4788_v12 = vmax.f32 %v9289_v57, %v4739_v7 }
 0x413   :  { %v4844_v21 = vadd.f32 %v8820_v59, %v4788_v12  ;;  %v4892_v62 = vmax.f32 %v4843_v38, 0.0  ;;  %v9303_v38 = vld [vmem:[#allocation51_spill] sm:$0xff] }
 0x414   :  { %v3513_v45 = vpop.f32.mrb[184].mxu0  ;;  %v4619_v61 = vpop.f32.mrb[184].mxu1  ;;  %v9304_v42 = vmax.f32 %v9302_v31, %v9303_v38 }
 0x415   :  { %v4893_v4 = vmax.f32 %v4844_v21, 0.0  ;;  %v4740_v51 = vmax.f32 %v3513_v45, %v4619_v61  ;;  %v3515_v52 = vpop.f32.mrb[185].mxu0  ;;  %v4621_v48 = vpop.f32.mrb[185].mxu1  ;;  %v9305_v61 = vld [vmem:[#allocation52_spill] sm:$0xff] }
 0x416   :  { %v3516_v49 = vpop.f32.mrb[186].mxu0  ;;  %v4622_v32 = vpop.f32.mrb[186].mxu1 }
 0x417   :  { %v5878_v9 = vpack.c.bf16 %v4893_v4, %v4892_v62  ;;  %v4789_v5 = vmax.f32 %v9292_v14, %v4740_v51  ;;  %v4741_v6 = vmax.f32 %v3516_v49, %v4622_v32  ;;  %v3518_v15 = vpop.f32.mrb[187].mxu0  ;;  %v4624_v37 = vpop.f32.mrb[187].mxu1  ;;  %v9306_v62 = vld [vmem:[#allocation53_spill] sm:$0xff] }
 0x418   :  { %v9307_v4 = vmax.f32 %v9305_v61, %v9306_v62  ;;  %v9308_v37 = vld [vmem:[#allocation54_spill] sm:$0xff] }
 0x419   :  { %5914 = vst [vmem:[%s9099_s6 + $0xa0] sm:$0xff] %v5878_v9   ;;  %v4845_v11 = vadd.f32 %v8820_v59, %v4789_v5  ;;  %v4790_v20 = vmax.f32 %v9295_v63, %v4741_v6 }
 0x41b   :  { %v4846_v10 = vadd.f32 %v8820_v59, %v4790_v20  ;;  %v4894_v33 = vmax.f32 %v4845_v11, 0.0  ;;  %v9309_v11 = vld [vmem:[#allocation55_spill] sm:$0xff] }
 0x41c   :  { %v3521_v41 = vpop.f32.mrb[188].mxu0  ;;  %v4627_v34 = vpop.f32.mrb[188].mxu1  ;;  %v9310_v26 = vmax.f32 %v9308_v37, %v9309_v11 }
 0x41d   :  { %v4895_v0 = vmax.f32 %v4846_v10, 0.0  ;;  %v4742_v1 = vmax.f32 %v3521_v41, %v4627_v34  ;;  %v3523_v23 = vpop.f32.mrb[189].mxu0  ;;  %v4629_v13 = vpop.f32.mrb[189].mxu1 }
 0x41e   :  { %v3524_v16 = vpop.f32.mrb[190].mxu0  ;;  %v4630_v46 = vpop.f32.mrb[190].mxu1 }
 0x41f   :  { %v5883_v17 = vpack.c.bf16 %v4895_v0, %v4894_v33  ;;  %v4791_v22 = vmax.f32 %v9298_v24, %v4742_v1  ;;  %v4743_v25 = vmax.f32 %v3524_v16, %v4630_v46  ;;  %v3526_v3 = vpop.f32.mrb[191].mxu0  ;;  %v4632_v27 = vpop.f32.mrb[191].mxu1 }
 0x421   :  { %5915 = vst [vmem:[%s9099_s6 + $0xa8] sm:$0xff] %v5883_v17   ;;  %v4847_v50 = vadd.f32 %v8820_v59, %v4791_v22  ;;  %v4792_v28 = vmax.f32 %v9301_v36, %v4743_v25 }
 0x423   :  { %v4848_v29 = vadd.f32 %v8820_v59, %v4792_v28  ;;  %v4896_v56 = vmax.f32 %v4847_v50, 0.0 }
 0x424   :  { %v3529_v43 = vpop.f32.mrb[192].mxu0  ;;  %v4635_v55 = vpop.f32.mrb[192].mxu1 }
 0x425   :  { %v4897_v18 = vmax.f32 %v4848_v29, 0.0  ;;  %v4744_v54 = vmax.f32 %v3529_v43, %v4635_v55  ;;  %v3531_v58 = vpop.f32.mrb[193].mxu0  ;;  %v4637_v53 = vpop.f32.mrb[193].mxu1 }
 0x426   :  { %v3532_v44 = vpop.f32.mrb[194].mxu0  ;;  %v4638_v7 = vpop.f32.mrb[194].mxu1 }
 0x427   :  { %v5888_v30 = vpack.c.bf16 %v4897_v18, %v4896_v56  ;;  %v4793_v8 = vmax.f32 %v9304_v42, %v4744_v54  ;;  %v4745_v57 = vmax.f32 %v3532_v44, %v4638_v7  ;;  %v3534_v12 = vpop.f32.mrb[195].mxu0  ;;  %v4640_v21 = vpop.f32.mrb[195].mxu1 }
 0x429   :  { %5916 = vst [vmem:[%s9099_s6 + $0xb0] sm:$0xff] %v5888_v30   ;;  %v4849_v45 = vadd.f32 %v8820_v59, %v4793_v8  ;;  %v4794_v51 = vmax.f32 %v9307_v4, %v4745_v57 }
 0x42b   :  { %v4850_v52 = vadd.f32 %v8820_v59, %v4794_v51  ;;  %v4898_v32 = vmax.f32 %v4849_v45, 0.0 }
 0x42c   :  { %v3537_v48 = vpop.f32.mrb[196].mxu0  ;;  %v4643_v49 = vpop.f32.mrb[196].mxu1 }
 0x42d   :  { %v4899_v9 = vmax.f32 %v4850_v52, 0.0  ;;  %v4746_v39 = vmax.f32 %v3537_v48, %v4643_v49  ;;  %v3539_v40 = vpop.f32.mrb[197].mxu0  ;;  %v4645_v14 = vpop.f32.mrb[197].mxu1 }
 0x42e   :  { %v3540_v5 = vpop.f32.mrb[198].mxu0  ;;  %v4646_v6 = vpop.f32.mrb[198].mxu1 }
 0x42f   :  { %v5893_v15 = vpack.c.bf16 %v4899_v9, %v4898_v32  ;;  %v4795_v60 = vmax.f32 %v9310_v26, %v4746_v39  ;;  %v3541_v63 = vpop.f32.mrb[199].mxu0  ;;  %v4647_v20 = vpop.f32.mrb[199].mxu1 }
 0x431   :  { %5917 = vst [vmem:[%s9099_s6 + $0xb8] sm:$0xff] %v5893_v15   ;;  %v4851_v10 = vadd.f32 %v8820_v59, %v4795_v60 }
 0x433   :  { %v4900_v41 = vmax.f32 %v4851_v10, 0.0 }
 0x435   :  { %v5774_v34 = vpack.c.bf16 %v4900_v41, %v4900_v41 }
 0x437   :  { %5146 = vst [vmem:[%s9099_s6 + $0xc0] sm:$0xf] %v5774_v34 }

// kernel: cnn_forward.5
= control target key start
LH: loop header
LB: loop body
LE: loop exit
PB: predicated region body
PF: predicated region fallthrough
CT: control target
= control target key end

     0   :  { %s1905_s0 = inlined_call_operand.vmem [shape: bf16[8,1568], index: 0, kind: input, shape index: {}]   ;;  %s1906_s1 = inlined_call_operand.vmem [shape: bf16[1568,128], index: 1, kind: input, shape index: {}]   ;;  %s1907_s2 = inlined_call_operand.vmem [shape: f32[1,128], index: 2, kind: input, shape index: {}]   ;;  %s1908_s3 = inlined_call_operand.hbm [shape: f32[8,128], index: 3, kind: output, shape index: {}]  }
   0x1   :  { %v1417_v0 = vld [vmem:[%s1906_s1 + $0x40] sm:$0xff]   ;;  %v1421_v4 = vld [vmem:[%s1906_s1 + $0x48] sm:$0xff]   ;;  %v1425_v8 = vld [vmem:[%s1906_s1 + $0x50] sm:$0xff]  }
   0x2   :  { %v1418_v1 = vld [vmem:[%s1906_s1] sm:$0xff]   ;;  %1271 = vmatprep.subr.bf16.mxu0 %v1417_v0  ;;  %v1422_v5 = vld [vmem:[%s1906_s1 + $0x8] sm:$0xff]   ;;  %v1426_v9 = vld [vmem:[%s1906_s1 + $0x10] sm:$0xff]  }
   0x3   :  { %v1419_v2 = vld [vmem:[%s1906_s1 + $0xc0] sm:$0xff]   ;;  %1272 = vmatpush3.bf16.msra.mxu0 %v1418_v1  ;;  %v1423_v6 = vld [vmem:[%s1906_s1 + $0xc8] sm:$0xff]   ;;  %v1427_v10 = vld [vmem:[%s1906_s1 + $0xd0] sm:$0xff]  }
   0x4   :  { %v1420_v3 = vld [vmem:[%s1906_s1 + $0x80] sm:$0xff]   ;;  %1293 = vmatprep.subr.bf16.mxu1 %v1419_v2  ;;  %1273 = vmatprep.subr.bf16.mxu0 %v1421_v4  ;;  %v1424_v7 = vld [vmem:[%s1906_s1 + $0x88] sm:$0xff]   ;;  %v1428_v11 = vld [vmem:[%s1906_s1 + $0x90] sm:$0xff]  }
   0x5   :  { %1294 = vmatpush3.bf16.msra.mxu1 %v1420_v3  ;;  %v1429_v12 = vld [vmem:[%s1906_s1 + $0x58] sm:$0xff]   ;;  %v1433_v16 = vld [vmem:[%s1906_s1 + $0x60] sm:$0xff]   ;;  %v1437_v20 = vld [vmem:[%s1906_s1 + $0x68] sm:$0xff]  }
   0x6   :  { %1295 = vmatprep.subr.bf16.mxu1 %v1423_v6  ;;  %v1430_v13 = vld [vmem:[%s1906_s1 + $0x18] sm:$0xff]   ;;  %v1434_v17 = vld [vmem:[%s1906_s1 + $0x20] sm:$0xff]   ;;  %v1438_v21 = vld [vmem:[%s1906_s1 + $0x28] sm:$0xff]  }
   0x7   :  { %1274 = vmatpush3.bf16.msra.mxu0 %v1422_v5  ;;  %v1431_v14 = vld [vmem:[%s1906_s1 + $0xd8] sm:$0xff]   ;;  %v1435_v18 = vld [vmem:[%s1906_s1 + $0xe0] sm:$0xff]   ;;  %v1439_v22 = vld [vmem:[%s1906_s1 + $0xe8] sm:$0xff]  }
   0x8   :  { %1275 = vmatprep.subr.bf16.mxu0 %v1425_v8  ;;  %v1432_v15 = vld [vmem:[%s1906_s1 + $0x98] sm:$0xff]   ;;  %v1436_v19 = vld [vmem:[%s1906_s1 + $0xa0] sm:$0xff]   ;;  %v1440_v23 = vld [vmem:[%s1906_s1 + $0xa8] sm:$0xff]  }
   0x9   :  { %1296 = vmatpush3.bf16.msra.mxu1 %v1424_v7  ;;  %v1441_v24 = vld [vmem:[%s1906_s1 + $0x70] sm:$0xff]   ;;  %v1445_v28 = vld [vmem:[%s1906_s1 + $0x78] sm:$0xff]   ;;  %v16_v32 = vld [vmem:[%s1905_s0] sm:$0xff] }
   0xa   :  { %1297 = vmatprep.subr.bf16.mxu1 %v1427_v10  ;;  %v1442_v25 = vld [vmem:[%s1906_s1 + $0x30] sm:$0xff]   ;;  %v1446_v29 = vld [vmem:[%s1906_s1 + $0x38] sm:$0xff]   ;;  %v1159_v33 = vcombine.low %v16_v32, %v16_v32  ;;  %v1160_v34 = vcombine.high %v16_v32, %v16_v32  ;;  %v1451_v35 = vld [vmem:[%s1906_s1 + $0x140] sm:$0xff]  }
   0xb   :  { %1276 = vmatpush3.bf16.msra.mxu0 %v1426_v9  ;;  %v1443_v26 = vld [vmem:[%s1906_s1 + $0xf0] sm:$0xff]   ;;  %v1447_v30 = vld [vmem:[%s1906_s1 + $0xf8] sm:$0xff]   ;;  %v17_v36 = vld [vmem:[%s1905_s0 + $0x8] sm:$0xff] }
   0xc   :  { %1277 = vmatprep.subr.bf16.mxu0 %v1429_v12  ;;  %v1444_v27 = vld [vmem:[%s1906_s1 + $0xb0] sm:$0xff]   ;;  %v1448_v31 = vld [vmem:[%s1906_s1 + $0xb8] sm:$0xff]   ;;  %v1161_v37 = vcombine.low %v17_v36, %v17_v36  ;;  %v1162_v38 = vcombine.high %v17_v36, %v17_v36  ;;  %v1454_v39 = vld [vmem:[%s1906_s1 + $0x100] sm:$0xff]   ;;  %895 = vmatprep.mubr.bf16.mxu0 %v1160_v34 }
   0xd   :  { %1298 = vmatpush3.bf16.msra.mxu1 %v1428_v11  ;;  %v1455_v40 = vld [vmem:[%s1906_s1 + $0x1c0] sm:$0xff]   ;;  %v1457_v42 = vld [vmem:[%s1906_s1 + $0x148] sm:$0xff]   ;;  %v1461_v46 = vld [vmem:[%s1906_s1 + $0x150] sm:$0xff]  }
   0xe   :  { %1299 = vmatprep.subr.bf16.mxu1 %v1431_v14  ;;  %935 = vmatprep.mubr.bf16.mxu1 %v1162_v38  ;;  %v1456_v41 = vld [vmem:[%s1906_s1 + $0x180] sm:$0xff]   ;;  %v1458_v43 = vld [vmem:[%s1906_s1 + $0x108] sm:$0xff]   ;;  %v1462_v47 = vld [vmem:[%s1906_s1 + $0x110] sm:$0xff]  }
   0xf   :  { %1278 = vmatpush3.bf16.msra.mxu0 %v1430_v13  ;;  %v1459_v44 = vld [vmem:[%s1906_s1 + $0x1c8] sm:$0xff]   ;;  %v1463_v48 = vld [vmem:[%s1906_s1 + $0x1d0] sm:$0xff]   ;;  %v1465_v50 = vld [vmem:[%s1906_s1 + $0x158] sm:$0xff]  }
  0x10   :  { %1279 = vmatprep.subr.bf16.mxu0 %v1433_v16  ;;  %v1460_v45 = vld [vmem:[%s1906_s1 + $0x188] sm:$0xff]   ;;  %v1464_v49 = vld [vmem:[%s1906_s1 + $0x190] sm:$0xff]   ;;  %v1466_v51 = vld [vmem:[%s1906_s1 + $0x118] sm:$0xff]  }
  0x11   :  { %1300 = vmatpush3.bf16.msra.mxu1 %v1432_v15  ;;  %v1467_v52 = vld [vmem:[%s1906_s1 + $0x1d8] sm:$0xff]   ;;  %v1469_v54 = vld [vmem:[%s1906_s1 + $0x160] sm:$0xff]   ;;  %v1473_v58 = vld [vmem:[%s1906_s1 + $0x168] sm:$0xff]  }
  0x12   :  { %1301 = vmatprep.subr.bf16.mxu1 %v1435_v18  ;;  %v1468_v53 = vld [vmem:[%s1906_s1 + $0x198] sm:$0xff]   ;;  %v1470_v55 = vld [vmem:[%s1906_s1 + $0x120] sm:$0xff]   ;;  %v1474_v59 = vld [vmem:[%s1906_s1 + $0x128] sm:$0xff]  }
  0x13   :  { %1280 = vmatpush3.bf16.msra.mxu0 %v1434_v17  ;;  %v1471_v56 = vld [vmem:[%s1906_s1 + $0x1e0] sm:$0xff]   ;;  %v1475_v60 = vld [vmem:[%s1906_s1 + $0x1e8] sm:$0xff]   ;;  %v1477_v62 = vld [vmem:[%s1906_s1 + $0x170] sm:$0xff]  }
  0x14   :  { %1281 = vmatprep.subr.bf16.mxu0 %v1437_v20  ;;  %v1472_v57 = vld [vmem:[%s1906_s1 + $0x1a0] sm:$0xff]   ;;  %v1476_v61 = vld [vmem:[%s1906_s1 + $0x1a8] sm:$0xff]   ;;  %v1478_v63 = vld [vmem:[%s1906_s1 + $0x130] sm:$0xff]  }
  0x15   :  { %1302 = vmatpush3.bf16.msra.mxu1 %v1436_v19  ;;  %v1479_v0 = vld [vmem:[%s1906_s1 + $0x1f0] sm:$0xff]   ;;  %v1481_v2 = vld [vmem:[%s1906_s1 + $0x178] sm:$0xff]   ;;  %v1487_v9 = vld [vmem:[%s1906_s1 + $0x240] sm:$0xff]  }
  0x16   :  { %1303 = vmatprep.subr.bf16.mxu1 %v1439_v22  ;;  %v1480_v1 = vld [vmem:[%s1906_s1 + $0x1b0] sm:$0xff]   ;;  %v1482_v3 = vld [vmem:[%s1906_s1 + $0x138] sm:$0xff]   ;;  %v1490_v13 = vld [vmem:[%s1906_s1 + $0x200] sm:$0xff]  }
  0x17   :  { %1282 = vmatpush3.bf16.msra.mxu0 %v1438_v21  ;;  %v1483_v4 = vld [vmem:[%s1906_s1 + $0x1f8] sm:$0xff]   ;;  %v18_v6 = vld [vmem:[%s1905_s0 + $0x10] sm:$0xff]  ;;  %v1491_v14 = vld [vmem:[%s1906_s1 + $0x2c0] sm:$0xff]  }
  0x18   :  { %1283 = vmatprep.subr.bf16.mxu0 %v1441_v24  ;;  %v1484_v5 = vld [vmem:[%s1906_s1 + $0x1b8] sm:$0xff]   ;;  %v1163_v7 = vcombine.low %v18_v6, %v18_v6  ;;  %v1164_v8 = vcombine.high %v18_v6, %v18_v6  ;;  %v1492_v15 = vld [vmem:[%s1906_s1 + $0x280] sm:$0xff]   ;;  %v1493_v16 = vld [vmem:[%s1906_s1 + $0x248] sm:$0xff]  }
  0x19   :  { %1304 = vmatpush3.bf16.msra.mxu1 %v1440_v23  ;;  %v19_v10 = vld [vmem:[%s1905_s0 + $0x18] sm:$0xff]  ;;  %v1494_v17 = vld [vmem:[%s1906_s1 + $0x208] sm:$0xff]   ;;  %v1497_v20 = vld [vmem:[%s1906_s1 + $0x250] sm:$0xff]  }
  0x1a   :  { %1305 = vmatprep.subr.bf16.mxu1 %v1443_v26  ;;  %v1165_v11 = vcombine.low %v19_v10, %v19_v10  ;;  %v1166_v12 = vcombine.high %v19_v10, %v19_v10  ;;  %v1495_v18 = vld [vmem:[%s1906_s1 + $0x2c8] sm:$0xff]   ;;  %v1498_v21 = vld [vmem:[%s1906_s1 + $0x210] sm:$0xff]   ;;  %v1501_v24 = vld [vmem:[%s1906_s1 + $0x258] sm:$0xff]  }
  0x1b   :  { %1284 = vmatpush3.bf16.msra.mxu0 %v1442_v25  ;;  %v1496_v19 = vld [vmem:[%s1906_s1 + $0x288] sm:$0xff]   ;;  %v1499_v22 = vld [vmem:[%s1906_s1 + $0x2d0] sm:$0xff]   ;;  %v1502_v25 = vld [vmem:[%s1906_s1 + $0x218] sm:$0xff]  }
  0x1c   :  { %1285 = vmatprep.subr.bf16.mxu0 %v1445_v28  ;;  %v1500_v23 = vld [vmem:[%s1906_s1 + $0x290] sm:$0xff]   ;;  %v1503_v26 = vld [vmem:[%s1906_s1 + $0x2d8] sm:$0xff]   ;;  %v1505_v28 = vld [vmem:[%s1906_s1 + $0x260] sm:$0xff]  }
  0x1d   :  { %1306 = vmatpush3.bf16.msra.mxu1 %v1444_v27  ;;  %v1504_v27 = vld [vmem:[%s1906_s1 + $0x298] sm:$0xff]   ;;  %v1509_v32 = vld [vmem:[%s1906_s1 + $0x268] sm:$0xff]   ;;  %v1513_v36 = vld [vmem:[%s1906_s1 + $0x270] sm:$0xff]  }
  0x1e   :  { %1307 = vmatprep.subr.bf16.mxu1 %v1447_v30  ;;  %v1507_v30 = vld [vmem:[%s1906_s1 + $0x2e0] sm:$0xff]   ;;  %v1511_v34 = vld [vmem:[%s1906_s1 + $0x2e8] sm:$0xff]   ;;  %v1515_v38 = vld [vmem:[%s1906_s1 + $0x2f0] sm:$0xff]  }
  0x1f   :  { %1286 = vmatpush3.bf16.msra.mxu0 %v1446_v29  ;;  %v1506_v29 = vld [vmem:[%s1906_s1 + $0x220] sm:$0xff]  }
  0x20   :  { %1315 = vmatprep.subr.bf16.mxu0 %v1451_v35  ;;  %v1512_v35 = vld [vmem:[%s1906_s1 + $0x2a8] sm:$0xff]  }
  0x21   :  { %1308 = vmatpush3.bf16.msra.mxu1 %v1448_v31  ;;  %v1508_v31 = vld [vmem:[%s1906_s1 + $0x2a0] sm:$0xff]  }
  0x22   :  { %896 = vmatmul.mubr.bf16.vlgmr.msra.gmra.mrb[0].mxu0 %v1159_v33  ;;  %1337 = vmatprep.subr.bf16.mxu1 %v1455_v40  ;;  %v1510_v33 = vld [vmem:[%s1906_s1 + $0x228] sm:$0xff]   ;;  %v1517_v40 = vld [vmem:[%s1906_s1 + $0x278] sm:$0xff]  }
  0x23   :  { %1316 = vmatpush3.bf16.msra.mxu0 %v1454_v39  ;;  %975 = vmatprep.mubr.bf16.mxu0 %v1164_v8  ;;  %v1516_v39 = vld [vmem:[%s1906_s1 + $0x2b0] sm:$0xff]  }
  0x24   :  { %936 = vmatmul.mubr.bf16.vlgmr.msra.gmra.mrb[0].mxu1 %v1161_v37  ;;  %1317 = vmatprep.subr.bf16.mxu0 %v1457_v42  ;;  %v1514_v37 = vld [vmem:[%s1906_s1 + $0x230] sm:$0xff]   ;;  %v1519_v42 = vld [vmem:[%s1906_s1 + $0x2f8] sm:$0xff]  }
  0x25   :  { %1338 = vmatpush3.bf16.msra.mxu1 %v1456_v41  ;;  %1015 = vmatprep.mubr.bf16.mxu1 %v1166_v12  ;;  %v1518_v41 = vld [vmem:[%s1906_s1 + $0x238] sm:$0xff]  }
  0x26   :  { %1339 = vmatprep.subr.bf16.mxu1 %v1459_v44  ;;  %v20_v44 = vld [vmem:[%s1905_s0 + $0x20] sm:$0xff] }
  0x27   :  { %1318 = vmatpush3.bf16.msra.mxu0 %v1458_v43  ;;  %v1520_v43 = vld [vmem:[%s1906_s1 + $0x2b8] sm:$0xff]  }
  0x28   :  { %1319 = vmatprep.subr.bf16.mxu0 %v1461_v46  ;;  %v1167_v46 = vcombine.low %v20_v44, %v20_v44 }
  0x29   :  { %1340 = vmatpush3.bf16.msra.mxu1 %v1460_v45  ;;  %v21_v45 = vld [vmem:[%s1905_s0 + $0x28] sm:$0xff] }
  0x2a   :  { %1341 = vmatprep.subr.bf16.mxu1 %v1463_v48  ;;  %v1169_v48 = vcombine.low %v21_v45, %v21_v45 }
  0x2b   :  { %1320 = vmatpush3.bf16.msra.mxu0 %v1462_v47  ;;  %v1168_v47 = vcombine.high %v20_v44, %v20_v44 }
  0x2c   :  { %1321 = vmatprep.subr.bf16.mxu0 %v1465_v50  ;;  %v1525_v50 = vld [vmem:[%s1906_s1 + $0x300] sm:$0xff]  }
  0x2d   :  { %1342 = vmatpush3.bf16.msra.mxu1 %v1464_v49  ;;  %v1170_v49 = vcombine.high %v21_v45, %v21_v45 }
  0x2e   :  { %1343 = vmatprep.subr.bf16.mxu1 %v1467_v52 }
  0x2f   :  { %1322 = vmatpush3.bf16.msra.mxu0 %v1466_v51  ;;  %v1552_v51 = vmov 0.0  }
  0x30   :  { %1323 = vmatprep.subr.bf16.mxu0 %v1469_v54 }
  0x31   :  { %1344 = vmatpush3.bf16.msra.mxu1 %v1468_v53 }
  0x32   :  { %1345 = vmatprep.subr.bf16.mxu1 %v1471_v56 }
  0x33   :  { %1324 = vmatpush3.bf16.msra.mxu0 %v1470_v55 }
  0x34   :  { %1325 = vmatprep.subr.bf16.mxu0 %v1473_v58 }
  0x35   :  { %1346 = vmatpush3.bf16.msra.mxu1 %v1472_v57 }
  0x36   :  { %1347 = vmatprep.subr.bf16.mxu1 %v1475_v60 }
  0x37   :  { %1326 = vmatpush3.bf16.msra.mxu0 %v1474_v59 }
  0x38   :  { %1327 = vmatprep.subr.bf16.mxu0 %v1477_v62 }
  0x39   :  { %1348 = vmatpush3.bf16.msra.mxu1 %v1476_v61 }
  0x3a   :  { %1349 = vmatprep.subr.bf16.mxu1 %v1479_v0 }
  0x3b   :  { %1328 = vmatpush3.bf16.msra.mxu0 %v1478_v63 }
  0x3c   :  { %1329 = vmatprep.subr.bf16.mxu0 %v1481_v2 }
  0x3d   :  { %1350 = vmatpush3.bf16.msra.mxu1 %v1480_v1 }
  0x3e   :  { %1351 = vmatprep.subr.bf16.mxu1 %v1483_v4 }
  0x3f   :  { %1330 = vmatpush3.bf16.msra.mxu0 %v1482_v3 }
  0x40   :  { %1359 = vmatprep.subr.bf16.mxu0 %v1487_v9 }
  0x41   :  { %1352 = vmatpush3.bf16.msra.mxu1 %v1484_v5 }
  0x42   :  { %976 = vmatmul.mubr.bf16.vlgmr.msra.gmra.mrb[4].mxu0 %v1163_v7  ;;  %1381 = vmatprep.subr.bf16.mxu1 %v1491_v14 }
  0x43   :  { %1360 = vmatpush3.bf16.msra.mxu0 %v1490_v13  ;;  %1055 = vmatprep.mubr.bf16.mxu0 %v1168_v47 }
  0x44   :  { %1016 = vmatmul.mubr.bf16.vlgmr.msra.gmra.mrb[4].mxu1 %v1165_v11  ;;  %1361 = vmatprep.subr.bf16.mxu0 %v1493_v16 }
  0x45   :  { %1382 = vmatpush3.bf16.msra.mxu1 %v1492_v15  ;;  %1095 = vmatprep.mubr.bf16.mxu1 %v1170_v49 }
  0x46   :  { %1383 = vmatprep.subr.bf16.mxu1 %v1495_v18 }
  0x47   :  { %1362 = vmatpush3.bf16.msra.mxu0 %v1494_v17 }
  0x48   :  { %1363 = vmatprep.subr.bf16.mxu0 %v1497_v20 }
  0x49   :  { %1384 = vmatpush3.bf16.msra.mxu1 %v1496_v19 }
  0x4a   :  { %1385 = vmatprep.subr.bf16.mxu1 %v1499_v22 }
  0x4b   :  { %1364 = vmatpush3.bf16.msra.mxu0 %v1498_v21 }
  0x4c   :  { %1365 = vmatprep.subr.bf16.mxu0 %v1501_v24 }
  0x4d   :  { %1386 = vmatpush3.bf16.msra.mxu1 %v1500_v23 }
  0x4e   :  { %1387 = vmatprep.subr.bf16.mxu1 %v1503_v26 }
  0x4f   :  { %1366 = vmatpush3.bf16.msra.mxu0 %v1502_v25 }
  0x50   :  { %1367 = vmatprep.subr.bf16.mxu0 %v1505_v28 }
  0x51   :  { %1388 = vmatpush3.bf16.msra.mxu1 %v1504_v27 }
  0x52   :  { %1389 = vmatprep.subr.bf16.mxu1 %v1507_v30 }
  0x53   :  { %1368 = vmatpush3.bf16.msra.mxu0 %v1506_v29 }
  0x54   :  { %1369 = vmatprep.subr.bf16.mxu0 %v1509_v32 }
  0x55   :  { %1390 = vmatpush3.bf16.msra.mxu1 %v1508_v31 }
  0x56   :  { %1391 = vmatprep.subr.bf16.mxu1 %v1511_v34 }
  0x57   :  { %1370 = vmatpush3.bf16.msra.mxu0 %v1510_v33 }
  0x58   :  { %1371 = vmatprep.subr.bf16.mxu0 %v1513_v36 }
  0x59   :  { %1392 = vmatpush3.bf16.msra.mxu1 %v1512_v35 }
  0x5a   :  { %1393 = vmatprep.subr.bf16.mxu1 %v1515_v38 }
  0x5b   :  { %1372 = vmatpush3.bf16.msra.mxu0 %v1514_v37 }
  0x5c   :  { %1373 = vmatprep.subr.bf16.mxu0 %v1517_v40 }
  0x5d   :  { %1394 = vmatpush3.bf16.msra.mxu1 %v1516_v39 }
  0x5e   :  { %1395 = vmatprep.subr.bf16.mxu1 %v1519_v42 }
  0x5f   :  { %1374 = vmatpush3.bf16.msra.mxu0 %v1518_v41 }
  0x60   :  { %1406 = vmatprep.subr.bf16.mxu0 %v1552_v51 }
  0x61   :  { %1396 = vmatpush3.bf16.msra.mxu1 %v1520_v43 }
  0x62   :  { %8 = vsyncpa [#allocation3], 0  ;;  %1056 = vmatmul.mubr.bf16.vlgmr.msra.gmra.mrb[8].mxu0 %v1167_v46  ;;  %v1526_v52 = vld [vmem:[%s1906_s1 + $0x308] sm:$0xff]   ;;  %vm1553_vm0 = vmmov 0   ;;  %v1527_v53 = vld [vmem:[%s1905_s0 + $0x30] ss:$0 sps:$4 sm:$0xff]  }
  0x63   :  { %1407 = vmatpush3.bf16.msra.mxu0 %v1525_v50  ;;  %1410 = vmatprep.mubr.msk.bf16.mxu0 %vm1553_vm0, %v1552_v51  ;;  %vm859_vm1 = vcmask 261120   ;;  %v1158_v55 = vld [vmem:[%s1907_s2] ss:$0 sm:$0xff]  ;;  %s1554_s0 = smov [#allocation2]  }
  0x64   :  { %1096 = vmatmul.mubr.bf16.vlgmr.msra.gmra.mrb[8].mxu1 %v1169_v48  ;;  %1408 = vmatprep.subr.bf16.mxu0 %v1552_v51  ;;  %s1150_s1 = sshll.u32 %s1554_s0, 4  ;;  %s1151_s1 = int_to_ptr.vmem [resolvable:$true] %s1150_s1 }
  0x65   :  { %s1528_s2 = scalar_lea.vmem %s1151_s1, 128  ;;  %p1533_p1 = scmp.lt.s32.totalorder %s1151_s1, %s1151_s1 }
  0x66   :  { %p1529_p0 = scmp.ne.s32.totalorder %s1151_s1, %s1528_s2  ;;  %p1534_p2 = scmp.lt.s32.totalorder %s1528_s2, %s1528_s2 }
  0x67   :  { %1409 = vmatpush3.bf16.msra.mxu0 %v1526_v52 }
  0x68   :  { %p1535_p3 = por %p1534_p2, %p1533_p1 }
  0x6a   :  { %1411 = vmatmul.mubr.msk.bf16.vlgmr.msra.gmra.mrb[12].mxu0 %vm859_vm1, %v1527_v53  ;;  %p1536_p4 = pnand %p1535_p3, %p1529_p0 }
  0xf5   :  { %v1287_v54 = vpop.f32.mrb[0].mxu0 }
  0xf6   :  { %v1288_v56 = vpop.f32.mrb[1].mxu0 }
  0xf7   :  { %v1289_v57 = vadd.f32 %v1288_v56, %v1287_v54  ;;  %v1290_v58 = vpop.f32.mrb[2].mxu0  ;;  %v1309_v59 = vpop.f32.mrb[0].mxu1 }
  0xf8   :  { %v1291_v60 = vpop.f32.mrb[3].mxu0  ;;  %v1310_v61 = vpop.f32.mrb[1].mxu1 }
  0xf9   :  { %v898_v62 = vadd.f32 %v1289_v57, %v1158_v55  ;;  %v1311_v63 = vadd.f32 %v1310_v61, %v1309_v59  ;;  %v1312_v0 = vpop.f32.mrb[2].mxu1 }
  0xfa   :  { %v1313_v1 = vpop.f32.mrb[3].mxu1 }
  0xfb   :  { %v938_v2 = vadd.f32 %v1311_v63, %v898_v62 }
 0x115   :  { %v1331_v3 = vpop.f32.mrb[4].mxu0 }
 0x116   :  { %v1332_v4 = vpop.f32.mrb[5].mxu0 }
 0x117   :  { %v1333_v5 = vadd.f32 %v1332_v4, %v1331_v3  ;;  %v1334_v6 = vpop.f32.mrb[6].mxu0  ;;  %v1353_v7 = vpop.f32.mrb[4].mxu1 }
 0x118   :  { %v1335_v8 = vpop.f32.mrb[7].mxu0  ;;  %v1354_v9 = vpop.f32.mrb[5].mxu1 }
 0x119   :  { %v978_v10 = vadd.f32 %v1333_v5, %v938_v2  ;;  %v1355_v11 = vadd.f32 %v1354_v9, %v1353_v7  ;;  %v1356_v12 = vpop.f32.mrb[6].mxu1 }
 0x11a   :  { %v1357_v13 = vpop.f32.mrb[7].mxu1 }
 0x11b   :  { %v1018_v14 = vadd.f32 %v1355_v11, %v978_v10 }
 0x135   :  { %v1375_v15 = vpop.f32.mrb[8].mxu0 }
 0x136   :  { %v1376_v16 = vpop.f32.mrb[9].mxu0 }
 0x137   :  { %v1397_v17 = vpop.f32.mrb[8].mxu1  ;;  %v1377_v18 = vadd.f32 %v1376_v16, %v1375_v15  ;;  %v1378_v19 = vpop.f32.mrb[10].mxu0 }
 0x138   :  { %v1398_v20 = vpop.f32.mrb[9].mxu1  ;;  %v1379_v22 = vpop.f32.mrb[11].mxu0 }
 0x139   :  { %v1399_v21 = vadd.f32 %v1398_v20, %v1397_v17  ;;  %v1400_v23 = vpop.f32.mrb[10].mxu1  ;;  %v1058_v24 = vadd.f32 %v1377_v18, %v1018_v14 }
 0x13a   :  { %v1401_v25 = vpop.f32.mrb[11].mxu1 }
 0x13b   :  { %v1098_v26 = vadd.f32 %v1399_v21, %v1058_v24 }
 0x13d   :  { %v1137_v27 = vpop.f32.mrb[12].mxu0 }
 0x13e   :  { %v1138_v28 = vadd.f32 %v1137_v27, %v1098_v26  ;;  %v1412_v29 = vpop.f32.mrb[13].mxu0 }
 0x13f   :  { %v1140_v30 = vpop.f32.mrb[14].mxu0 }
 0x140   :  { %1143 = vst [vmem:[#allocation2] sm:$0xff] %v1138_v28  ;;  %v1413_v31 = vpop.f32.mrb[15].mxu0 }
 0x141   :  { %1539 = shalt.err (!%p1536_p4)
}
 0x142   :  { %s1540_s10 = scalar_lea.hbm %s1908_s3, 128 }
 0x143   :  { %p1541_p5 = scmp.ne.s32.totalorder %s1908_s3, %s1540_s10  ;;  %p1544_p6 = scmp.lt.u32.totalorder %s1540_s10, %s1908_s3 }
 0x145   :  { %p1546_p7 = pnand %p1544_p6, %p1541_p5 }
 0x147   :  { %1549 = shalt.err (!%p1546_p7)
}
 0x148   :  { %1153 = dma.vmem_to_hbm [thread:$0]  %s1151_s1, 128, %s1908_s3, [#allocation3]  }
 0x149   :  { %1550 = dma.done.wait [#allocation3], 128  }
 0x14a   :  { %1551 = vsyncadd [#allocation3], 4294967168 }
 0x14b   :  { %1157 = vsyncpa [#allocation3], 1 }

</bundles_post_ra>
